<compile_context>
chip_gen: v5e
topology: v5e:2x2
jax: 0.10.0
libtpu: 0.0.40
codegen_flags: <defaults>
</compile_context>

<pallas_src>
import functools
import math

import jax
import jax.numpy as jnp
from jax.experimental import pallas as pl
from jax.experimental.pallas import tpu as pltpu

LANES = 128

# ----------------------------- network config ------------------------------
INPUT_SHAPE = (3, 29, 29)      # smallest spatial size that survives 3x (k=5, s=2)
FEATURE_MAPS = (16, 32, 64)
KERNEL = 5
STRIDE = 2
HIDDEN = 32
S_SHAPE = 4

H0 = INPUT_SHAPE[1]                         # 29
H1 = (H0 - KERNEL) // STRIDE + 1            # 13
H2 = (H1 - KERNEL) // STRIDE + 1            # 5
H3 = (H2 - KERNEL) // STRIDE + 1            # 1
assert (H1, H2, H3) == (13, 5, 1)

# conv1 phase geometry:  ho = 2*p + rh (p<7), wo = 2*q + rw (q<8); valid ho,wo <= 12
P1, Q1 = 7, 8
M1 = 2 * 2 * P1 * Q1                        # 224 phase-ordered conv1 output rows
K1 = KERNEL * KERNEL * INPUT_SHAPE[0]       # 75 (padded to 128)

# conv2 output rows: (h2 in [0,6), w2 in [0,8)); valid h2,w2 < 5
M2_ROWS, M2_COLS = 6, 8
M2 = M2_ROWS * M2_COLS                      # 48


# ------------------------------ fused kernel -------------------------------

def _fused_kernel(col_ref, w1_ref, b1_ref, w2_ref, b2_ref, w3_ref, b3_ref,
                  wh_ref, bh_ref, wo_ref, bo_ref, out_ref, a1_ref, a2_ref):
    f32 = jnp.float32
    bf16 = jnp.bfloat16

    # -------- conv1: one MXU matmul on the pre-built phase-ordered im2col ----
    col = col_ref[0]                                                # (224, 128) bf16
    z1 = jnp.dot(col, w1_ref[...], preferred_element_type=f32)      # (224, 128) f32
    a1 = jnp.maximum(z1 + b1_ref[...], 0.0)
    # store phase-decomposed: a1_ref[(rh*2+rw), p, q, c] = conv1(2p+rh, 2q+rw, c)
    a1_ref[:, 0:P1, 0:Q1, :] = a1.reshape(4, P1, Q1, LANES)
    # zero the never-written padding regions (keeps everything finite/deterministic)
    a1_ref[:, :, Q1:2 * Q1, :] = jnp.zeros((4, P1 + 1, Q1, LANES), f32)
    a1_ref[:, P1:P1 + 1, 0:Q1, :] = jnp.zeros((4, 1, Q1, LANES), f32)

    # -------- conv2: in-kernel im2col via contiguous slices of phase store ---
    acc2 = jnp.zeros((M2, LANES), f32)
    for i in range(KERNEL):
        for j in range(KERNEL):
            ri, qi = i % 2, i // 2
            rj, qj = j % 2, j // 2
            # rows (h2, w2): conv1 output at (2*h2+i, 2*w2+j) == phase (ri,rj),
            # position (qi+h2, qj+w2)  ->  contiguous slice, no strided access.
            patch = a1_ref[ri * 2 + rj, qi:qi + M2_ROWS, qj:qj + M2_COLS, :]
            lhs = patch.reshape(M2, LANES).astype(bf16)
            acc2 += jnp.dot(lhs, w2_ref[i * KERNEL + j],
                            preferred_element_type=f32)
    a2 = jnp.maximum(acc2 + b2_ref[...], 0.0)                       # (48, 128)
    a2_ref[...] = a2

    # -------- conv3 (5x5 input, 5x5 kernel -> 1x1): full contraction ---------
    # For offset (i,j) the single needed row of a2 is row i*8+j; we load an
    # 8-row window starting there so only accumulator row 0 is meaningful.
    acc3 = jnp.zeros((8, LANES), f32)
    for i in range(KERNEL):
        for j in range(KERNEL):
            r = i * M2_COLS + j
            lhs = a2_ref[r:r + 8, :].astype(bf16)                   # (8, 128)
            acc3 += jnp.dot(lhs, w3_ref[i * KERNEL + j],
                            preferred_element_type=f32)
    a3 = jnp.maximum(acc3 + b3_ref[...], 0.0)                       # row 0 valid

    # -------- head (relu) + out ----------------------------------------------
    h = jnp.maximum(
        jnp.dot(a3.astype(bf16), wh_ref[...], preferred_element_type=f32)
        + bh_ref[...], 0.0)
    o = (jnp.dot(h.astype(bf16), wo_ref[...], preferred_element_type=f32)
         + bo_ref[...])                                             # (8, 128)
    out_ref[...] = o.reshape(1, 8, LANES)                           # row 0 / lanes<4 valid


# --------------------------- parameter preparation --------------------------

def _pad_to(x, shape):
    return jnp.pad(x, [(0, t - s) for s, t in zip(x.shape, shape)])


def prepare_params(params):
    """One-time: transpose / reorder / zero-pad weights to (K,128) MXU layouts,
    cast matmul operands to bf16; biases stay f32 (v5e-friendly elementwise)."""
    p = {}
    w1 = jnp.transpose(params["conv1_w"], (2, 3, 1, 0)).reshape(K1, FEATURE_MAPS[0])
    p["w1"] = _pad_to(w1, (LANES, LANES)).astype(jnp.bfloat16)
    p["b1"] = _pad_to(params["conv1_b"].reshape(1, -1), (1, LANES)).astype(jnp.float32)

    w2 = jnp.transpose(params["conv2_w"], (2, 3, 1, 0)).reshape(
        KERNEL * KERNEL, FEATURE_MAPS[0], FEATURE_MAPS[1])
    p["w2"] = _pad_to(w2, (KERNEL * KERNEL, LANES, LANES)).astype(jnp.bfloat16)
    p["b2"] = _pad_to(params["conv2_b"].reshape(1, -1), (1, LANES)).astype(jnp.float32)

    w3 = jnp.transpose(params["conv3_w"], (2, 3, 1, 0)).reshape(
        KERNEL * KERNEL, FEATURE_MAPS[1], FEATURE_MAPS[2])
    p["w3"] = _pad_to(w3, (KERNEL * KERNEL, LANES, LANES)).astype(jnp.bfloat16)
    p["b3"] = _pad_to(params["conv3_b"].reshape(1, -1), (1, LANES)).astype(jnp.float32)

    p["wh"] = _pad_to(params["head_w"].T, (LANES, LANES)).astype(jnp.bfloat16)
    p["bh"] = _pad_to(params["head_b"].reshape(1, -1), (1, LANES)).astype(jnp.float32)
    p["wo"] = _pad_to(params["out_w"].T, (LANES, LANES)).astype(jnp.bfloat16)
    p["bo"] = _pad_to(params["out_b"].reshape(1, -1), (1, LANES)).astype(jnp.float32)
    return p


# ------------------------------ forward wrapper -----------------------------

def _conv1_im2col_phase(x_nhwc):
    """Build conv1's im2col with rows ordered (rh, rw, p, q) = output phase order,
    so the kernel can store conv1's output phase-decomposed (the thing that makes
    conv2's in-kernel patch extraction purely contiguous)."""
    n = x_nhwc.shape[0]
    hp = 2 * (2 * P1) + KERNEL - 2              # 31
    wp = 2 * (2 * Q1) + KERNEL - 2              # 35
    xp = jnp.pad(x_nhwc, ((0, 0), (0, hp - H0), (0, wp - H0), (0, 0)))
    pats = []
    for i in range(KERNEL):
        for j in range(KERNEL):
            pats.append(jax.lax.slice(
                xp, (0, i, j, 0),
                (n, i + 2 * (2 * P1) - 1, j + 2 * (2 * Q1) - 1, INPUT_SHAPE[0]),
                (1, STRIDE, STRIDE, 1)))        # (n, 14, 16, 3)
    col = jnp.stack(pats, axis=3).reshape(n, 2 * P1, 2 * Q1, K1)
    col = col.reshape(n, P1, 2, Q1, 2, K1).transpose(0, 2, 4, 1, 3, 5)
    col = col.reshape(n, M1, K1)
    col = jnp.pad(col, ((0, 0), (0, 0), (0, LANES - K1)))
    return col.astype(jnp.bfloat16)


@jax.jit
def vanilla_cnn_forward(prep, x_nchw):
    n = x_nchw.shape[0]
    x_nhwc = jnp.transpose(x_nchw, (0, 2, 3, 1)).astype(jnp.float32)
    col = _conv1_im2col_phase(x_nhwc)                                 # (n, 224, 128)

    rep2 = lambda i: (0, 0)
    rep3 = lambda i: (0, 0, 0)
    out = pl.pallas_call(
        _fused_kernel,
        out_shape=jax.ShapeDtypeStruct((n, 8, LANES), jnp.float32),
        grid_spec=pltpu.PrefetchScalarGridSpec(
            num_scalar_prefetch=0,
            grid=(n,),
            in_specs=[
                pl.BlockSpec((1, M1, LANES), lambda i: (i, 0, 0)),     # conv1 im2col
                pl.BlockSpec((LANES, LANES), rep2),                    # w1
                pl.BlockSpec((1, LANES), rep2),                        # b1
                pl.BlockSpec((KERNEL * KERNEL, LANES, LANES), rep3),   # w2
                pl.BlockSpec((1, LANES), rep2),                        # b2
                pl.BlockSpec((KERNEL * KERNEL, LANES, LANES), rep3),   # w3
                pl.BlockSpec((1, LANES), rep2),                        # b3
                pl.BlockSpec((LANES, LANES), rep2),                    # wh
                pl.BlockSpec((1, LANES), rep2),                        # bh
                pl.BlockSpec((LANES, LANES), rep2),                    # wo
                pl.BlockSpec((1, LANES), rep2),                        # bo
            ],
            out_specs=pl.BlockSpec((1, 8, LANES), lambda i: (i, 0, 0)),
            scratch_shapes=[
                pltpu.VMEM((4, P1 + 1, 2 * Q1, LANES), jnp.float32),   # conv1 acts (phase)
                pltpu.VMEM((M2, LANES), jnp.float32),                  # conv2 acts
            ],
        ),
        compiler_params=pltpu.CompilerParams(
            dimension_semantics=("parallel",)),
    )(col, prep["w1"], prep["b1"], prep["w2"], prep["b2"],
      prep["w3"], prep["b3"], prep["wh"], prep["bh"], prep["wo"], prep["bo"])
    return out[:, 0, :S_SHAPE]


# ------------------------------ init & reference ----------------------------

def init_params(key):
    """Deterministic PyTorch-style uniform init (bound = 1/sqrt(fan_in))."""
    def uniform(k, shape, fan_in):
        bound = 1.0 / math.sqrt(fan_in)
        return jax.random.uniform(k, shape, jnp.float32, -bound, bound)

    params = {}
    keys = jax.random.split(key, 10)
    cin = INPUT_SHAPE[0]
    ki = 0
    for li, cout in enumerate(FEATURE_MAPS, 1):
        fan_in = cin * KERNEL * KERNEL
        params[f"conv{li}_w"] = uniform(keys[ki], (cout, cin, KERNEL, KERNEL), fan_in); ki += 1
        params[f"conv{li}_b"] = uniform(keys[ki], (cout,), fan_in); ki += 1
        cin = cout
    n_out = FEATURE_MAPS[-1] * H3 * H3
    params["head_w"] = uniform(keys[ki], (HIDDEN, n_out), n_out); ki += 1
    params["head_b"] = uniform(keys[ki], (HIDDEN,), n_out); ki += 1
    params["out_w"] = uniform(keys[ki], (S_SHAPE, HIDDEN), HIDDEN); ki += 1
    params["out_b"] = uniform(keys[ki], (S_SHAPE,), HIDDEN); ki += 1
    return params


def reference_forward(params, x_nchw):
    dn = ("NCHW", "OIHW", "NCHW")
    x = x_nchw
    for li in (1, 2, 3):
        w = params[f"conv{li}_w"]
        b = params[f"conv{li}_b"]
        x = jax.lax.conv_general_dilated(
            x, w, (STRIDE, STRIDE), "VALID", dimension_numbers=dn,
            precision=jax.lax.Precision.HIGHEST)
        x = jax.nn.relu(x + b[None, :, None, None])
    x = x.reshape(x.shape[0], -1)
    x = jax.nn.relu(
        jnp.dot(x, params["head_w"].T, precision=jax.lax.Precision.HIGHEST)
        + params["head_b"])
    return (jnp.dot(x, params["out_w"].T, precision=jax.lax.Precision.HIGHEST)
            + params["out_b"])


# ----------------------------------- main ------------------------------------

if __name__ == "__main__":
    key = jax.random.PRNGKey(0)
    pkey, xkey = jax.random.split(key)

    batch = 2
    params = init_params(pkey)
    prep = prepare_params(params)                      # one-time layout prep
    x = jax.random.normal(xkey, (batch,) + INPUT_SHAPE, jnp.float32)

    out = jax.block_until_ready(vanilla_cnn_forward(prep, x))
    assert out.shape == (batch, S_SHAPE), out.shape

    ref = jax.block_until_ready(reference_forward(params, x))
    # Expected precision: bf16 MXU operands with f32 accumulation -> ~1e-3-level
    # absolute error vs the f32 HIGHEST-precision reference.
    assert jnp.allclose(out, ref, rtol=5e-2, atol=2e-2), (out, ref)

    print("KERNEL_OK")
</pallas_src>

<mosaic_0001>
module attributes {stable_mosaic.version = 11 : i64} {
  func.func @_fused_kernel(%arg0: i32, %arg1: memref<1x224x128xbf16, #tpu.memory_space<vmem>>, %arg2: memref<128x128xbf16, #tpu.memory_space<vmem>>, %arg3: memref<1x128xf32, #tpu.memory_space<vmem>>, %arg4: memref<25x128x128xbf16, #tpu.memory_space<vmem>>, %arg5: memref<1x128xf32, #tpu.memory_space<vmem>>, %arg6: memref<25x128x128xbf16, #tpu.memory_space<vmem>>, %arg7: memref<1x128xf32, #tpu.memory_space<vmem>>, %arg8: memref<128x128xbf16, #tpu.memory_space<vmem>>, %arg9: memref<1x128xf32, #tpu.memory_space<vmem>>, %arg10: memref<128x128xbf16, #tpu.memory_space<vmem>>, %arg11: memref<1x128xf32, #tpu.memory_space<vmem>>, %arg12: memref<1x8x128xf32, #tpu.memory_space<vmem>>, %arg13: memref<4x8x16x128xf32, #tpu.memory_space<vmem>>, %arg14: memref<48x128xf32, #tpu.memory_space<vmem>>) attributes {dimension_semantics = [#tpu.dimension_semantics<parallel>], iteration_bounds = array<i64: 2>, scalar_prefetch = 0 : i64, scratch_operands = 2 : i64, tpu.core_type = #tpu.core_type<tc>, window_params = [{transform_indices = @transform_0, window_bounds = array<i64: 1, 224, 128>}, {pipeline_mode = #tpu.pipeline_mode<synchronous>, transform_indices = @transform_1, window_bounds = array<i64: 128, 128>}, {pipeline_mode = #tpu.pipeline_mode<synchronous>, transform_indices = @transform_2, window_bounds = array<i64: 1, 128>}, {pipeline_mode = #tpu.pipeline_mode<synchronous>, transform_indices = @transform_3, window_bounds = array<i64: 25, 128, 128>}, {pipeline_mode = #tpu.pipeline_mode<synchronous>, transform_indices = @transform_4, window_bounds = array<i64: 1, 128>}, {pipeline_mode = #tpu.pipeline_mode<synchronous>, transform_indices = @transform_5, window_bounds = array<i64: 25, 128, 128>}, {pipeline_mode = #tpu.pipeline_mode<synchronous>, transform_indices = @transform_6, window_bounds = array<i64: 1, 128>}, {pipeline_mode = #tpu.pipeline_mode<synchronous>, transform_indices = @transform_7, window_bounds = array<i64: 128, 128>}, {pipeline_mode = #tpu.pipeline_mode<synchronous>, transform_indices = @transform_8, window_bounds = array<i64: 1, 128>}, {pipeline_mode = #tpu.pipeline_mode<synchronous>, transform_indices = @transform_9, window_bounds = array<i64: 128, 128>}, {pipeline_mode = #tpu.pipeline_mode<synchronous>, transform_indices = @transform_10, window_bounds = array<i64: 1, 128>}, {transform_indices = @transform_11, window_bounds = array<i64: 1, 8, 128>}]} {
    %c0 = arith.constant 0 : index
    %c0_0 = arith.constant 0 : index
    %c0_1 = arith.constant 0 : index
    %0 = vector.load %arg1[%c0, %c0_0, %c0_1] : memref<1x224x128xbf16, #tpu.memory_space<vmem>>, vector<1x224x128xbf16>
    %1 = vector.shape_cast %0 : vector<1x224x128xbf16> to vector<224x128xbf16>
    %c0_2 = arith.constant 0 : index
    %c0_3 = arith.constant 0 : index
    %2 = vector.load %arg2[%c0_2, %c0_3] : memref<128x128xbf16, #tpu.memory_space<vmem>>, vector<128x128xbf16>
    %cst = arith.constant dense<0.000000e+00> : vector<224x128xf32>
    %3 = tpu.matmul %1, %2, %cst {dimension_numbers = #tpu.dot_dimension_numbers<[1], [0], [0], [1], [0, 0, 1, 1], [], []>} : vector<224x128xbf16>, vector<128x128xbf16>, vector<224x128xf32> -> vector<224x128xf32>
    %c0_4 = arith.constant 0 : index
    %c0_5 = arith.constant 0 : index
    %4 = vector.load %arg3[%c0_4, %c0_5] : memref<1x128xf32, #tpu.memory_space<vmem>>, vector<1x128xf32>
    %5 = vector.broadcast %4 : vector<1x128xf32> to vector<224x128xf32>
    %6 = arith.addf %3, %5 : vector<224x128xf32>
    %cst_6 = arith.constant 0.000000e+00 : f32
    %7 = vector.broadcast %cst_6 : f32 to vector<224x128xf32>
    %8 = arith.maximumf %6, %7 : vector<224x128xf32>
    %9 = vector.shape_cast %8 : vector<224x128xf32> to vector<4x7x8x128xf32>
    %c0_7 = arith.constant 0 : index
    %c0_8 = arith.constant 0 : index
    %c0_9 = arith.constant 0 : index
    %c0_10 = arith.constant 0 : index
    %10 = vector.load %arg13[%c0_7, %c0_8, %c0_9, %c0_10] : memref<4x8x16x128xf32, #tpu.memory_space<vmem>>, vector<4x7x8x128xf32>
    tpu.vector_store %arg13[%c0_7, %c0_8, %c0_9, %c0_10], %9 {strides = array<i32>} : memref<4x8x16x128xf32, #tpu.memory_space<vmem>>, vector<4x7x8x128xf32>,
    %cst_11 = arith.constant 0.000000e+00 : f32
    %11 = vector.broadcast %cst_11 : f32 to vector<4x8x8x128xf32>
    %c0_12 = arith.constant 0 : index
    %c0_13 = arith.constant 0 : index
    %c8 = arith.constant 8 : index
    %c0_14 = arith.constant 0 : index
    %12 = vector.load %arg13[%c0_12, %c0_13, %c8, %c0_14] : memref<4x8x16x128xf32, #tpu.memory_space<vmem>>, vector<4x8x8x128xf32>
    tpu.vector_store %arg13[%c0_12, %c0_13, %c8, %c0_14], %11 {strides = array<i32>} : memref<4x8x16x128xf32, #tpu.memory_space<vmem>>, vector<4x8x8x128xf32>,
    %cst_15 = arith.constant 0.000000e+00 : f32
    %13 = vector.broadcast %cst_15 : f32 to vector<4x1x8x128xf32>
    %c0_16 = arith.constant 0 : index
    %c7 = arith.constant 7 : index
    %c0_17 = arith.constant 0 : index
    %c0_18 = arith.constant 0 : index
    %14 = vector.load %arg13[%c0_16, %c7, %c0_17, %c0_18] : memref<4x8x16x128xf32, #tpu.memory_space<vmem>>, vector<4x1x8x128xf32>
    tpu.vector_store %arg13[%c0_16, %c7, %c0_17, %c0_18], %13 {strides = array<i32>} : memref<4x8x16x128xf32, #tpu.memory_space<vmem>>, vector<4x1x8x128xf32>,
    %cst_19 = arith.constant 0.000000e+00 : f32
    %15 = vector.broadcast %cst_19 : f32 to vector<48x128xf32>
    %c0_20 = arith.constant 0 : index
    %c0_21 = arith.constant 0 : index
    %c0_22 = arith.constant 0 : index
    %c0_23 = arith.constant 0 : index
    %16 = vector.load %arg13[%c0_20, %c0_21, %c0_22, %c0_23] : memref<4x8x16x128xf32, #tpu.memory_space<vmem>>, vector<1x6x8x128xf32>
    %17 = vector.shape_cast %16 : vector<1x6x8x128xf32> to vector<6x8x128xf32>
    %18 = vector.shape_cast %17 : vector<6x8x128xf32> to vector<48x128xf32>
    %19 = arith.truncf %18 : vector<48x128xf32> to vector<48x128xbf16>
    %c0_24 = arith.constant 0 : index
    %c0_25 = arith.constant 0 : index
    %c0_26 = arith.constant 0 : index
    %20 = vector.load %arg4[%c0_24, %c0_25, %c0_26] : memref<25x128x128xbf16, #tpu.memory_space<vmem>>, vector<1x128x128xbf16>
    %21 = vector.shape_cast %20 : vector<1x128x128xbf16> to vector<128x128xbf16>
    %cst_27 = arith.constant dense<0.000000e+00> : vector<48x128xf32>
    %22 = tpu.matmul %19, %21, %cst_27 {dimension_numbers = #tpu.dot_dimension_numbers<[1], [0], [0], [1], [0, 0, 1, 1], [], []>} : vector<48x128xbf16>, vector<128x128xbf16>, vector<48x128xf32> -> vector<48x128xf32>
    %23 = arith.addf %15, %22 : vector<48x128xf32>
    %c1 = arith.constant 1 : index
    %c0_28 = arith.constant 0 : index
    %c0_29 = arith.constant 0 : index
    %c0_30 = arith.constant 0 : index
    %24 = vector.load %arg13[%c1, %c0_28, %c0_29, %c0_30] : memref<4x8x16x128xf32, #tpu.memory_space<vmem>>, vector<1x6x8x128xf32>
    %25 = vector.shape_cast %24 : vector<1x6x8x128xf32> to vector<6x8x128xf32>
    %26 = vector.shape_cast %25 : vector<6x8x128xf32> to vector<48x128xf32>
    %27 = arith.truncf %26 : vector<48x128xf32> to vector<48x128xbf16>
    %c1_31 = arith.constant 1 : index
    %c0_32 = arith.constant 0 : index
    %c0_33 = arith.constant 0 : index
    %28 = vector.load %arg4[%c1_31, %c0_32, %c0_33] : memref<25x128x128xbf16, #tpu.memory_space<vmem>>, vector<1x128x128xbf16>
    %29 = vector.shape_cast %28 : vector<1x128x128xbf16> to vector<128x128xbf16>
    %cst_34 = arith.constant dense<0.000000e+00> : vector<48x128xf32>
    %30 = tpu.matmul %27, %29, %cst_34 {dimension_numbers = #tpu.dot_dimension_numbers<[1], [0], [0], [1], [0, 0, 1, 1], [], []>} : vector<48x128xbf16>, vector<128x128xbf16>, vector<48x128xf32> -> vector<48x128xf32>
    %31 = arith.addf %23, %30 : vector<48x128xf32>
    %c0_35 = arith.constant 0 : index
    %c0_36 = arith.constant 0 : index
    %c1_37 = arith.constant 1 : index
    %c0_38 = arith.constant 0 : index
    %32 = vector.load %arg13[%c0_35, %c0_36, %c1_37, %c0_38] : memref<4x8x16x128xf32, #tpu.memory_space<vmem>>, vector<1x6x8x128xf32>
    %33 = vector.shape_cast %32 : vector<1x6x8x128xf32> to vector<6x8x128xf32>
    %34 = vector.shape_cast %33 : vector<6x8x128xf32> to vector<48x128xf32>
    %35 = arith.truncf %34 : vector<48x128xf32> to vector<48x128xbf16>
    %c2 = arith.constant 2 : index
    %c0_39 = arith.constant 0 : index
    %c0_40 = arith.constant 0 : index
    %36 = vector.load %arg4[%c2, %c0_39, %c0_40] : memref<25x128x128xbf16, #tpu.memory_space<vmem>>, vector<1x128x128xbf16>
    %37 = vector.shape_cast %36 : vector<1x128x128xbf16> to vector<128x128xbf16>
    %cst_41 = arith.constant dense<0.000000e+00> : vector<48x128xf32>
    %38 = tpu.matmul %35, %37, %cst_41 {dimension_numbers = #tpu.dot_dimension_numbers<[1], [0], [0], [1], [0, 0, 1, 1], [], []>} : vector<48x128xbf16>, vector<128x128xbf16>, vector<48x128xf32> -> vector<48x128xf32>
    %39 = arith.addf %31, %38 : vector<48x128xf32>
    %c1_42 = arith.constant 1 : index
    %c0_43 = arith.constant 0 : index
    %c1_44 = arith.constant 1 : index
    %c0_45 = arith.constant 0 : index
    %40 = vector.load %arg13[%c1_42, %c0_43, %c1_44, %c0_45] : memref<4x8x16x128xf32, #tpu.memory_space<vmem>>, vector<1x6x8x128xf32>
    %41 = vector.shape_cast %40 : vector<1x6x8x128xf32> to vector<6x8x128xf32>
    %42 = vector.shape_cast %41 : vector<6x8x128xf32> to vector<48x128xf32>
    %43 = arith.truncf %42 : vector<48x128xf32> to vector<48x128xbf16>
    %c3 = arith.constant 3 : index
    %c0_46 = arith.constant 0 : index
    %c0_47 = arith.constant 0 : index
    %44 = vector.load %arg4[%c3, %c0_46, %c0_47] : memref<25x128x128xbf16, #tpu.memory_space<vmem>>, vector<1x128x128xbf16>
    %45 = vector.shape_cast %44 : vector<1x128x128xbf16> to vector<128x128xbf16>
    %cst_48 = arith.constant dense<0.000000e+00> : vector<48x128xf32>
    %46 = tpu.matmul %43, %45, %cst_48 {dimension_numbers = #tpu.dot_dimension_numbers<[1], [0], [0], [1], [0, 0, 1, 1], [], []>} : vector<48x128xbf16>, vector<128x128xbf16>, vector<48x128xf32> -> vector<48x128xf32>
    %47 = arith.addf %39, %46 : vector<48x128xf32>
    %c0_49 = arith.constant 0 : index
    %c0_50 = arith.constant 0 : index
    %c2_51 = arith.constant 2 : index
    %c0_52 = arith.constant 0 : index
    %48 = vector.load %arg13[%c0_49, %c0_50, %c2_51, %c0_52] : memref<4x8x16x128xf32, #tpu.memory_space<vmem>>, vector<1x6x8x128xf32>
    %49 = vector.shape_cast %48 : vector<1x6x8x128xf32> to vector<6x8x128xf32>
    %50 = vector.shape_cast %49 : vector<6x8x128xf32> to vector<48x128xf32>
    %51 = arith.truncf %50 : vector<48x128xf32> to vector<48x128xbf16>
    %c4 = arith.constant 4 : index
    %c0_53 = arith.constant 0 : index
    %c0_54 = arith.constant 0 : index
    %52 = vector.load %arg4[%c4, %c0_53, %c0_54] : memref<25x128x128xbf16, #tpu.memory_space<vmem>>, vector<1x128x128xbf16>
    %53 = vector.shape_cast %52 : vector<1x128x128xbf16> to vector<128x128xbf16>
    %cst_55 = arith.constant dense<0.000000e+00> : vector<48x128xf32>
    %54 = tpu.matmul %51, %53, %cst_55 {dimension_numbers = #tpu.dot_dimension_numbers<[1], [0], [0], [1], [0, 0, 1, 1], [], []>} : vector<48x128xbf16>, vector<128x128xbf16>, vector<48x128xf32> -> vector<48x128xf32>
    %55 = arith.addf %47, %54 : vector<48x128xf32>
    %c2_56 = arith.constant 2 : index
    %c0_57 = arith.constant 0 : index
    %c0_58 = arith.constant 0 : index
    %c0_59 = arith.constant 0 : index
    %56 = vector.load %arg13[%c2_56, %c0_57, %c0_58, %c0_59] : memref<4x8x16x128xf32, #tpu.memory_space<vmem>>, vector<1x6x8x128xf32>
    %57 = vector.shape_cast %56 : vector<1x6x8x128xf32> to vector<6x8x128xf32>
    %58 = vector.shape_cast %57 : vector<6x8x128xf32> to vector<48x128xf32>
    %59 = arith.truncf %58 : vector<48x128xf32> to vector<48x128xbf16>
    %c5 = arith.constant 5 : index
    %c0_60 = arith.constant 0 : index
    %c0_61 = arith.constant 0 : index
    %60 = vector.load %arg4[%c5, %c0_60, %c0_61] : memref<25x128x128xbf16, #tpu.memory_space<vmem>>, vector<1x128x128xbf16>
    %61 = vector.shape_cast %60 : vector<1x128x128xbf16> to vector<128x128xbf16>
    %cst_62 = arith.constant dense<0.000000e+00> : vector<48x128xf32>
    %62 = tpu.matmul %59, %61, %cst_62 {dimension_numbers = #tpu.dot_dimension_numbers<[1], [0], [0], [1], [0, 0, 1, 1], [], []>} : vector<48x128xbf16>, vector<128x128xbf16>, vector<48x128xf32> -> vector<48x128xf32>
    %63 = arith.addf %55, %62 : vector<48x128xf32>
    %c3_63 = arith.constant 3 : index
    %c0_64 = arith.constant 0 : index
    %c0_65 = arith.constant 0 : index
    %c0_66 = arith.constant 0 : index
    %64 = vector.load %arg13[%c3_63, %c0_64, %c0_65, %c0_66] : memref<4x8x16x128xf32, #tpu.memory_space<vmem>>, vector<1x6x8x128xf32>
    %65 = vector.shape_cast %64 : vector<1x6x8x128xf32> to vector<6x8x128xf32>
    %66 = vector.shape_cast %65 : vector<6x8x128xf32> to vector<48x128xf32>
    %67 = arith.truncf %66 : vector<48x128xf32> to vector<48x128xbf16>
    %c6 = arith.constant 6 : index
    %c0_67 = arith.constant 0 : index
    %c0_68 = arith.constant 0 : index
    %68 = vector.load %arg4[%c6, %c0_67, %c0_68] : memref<25x128x128xbf16, #tpu.memory_space<vmem>>, vector<1x128x128xbf16>
    %69 = vector.shape_cast %68 : vector<1x128x128xbf16> to vector<128x128xbf16>
    %cst_69 = arith.constant dense<0.000000e+00> : vector<48x128xf32>
    %70 = tpu.matmul %67, %69, %cst_69 {dimension_numbers = #tpu.dot_dimension_numbers<[1], [0], [0], [1], [0, 0, 1, 1], [], []>} : vector<48x128xbf16>, vector<128x128xbf16>, vector<48x128xf32> -> vector<48x128xf32>
    %71 = arith.addf %63, %70 : vector<48x128xf32>
    %c2_70 = arith.constant 2 : index
    %c0_71 = arith.constant 0 : index
    %c1_72 = arith.constant 1 : index
    %c0_73 = arith.constant 0 : index
    %72 = vector.load %arg13[%c2_70, %c0_71, %c1_72, %c0_73] : memref<4x8x16x128xf32, #tpu.memory_space<vmem>>, vector<1x6x8x128xf32>
    %73 = vector.shape_cast %72 : vector<1x6x8x128xf32> to vector<6x8x128xf32>
    %74 = vector.shape_cast %73 : vector<6x8x128xf32> to vector<48x128xf32>
    %75 = arith.truncf %74 : vector<48x128xf32> to vector<48x128xbf16>
    %c7_74 = arith.constant 7 : index
    %c0_75 = arith.constant 0 : index
    %c0_76 = arith.constant 0 : index
    %76 = vector.load %arg4[%c7_74, %c0_75, %c0_76] : memref<25x128x128xbf16, #tpu.memory_space<vmem>>, vector<1x128x128xbf16>
    %77 = vector.shape_cast %76 : vector<1x128x128xbf16> to vector<128x128xbf16>
    %cst_77 = arith.constant dense<0.000000e+00> : vector<48x128xf32>
    %78 = tpu.matmul %75, %77, %cst_77 {dimension_numbers = #tpu.dot_dimension_numbers<[1], [0], [0], [1], [0, 0, 1, 1], [], []>} : vector<48x128xbf16>, vector<128x128xbf16>, vector<48x128xf32> -> vector<48x128xf32>
    %79 = arith.addf %71, %78 : vector<48x128xf32>
    %c3_78 = arith.constant 3 : index
    %c0_79 = arith.constant 0 : index
    %c1_80 = arith.constant 1 : index
    %c0_81 = arith.constant 0 : index
    %80 = vector.load %arg13[%c3_78, %c0_79, %c1_80, %c0_81] : memref<4x8x16x128xf32, #tpu.memory_space<vmem>>, vector<1x6x8x128xf32>
    %81 = vector.shape_cast %80 : vector<1x6x8x128xf32> to vector<6x8x128xf32>
    %82 = vector.shape_cast %81 : vector<6x8x128xf32> to vector<48x128xf32>
    %83 = arith.truncf %82 : vector<48x128xf32> to vector<48x128xbf16>
    %c8_82 = arith.constant 8 : index
    %c0_83 = arith.constant 0 : index
    %c0_84 = arith.constant 0 : index
    %84 = vector.load %arg4[%c8_82, %c0_83, %c0_84] : memref<25x128x128xbf16, #tpu.memory_space<vmem>>, vector<1x128x128xbf16>
    %85 = vector.shape_cast %84 : vector<1x128x128xbf16> to vector<128x128xbf16>
    %cst_85 = arith.constant dense<0.000000e+00> : vector<48x128xf32>
    %86 = tpu.matmul %83, %85, %cst_85 {dimension_numbers = #tpu.dot_dimension_numbers<[1], [0], [0], [1], [0, 0, 1, 1], [], []>} : vector<48x128xbf16>, vector<128x128xbf16>, vector<48x128xf32> -> vector<48x128xf32>
    %87 = arith.addf %79, %86 : vector<48x128xf32>
    %c2_86 = arith.constant 2 : index
    %c0_87 = arith.constant 0 : index
    %c2_88 = arith.constant 2 : index
    %c0_89 = arith.constant 0 : index
    %88 = vector.load %arg13[%c2_86, %c0_87, %c2_88, %c0_89] : memref<4x8x16x128xf32, #tpu.memory_space<vmem>>, vector<1x6x8x128xf32>
    %89 = vector.shape_cast %88 : vector<1x6x8x128xf32> to vector<6x8x128xf32>
    %90 = vector.shape_cast %89 : vector<6x8x128xf32> to vector<48x128xf32>
    %91 = arith.truncf %90 : vector<48x128xf32> to vector<48x128xbf16>
    %c9 = arith.constant 9 : index
    %c0_90 = arith.constant 0 : index
    %c0_91 = arith.constant 0 : index
    %92 = vector.load %arg4[%c9, %c0_90, %c0_91] : memref<25x128x128xbf16, #tpu.memory_space<vmem>>, vector<1x128x128xbf16>
    %93 = vector.shape_cast %92 : vector<1x128x128xbf16> to vector<128x128xbf16>
    %cst_92 = arith.constant dense<0.000000e+00> : vector<48x128xf32>
    %94 = tpu.matmul %91, %93, %cst_92 {dimension_numbers = #tpu.dot_dimension_numbers<[1], [0], [0], [1], [0, 0, 1, 1], [], []>} : vector<48x128xbf16>, vector<128x128xbf16>, vector<48x128xf32> -> vector<48x128xf32>
    %95 = arith.addf %87, %94 : vector<48x128xf32>
    %c0_93 = arith.constant 0 : index
    %c1_94 = arith.constant 1 : index
    %c0_95 = arith.constant 0 : index
    %c0_96 = arith.constant 0 : index
    %96 = vector.load %arg13[%c0_93, %c1_94, %c0_95, %c0_96] : memref<4x8x16x128xf32, #tpu.memory_space<vmem>>, vector<1x6x8x128xf32>
    %97 = vector.shape_cast %96 : vector<1x6x8x128xf32> to vector<6x8x128xf32>
    %98 = vector.shape_cast %97 : vector<6x8x128xf32> to vector<48x128xf32>
    %99 = arith.truncf %98 : vector<48x128xf32> to vector<48x128xbf16>
    %c10 = arith.constant 10 : index
    %c0_97 = arith.constant 0 : index
    %c0_98 = arith.constant 0 : index
    %100 = vector.load %arg4[%c10, %c0_97, %c0_98] : memref<25x128x128xbf16, #tpu.memory_space<vmem>>, vector<1x128x128xbf16>
    %101 = vector.shape_cast %100 : vector<1x128x128xbf16> to vector<128x128xbf16>
    %cst_99 = arith.constant dense<0.000000e+00> : vector<48x128xf32>
    %102 = tpu.matmul %99, %101, %cst_99 {dimension_numbers = #tpu.dot_dimension_numbers<[1], [0], [0], [1], [0, 0, 1, 1], [], []>} : vector<48x128xbf16>, vector<128x128xbf16>, vector<48x128xf32> -> vector<48x128xf32>
    %103 = arith.addf %95, %102 : vector<48x128xf32>
    %c1_100 = arith.constant 1 : index
    %c1_101 = arith.constant 1 : index
    %c0_102 = arith.constant 0 : index
    %c0_103 = arith.constant 0 : index
    %104 = vector.load %arg13[%c1_100, %c1_101, %c0_102, %c0_103] : memref<4x8x16x128xf32, #tpu.memory_space<vmem>>, vector<1x6x8x128xf32>
    %105 = vector.shape_cast %104 : vector<1x6x8x128xf32> to vector<6x8x128xf32>
    %106 = vector.shape_cast %105 : vector<6x8x128xf32> to vector<48x128xf32>
    %107 = arith.truncf %106 : vector<48x128xf32> to vector<48x128xbf16>
    %c11 = arith.constant 11 : index
    %c0_104 = arith.constant 0 : index
    %c0_105 = arith.constant 0 : index
    %108 = vector.load %arg4[%c11, %c0_104, %c0_105] : memref<25x128x128xbf16, #tpu.memory_space<vmem>>, vector<1x128x128xbf16>
    %109 = vector.shape_cast %108 : vector<1x128x128xbf16> to vector<128x128xbf16>
    %cst_106 = arith.constant dense<0.000000e+00> : vector<48x128xf32>
    %110 = tpu.matmul %107, %109, %cst_106 {dimension_numbers = #tpu.dot_dimension_numbers<[1], [0], [0], [1], [0, 0, 1, 1], [], []>} : vector<48x128xbf16>, vector<128x128xbf16>, vector<48x128xf32> -> vector<48x128xf32>
    %111 = arith.addf %103, %110 : vector<48x128xf32>
    %c0_107 = arith.constant 0 : index
    %c1_108 = arith.constant 1 : index
    %c1_109 = arith.constant 1 : index
    %c0_110 = arith.constant 0 : index
    %112 = vector.load %arg13[%c0_107, %c1_108, %c1_109, %c0_110] : memref<4x8x16x128xf32, #tpu.memory_space<vmem>>, vector<1x6x8x128xf32>
    %113 = vector.shape_cast %112 : vector<1x6x8x128xf32> to vector<6x8x128xf32>
    %114 = vector.shape_cast %113 : vector<6x8x128xf32> to vector<48x128xf32>
    %115 = arith.truncf %114 : vector<48x128xf32> to vector<48x128xbf16>
    %c12 = arith.constant 12 : index
    %c0_111 = arith.constant 0 : index
    %c0_112 = arith.constant 0 : index
    %116 = vector.load %arg4[%c12, %c0_111, %c0_112] : memref<25x128x128xbf16, #tpu.memory_space<vmem>>, vector<1x128x128xbf16>
    %117 = vector.shape_cast %116 : vector<1x128x128xbf16> to vector<128x128xbf16>
    %cst_113 = arith.constant dense<0.000000e+00> : vector<48x128xf32>
    %118 = tpu.matmul %115, %117, %cst_113 {dimension_numbers = #tpu.dot_dimension_numbers<[1], [0], [0], [1], [0, 0, 1, 1], [], []>} : vector<48x128xbf16>, vector<128x128xbf16>, vector<48x128xf32> -> vector<48x128xf32>
    %119 = arith.addf %111, %118 : vector<48x128xf32>
    %c1_114 = arith.constant 1 : index
    %c1_115 = arith.constant 1 : index
    %c1_116 = arith.constant 1 : index
    %c0_117 = arith.constant 0 : index
    %120 = vector.load %arg13[%c1_114, %c1_115, %c1_116, %c0_117] : memref<4x8x16x128xf32, #tpu.memory_space<vmem>>, vector<1x6x8x128xf32>
    %121 = vector.shape_cast %120 : vector<1x6x8x128xf32> to vector<6x8x128xf32>
    %122 = vector.shape_cast %121 : vector<6x8x128xf32> to vector<48x128xf32>
    %123 = arith.truncf %122 : vector<48x128xf32> to vector<48x128xbf16>
    %c13 = arith.constant 13 : index
    %c0_118 = arith.constant 0 : index
    %c0_119 = arith.constant 0 : index
    %124 = vector.load %arg4[%c13, %c0_118, %c0_119] : memref<25x128x128xbf16, #tpu.memory_space<vmem>>, vector<1x128x128xbf16>
    %125 = vector.shape_cast %124 : vector<1x128x128xbf16> to vector<128x128xbf16>
    %cst_120 = arith.constant dense<0.000000e+00> : vector<48x128xf32>
    %126 = tpu.matmul %123, %125, %cst_120 {dimension_numbers = #tpu.dot_dimension_numbers<[1], [0], [0], [1], [0, 0, 1, 1], [], []>} : vector<48x128xbf16>, vector<128x128xbf16>, vector<48x128xf32> -> vector<48x128xf32>
    %127 = arith.addf %119, %126 : vector<48x128xf32>
    %c0_121 = arith.constant 0 : index
    %c1_122 = arith.constant 1 : index
    %c2_123 = arith.constant 2 : index
    %c0_124 = arith.constant 0 : index
    %128 = vector.load %arg13[%c0_121, %c1_122, %c2_123, %c0_124] : memref<4x8x16x128xf32, #tpu.memory_space<vmem>>, vector<1x6x8x128xf32>
    %129 = vector.shape_cast %128 : vector<1x6x8x128xf32> to vector<6x8x128xf32>
    %130 = vector.shape_cast %129 : vector<6x8x128xf32> to vector<48x128xf32>
    %131 = arith.truncf %130 : vector<48x128xf32> to vector<48x128xbf16>
    %c14 = arith.constant 14 : index
    %c0_125 = arith.constant 0 : index
    %c0_126 = arith.constant 0 : index
    %132 = vector.load %arg4[%c14, %c0_125, %c0_126] : memref<25x128x128xbf16, #tpu.memory_space<vmem>>, vector<1x128x128xbf16>
    %133 = vector.shape_cast %132 : vector<1x128x128xbf16> to vector<128x128xbf16>
    %cst_127 = arith.constant dense<0.000000e+00> : vector<48x128xf32>
    %134 = tpu.matmul %131, %133, %cst_127 {dimension_numbers = #tpu.dot_dimension_numbers<[1], [0], [0], [1], [0, 0, 1, 1], [], []>} : vector<48x128xbf16>, vector<128x128xbf16>, vector<48x128xf32> -> vector<48x128xf32>
    %135 = arith.addf %127, %134 : vector<48x128xf32>
    %c2_128 = arith.constant 2 : index
    %c1_129 = arith.constant 1 : index
    %c0_130 = arith.constant 0 : index
    %c0_131 = arith.constant 0 : index
    %136 = vector.load %arg13[%c2_128, %c1_129, %c0_130, %c0_131] : memref<4x8x16x128xf32, #tpu.memory_space<vmem>>, vector<1x6x8x128xf32>
    %137 = vector.shape_cast %136 : vector<1x6x8x128xf32> to vector<6x8x128xf32>
    %138 = vector.shape_cast %137 : vector<6x8x128xf32> to vector<48x128xf32>
    %139 = arith.truncf %138 : vector<48x128xf32> to vector<48x128xbf16>
    %c15 = arith.constant 15 : index
    %c0_132 = arith.constant 0 : index
    %c0_133 = arith.constant 0 : index
    %140 = vector.load %arg4[%c15, %c0_132, %c0_133] : memref<25x128x128xbf16, #tpu.memory_space<vmem>>, vector<1x128x128xbf16>
    %141 = vector.shape_cast %140 : vector<1x128x128xbf16> to vector<128x128xbf16>
    %cst_134 = arith.constant dense<0.000000e+00> : vector<48x128xf32>
    %142 = tpu.matmul %139, %141, %cst_134 {dimension_numbers = #tpu.dot_dimension_numbers<[1], [0], [0], [1], [0, 0, 1, 1], [], []>} : vector<48x128xbf16>, vector<128x128xbf16>, vector<48x128xf32> -> vector<48x128xf32>
    %143 = arith.addf %135, %142 : vector<48x128xf32>
    %c3_135 = arith.constant 3 : index
    %c1_136 = arith.constant 1 : index
    %c0_137 = arith.constant 0 : index
    %c0_138 = arith.constant 0 : index
    %144 = vector.load %arg13[%c3_135, %c1_136, %c0_137, %c0_138] : memref<4x8x16x128xf32, #tpu.memory_space<vmem>>, vector<1x6x8x128xf32>
    %145 = vector.shape_cast %144 : vector<1x6x8x128xf32> to vector<6x8x128xf32>
    %146 = vector.shape_cast %145 : vector<6x8x128xf32> to vector<48x128xf32>
    %147 = arith.truncf %146 : vector<48x128xf32> to vector<48x128xbf16>
    %c16 = arith.constant 16 : index
    %c0_139 = arith.constant 0 : index
    %c0_140 = arith.constant 0 : index
    %148 = vector.load %arg4[%c16, %c0_139, %c0_140] : memref<25x128x128xbf16, #tpu.memory_space<vmem>>, vector<1x128x128xbf16>
    %149 = vector.shape_cast %148 : vector<1x128x128xbf16> to vector<128x128xbf16>
    %cst_141 = arith.constant dense<0.000000e+00> : vector<48x128xf32>
    %150 = tpu.matmul %147, %149, %cst_141 {dimension_numbers = #tpu.dot_dimension_numbers<[1], [0], [0], [1], [0, 0, 1, 1], [], []>} : vector<48x128xbf16>, vector<128x128xbf16>, vector<48x128xf32> -> vector<48x128xf32>
    %151 = arith.addf %143, %150 : vector<48x128xf32>
    %c2_142 = arith.constant 2 : index
    %c1_143 = arith.constant 1 : index
    %c1_144 = arith.constant 1 : index
    %c0_145 = arith.constant 0 : index
    %152 = vector.load %arg13[%c2_142, %c1_143, %c1_144, %c0_145] : memref<4x8x16x128xf32, #tpu.memory_space<vmem>>, vector<1x6x8x128xf32>
    %153 = vector.shape_cast %152 : vector<1x6x8x128xf32> to vector<6x8x128xf32>
    %154 = vector.shape_cast %153 : vector<6x8x128xf32> to vector<48x128xf32>
    %155 = arith.truncf %154 : vector<48x128xf32> to vector<48x128xbf16>
    %c17 = arith.constant 17 : index
    %c0_146 = arith.constant 0 : index
    %c0_147 = arith.constant 0 : index
    %156 = vector.load %arg4[%c17, %c0_146, %c0_147] : memref<25x128x128xbf16, #tpu.memory_space<vmem>>, vector<1x128x128xbf16>
    %157 = vector.shape_cast %156 : vector<1x128x128xbf16> to vector<128x128xbf16>
    %cst_148 = arith.constant dense<0.000000e+00> : vector<48x128xf32>
    %158 = tpu.matmul %155, %157, %cst_148 {dimension_numbers = #tpu.dot_dimension_numbers<[1], [0], [0], [1], [0, 0, 1, 1], [], []>} : vector<48x128xbf16>, vector<128x128xbf16>, vector<48x128xf32> -> vector<48x128xf32>
    %159 = arith.addf %151, %158 : vector<48x128xf32>
    %c3_149 = arith.constant 3 : index
    %c1_150 = arith.constant 1 : index
    %c1_151 = arith.constant 1 : index
    %c0_152 = arith.constant 0 : index
    %160 = vector.load %arg13[%c3_149, %c1_150, %c1_151, %c0_152] : memref<4x8x16x128xf32, #tpu.memory_space<vmem>>, vector<1x6x8x128xf32>
    %161 = vector.shape_cast %160 : vector<1x6x8x128xf32> to vector<6x8x128xf32>
    %162 = vector.shape_cast %161 : vector<6x8x128xf32> to vector<48x128xf32>
    %163 = arith.truncf %162 : vector<48x128xf32> to vector<48x128xbf16>
    %c18 = arith.constant 18 : index
    %c0_153 = arith.constant 0 : index
    %c0_154 = arith.constant 0 : index
    %164 = vector.load %arg4[%c18, %c0_153, %c0_154] : memref<25x128x128xbf16, #tpu.memory_space<vmem>>, vector<1x128x128xbf16>
    %165 = vector.shape_cast %164 : vector<1x128x128xbf16> to vector<128x128xbf16>
    %cst_155 = arith.constant dense<0.000000e+00> : vector<48x128xf32>
    %166 = tpu.matmul %163, %165, %cst_155 {dimension_numbers = #tpu.dot_dimension_numbers<[1], [0], [0], [1], [0, 0, 1, 1], [], []>} : vector<48x128xbf16>, vector<128x128xbf16>, vector<48x128xf32> -> vector<48x128xf32>
    %167 = arith.addf %159, %166 : vector<48x128xf32>
    %c2_156 = arith.constant 2 : index
    %c1_157 = arith.constant 1 : index
    %c2_158 = arith.constant 2 : index
    %c0_159 = arith.constant 0 : index
    %168 = vector.load %arg13[%c2_156, %c1_157, %c2_158, %c0_159] : memref<4x8x16x128xf32, #tpu.memory_space<vmem>>, vector<1x6x8x128xf32>
    %169 = vector.shape_cast %168 : vector<1x6x8x128xf32> to vector<6x8x128xf32>
    %170 = vector.shape_cast %169 : vector<6x8x128xf32> to vector<48x128xf32>
    %171 = arith.truncf %170 : vector<48x128xf32> to vector<48x128xbf16>
    %c19 = arith.constant 19 : index
    %c0_160 = arith.constant 0 : index
    %c0_161 = arith.constant 0 : index
    %172 = vector.load %arg4[%c19, %c0_160, %c0_161] : memref<25x128x128xbf16, #tpu.memory_space<vmem>>, vector<1x128x128xbf16>
    %173 = vector.shape_cast %172 : vector<1x128x128xbf16> to vector<128x128xbf16>
    %cst_162 = arith.constant dense<0.000000e+00> : vector<48x128xf32>
    %174 = tpu.matmul %171, %173, %cst_162 {dimension_numbers = #tpu.dot_dimension_numbers<[1], [0], [0], [1], [0, 0, 1, 1], [], []>} : vector<48x128xbf16>, vector<128x128xbf16>, vector<48x128xf32> -> vector<48x128xf32>
    %175 = arith.addf %167, %174 : vector<48x128xf32>
    %c0_163 = arith.constant 0 : index
    %c2_164 = arith.constant 2 : index
    %c0_165 = arith.constant 0 : index
    %c0_166 = arith.constant 0 : index
    %176 = vector.load %arg13[%c0_163, %c2_164, %c0_165, %c0_166] : memref<4x8x16x128xf32, #tpu.memory_space<vmem>>, vector<1x6x8x128xf32>
    %177 = vector.shape_cast %176 : vector<1x6x8x128xf32> to vector<6x8x128xf32>
    %178 = vector.shape_cast %177 : vector<6x8x128xf32> to vector<48x128xf32>
    %179 = arith.truncf %178 : vector<48x128xf32> to vector<48x128xbf16>
    %c20 = arith.constant 20 : index
    %c0_167 = arith.constant 0 : index
    %c0_168 = arith.constant 0 : index
    %180 = vector.load %arg4[%c20, %c0_167, %c0_168] : memref<25x128x128xbf16, #tpu.memory_space<vmem>>, vector<1x128x128xbf16>
    %181 = vector.shape_cast %180 : vector<1x128x128xbf16> to vector<128x128xbf16>
    %cst_169 = arith.constant dense<0.000000e+00> : vector<48x128xf32>
    %182 = tpu.matmul %179, %181, %cst_169 {dimension_numbers = #tpu.dot_dimension_numbers<[1], [0], [0], [1], [0, 0, 1, 1], [], []>} : vector<48x128xbf16>, vector<128x128xbf16>, vector<48x128xf32> -> vector<48x128xf32>
    %183 = arith.addf %175, %182 : vector<48x128xf32>
    %c1_170 = arith.constant 1 : index
    %c2_171 = arith.constant 2 : index
    %c0_172 = arith.constant 0 : index
    %c0_173 = arith.constant 0 : index
    %184 = vector.load %arg13[%c1_170, %c2_171, %c0_172, %c0_173] : memref<4x8x16x128xf32, #tpu.memory_space<vmem>>, vector<1x6x8x128xf32>
    %185 = vector.shape_cast %184 : vector<1x6x8x128xf32> to vector<6x8x128xf32>
    %186 = vector.shape_cast %185 : vector<6x8x128xf32> to vector<48x128xf32>
    %187 = arith.truncf %186 : vector<48x128xf32> to vector<48x128xbf16>
    %c21 = arith.constant 21 : index
    %c0_174 = arith.constant 0 : index
    %c0_175 = arith.constant 0 : index
    %188 = vector.load %arg4[%c21, %c0_174, %c0_175] : memref<25x128x128xbf16, #tpu.memory_space<vmem>>, vector<1x128x128xbf16>
    %189 = vector.shape_cast %188 : vector<1x128x128xbf16> to vector<128x128xbf16>
    %cst_176 = arith.constant dense<0.000000e+00> : vector<48x128xf32>
    %190 = tpu.matmul %187, %189, %cst_176 {dimension_numbers = #tpu.dot_dimension_numbers<[1], [0], [0], [1], [0, 0, 1, 1], [], []>} : vector<48x128xbf16>, vector<128x128xbf16>, vector<48x128xf32> -> vector<48x128xf32>
    %191 = arith.addf %183, %190 : vector<48x128xf32>
    %c0_177 = arith.constant 0 : index
    %c2_178 = arith.constant 2 : index
    %c1_179 = arith.constant 1 : index
    %c0_180 = arith.constant 0 : index
    %192 = vector.load %arg13[%c0_177, %c2_178, %c1_179, %c0_180] : memref<4x8x16x128xf32, #tpu.memory_space<vmem>>, vector<1x6x8x128xf32>
    %193 = vector.shape_cast %192 : vector<1x6x8x128xf32> to vector<6x8x128xf32>
    %194 = vector.shape_cast %193 : vector<6x8x128xf32> to vector<48x128xf32>
    %195 = arith.truncf %194 : vector<48x128xf32> to vector<48x128xbf16>
    %c22 = arith.constant 22 : index
    %c0_181 = arith.constant 0 : index
    %c0_182 = arith.constant 0 : index
    %196 = vector.load %arg4[%c22, %c0_181, %c0_182] : memref<25x128x128xbf16, #tpu.memory_space<vmem>>, vector<1x128x128xbf16>
    %197 = vector.shape_cast %196 : vector<1x128x128xbf16> to vector<128x128xbf16>
    %cst_183 = arith.constant dense<0.000000e+00> : vector<48x128xf32>
    %198 = tpu.matmul %195, %197, %cst_183 {dimension_numbers = #tpu.dot_dimension_numbers<[1], [0], [0], [1], [0, 0, 1, 1], [], []>} : vector<48x128xbf16>, vector<128x128xbf16>, vector<48x128xf32> -> vector<48x128xf32>
    %199 = arith.addf %191, %198 : vector<48x128xf32>
    %c1_184 = arith.constant 1 : index
    %c2_185 = arith.constant 2 : index
    %c1_186 = arith.constant 1 : index
    %c0_187 = arith.constant 0 : index
    %200 = vector.load %arg13[%c1_184, %c2_185, %c1_186, %c0_187] : memref<4x8x16x128xf32, #tpu.memory_space<vmem>>, vector<1x6x8x128xf32>
    %201 = vector.shape_cast %200 : vector<1x6x8x128xf32> to vector<6x8x128xf32>
    %202 = vector.shape_cast %201 : vector<6x8x128xf32> to vector<48x128xf32>
    %203 = arith.truncf %202 : vector<48x128xf32> to vector<48x128xbf16>
    %c23 = arith.constant 23 : index
    %c0_188 = arith.constant 0 : index
    %c0_189 = arith.constant 0 : index
    %204 = vector.load %arg4[%c23, %c0_188, %c0_189] : memref<25x128x128xbf16, #tpu.memory_space<vmem>>, vector<1x128x128xbf16>
    %205 = vector.shape_cast %204 : vector<1x128x128xbf16> to vector<128x128xbf16>
    %cst_190 = arith.constant dense<0.000000e+00> : vector<48x128xf32>
    %206 = tpu.matmul %203, %205, %cst_190 {dimension_numbers = #tpu.dot_dimension_numbers<[1], [0], [0], [1], [0, 0, 1, 1], [], []>} : vector<48x128xbf16>, vector<128x128xbf16>, vector<48x128xf32> -> vector<48x128xf32>
    %207 = arith.addf %199, %206 : vector<48x128xf32>
    %c0_191 = arith.constant 0 : index
    %c2_192 = arith.constant 2 : index
    %c2_193 = arith.constant 2 : index
    %c0_194 = arith.constant 0 : index
    %208 = vector.load %arg13[%c0_191, %c2_192, %c2_193, %c0_194] : memref<4x8x16x128xf32, #tpu.memory_space<vmem>>, vector<1x6x8x128xf32>
    %209 = vector.shape_cast %208 : vector<1x6x8x128xf32> to vector<6x8x128xf32>
    %210 = vector.shape_cast %209 : vector<6x8x128xf32> to vector<48x128xf32>
    %211 = arith.truncf %210 : vector<48x128xf32> to vector<48x128xbf16>
    %c24 = arith.constant 24 : index
    %c0_195 = arith.constant 0 : index
    %c0_196 = arith.constant 0 : index
    %212 = vector.load %arg4[%c24, %c0_195, %c0_196] : memref<25x128x128xbf16, #tpu.memory_space<vmem>>, vector<1x128x128xbf16>
    %213 = vector.shape_cast %212 : vector<1x128x128xbf16> to vector<128x128xbf16>
    %cst_197 = arith.constant dense<0.000000e+00> : vector<48x128xf32>
    %214 = tpu.matmul %211, %213, %cst_197 {dimension_numbers = #tpu.dot_dimension_numbers<[1], [0], [0], [1], [0, 0, 1, 1], [], []>} : vector<48x128xbf16>, vector<128x128xbf16>, vector<48x128xf32> -> vector<48x128xf32>
    %215 = arith.addf %207, %214 : vector<48x128xf32>
    %c0_198 = arith.constant 0 : index
    %c0_199 = arith.constant 0 : index
    %216 = vector.load %arg5[%c0_198, %c0_199] : memref<1x128xf32, #tpu.memory_space<vmem>>, vector<1x128xf32>
    %217 = vector.broadcast %216 : vector<1x128xf32> to vector<48x128xf32>
    %218 = arith.addf %215, %217 : vector<48x128xf32>
    %cst_200 = arith.constant 0.000000e+00 : f32
    %219 = vector.broadcast %cst_200 : f32 to vector<48x128xf32>
    %220 = arith.maximumf %218, %219 : vector<48x128xf32>
    %c0_201 = arith.constant 0 : index
    %c0_202 = arith.constant 0 : index
    %221 = vector.load %arg14[%c0_201, %c0_202] : memref<48x128xf32, #tpu.memory_space<vmem>>, vector<48x128xf32>
    tpu.vector_store %arg14[%c0_201, %c0_202], %220 {strides = array<i32>} : memref<48x128xf32, #tpu.memory_space<vmem>>, vector<48x128xf32>,
    %cst_203 = arith.constant 0.000000e+00 : f32
    %222 = vector.broadcast %cst_203 : f32 to vector<8x128xf32>
    %c0_204 = arith.constant 0 : index
    %c0_205 = arith.constant 0 : index
    %223 = vector.load %arg14[%c0_204, %c0_205] : memref<48x128xf32, #tpu.memory_space<vmem>>, vector<8x128xf32>
    %224 = arith.truncf %223 : vector<8x128xf32> to vector<8x128xbf16>
    %c0_206 = arith.constant 0 : index
    %c0_207 = arith.constant 0 : index
    %c0_208 = arith.constant 0 : index
    %225 = vector.load %arg6[%c0_206, %c0_207, %c0_208] : memref<25x128x128xbf16, #tpu.memory_space<vmem>>, vector<1x128x128xbf16>
    %226 = vector.shape_cast %225 : vector<1x128x128xbf16> to vector<128x128xbf16>
    %cst_209 = arith.constant dense<0.000000e+00> : vector<8x128xf32>
    %227 = tpu.matmul %224, %226, %cst_209 {dimension_numbers = #tpu.dot_dimension_numbers<[1], [0], [0], [1], [0, 0, 1, 1], [], []>} : vector<8x128xbf16>, vector<128x128xbf16>, vector<8x128xf32> -> vector<8x128xf32>
    %228 = arith.addf %222, %227 : vector<8x128xf32>
    %c1_210 = arith.constant 1 : index
    %c0_211 = arith.constant 0 : index
    %229 = vector.load %arg14[%c1_210, %c0_211] : memref<48x128xf32, #tpu.memory_space<vmem>>, vector<8x128xf32>
    %230 = arith.truncf %229 : vector<8x128xf32> to vector<8x128xbf16>
    %c1_212 = arith.constant 1 : index
    %c0_213 = arith.constant 0 : index
    %c0_214 = arith.constant 0 : index
    %231 = vector.load %arg6[%c1_212, %c0_213, %c0_214] : memref<25x128x128xbf16, #tpu.memory_space<vmem>>, vector<1x128x128xbf16>
    %232 = vector.shape_cast %231 : vector<1x128x128xbf16> to vector<128x128xbf16>
    %cst_215 = arith.constant dense<0.000000e+00> : vector<8x128xf32>
    %233 = tpu.matmul %230, %232, %cst_215 {dimension_numbers = #tpu.dot_dimension_numbers<[1], [0], [0], [1], [0, 0, 1, 1], [], []>} : vector<8x128xbf16>, vector<128x128xbf16>, vector<8x128xf32> -> vector<8x128xf32>
    %234 = arith.addf %228, %233 : vector<8x128xf32>
    %c2_216 = arith.constant 2 : index
    %c0_217 = arith.constant 0 : index
    %235 = vector.load %arg14[%c2_216, %c0_217] : memref<48x128xf32, #tpu.memory_space<vmem>>, vector<8x128xf32>
    %236 = arith.truncf %235 : vector<8x128xf32> to vector<8x128xbf16>
    %c2_218 = arith.constant 2 : index
    %c0_219 = arith.constant 0 : index
    %c0_220 = arith.constant 0 : index
    %237 = vector.load %arg6[%c2_218, %c0_219, %c0_220] : memref<25x128x128xbf16, #tpu.memory_space<vmem>>, vector<1x128x128xbf16>
    %238 = vector.shape_cast %237 : vector<1x128x128xbf16> to vector<128x128xbf16>
    %cst_221 = arith.constant dense<0.000000e+00> : vector<8x128xf32>
    %239 = tpu.matmul %236, %238, %cst_221 {dimension_numbers = #tpu.dot_dimension_numbers<[1], [0], [0], [1], [0, 0, 1, 1], [], []>} : vector<8x128xbf16>, vector<128x128xbf16>, vector<8x128xf32> -> vector<8x128xf32>
    %240 = arith.addf %234, %239 : vector<8x128xf32>
    %c3_222 = arith.constant 3 : index
    %c0_223 = arith.constant 0 : index
    %241 = vector.load %arg14[%c3_222, %c0_223] : memref<48x128xf32, #tpu.memory_space<vmem>>, vector<8x128xf32>
    %242 = arith.truncf %241 : vector<8x128xf32> to vector<8x128xbf16>
    %c3_224 = arith.constant 3 : index
    %c0_225 = arith.constant 0 : index
    %c0_226 = arith.constant 0 : index
    %243 = vector.load %arg6[%c3_224, %c0_225, %c0_226] : memref<25x128x128xbf16, #tpu.memory_space<vmem>>, vector<1x128x128xbf16>
    %244 = vector.shape_cast %243 : vector<1x128x128xbf16> to vector<128x128xbf16>
    %cst_227 = arith.constant dense<0.000000e+00> : vector<8x128xf32>
    %245 = tpu.matmul %242, %244, %cst_227 {dimension_numbers = #tpu.dot_dimension_numbers<[1], [0], [0], [1], [0, 0, 1, 1], [], []>} : vector<8x128xbf16>, vector<128x128xbf16>, vector<8x128xf32> -> vector<8x128xf32>
    %246 = arith.addf %240, %245 : vector<8x128xf32>
    %c4_228 = arith.constant 4 : index
    %c0_229 = arith.constant 0 : index
    %247 = vector.load %arg14[%c4_228, %c0_229] : memref<48x128xf32, #tpu.memory_space<vmem>>, vector<8x128xf32>
    %248 = arith.truncf %247 : vector<8x128xf32> to vector<8x128xbf16>
    %c4_230 = arith.constant 4 : index
    %c0_231 = arith.constant 0 : index
    %c0_232 = arith.constant 0 : index
    %249 = vector.load %arg6[%c4_230, %c0_231, %c0_232] : memref<25x128x128xbf16, #tpu.memory_space<vmem>>, vector<1x128x128xbf16>
    %250 = vector.shape_cast %249 : vector<1x128x128xbf16> to vector<128x128xbf16>
    %cst_233 = arith.constant dense<0.000000e+00> : vector<8x128xf32>
    %251 = tpu.matmul %248, %250, %cst_233 {dimension_numbers = #tpu.dot_dimension_numbers<[1], [0], [0], [1], [0, 0, 1, 1], [], []>} : vector<8x128xbf16>, vector<128x128xbf16>, vector<8x128xf32> -> vector<8x128xf32>
    %252 = arith.addf %246, %251 : vector<8x128xf32>
    %c8_234 = arith.constant 8 : index
    %c0_235 = arith.constant 0 : index
    %253 = vector.load %arg14[%c8_234, %c0_235] : memref<48x128xf32, #tpu.memory_space<vmem>>, vector<8x128xf32>
    %254 = arith.truncf %253 : vector<8x128xf32> to vector<8x128xbf16>
    %c5_236 = arith.constant 5 : index
    %c0_237 = arith.constant 0 : index
    %c0_238 = arith.constant 0 : index
    %255 = vector.load %arg6[%c5_236, %c0_237, %c0_238] : memref<25x128x128xbf16, #tpu.memory_space<vmem>>, vector<1x128x128xbf16>
    %256 = vector.shape_cast %255 : vector<1x128x128xbf16> to vector<128x128xbf16>
    %cst_239 = arith.constant dense<0.000000e+00> : vector<8x128xf32>
    %257 = tpu.matmul %254, %256, %cst_239 {dimension_numbers = #tpu.dot_dimension_numbers<[1], [0], [0], [1], [0, 0, 1, 1], [], []>} : vector<8x128xbf16>, vector<128x128xbf16>, vector<8x128xf32> -> vector<8x128xf32>
    %258 = arith.addf %252, %257 : vector<8x128xf32>
    %c9_240 = arith.constant 9 : index
    %c0_241 = arith.constant 0 : index
    %259 = vector.load %arg14[%c9_240, %c0_241] : memref<48x128xf32, #tpu.memory_space<vmem>>, vector<8x128xf32>
    %260 = arith.truncf %259 : vector<8x128xf32> to vector<8x128xbf16>
    %c6_242 = arith.constant 6 : index
    %c0_243 = arith.constant 0 : index
    %c0_244 = arith.constant 0 : index
    %261 = vector.load %arg6[%c6_242, %c0_243, %c0_244] : memref<25x128x128xbf16, #tpu.memory_space<vmem>>, vector<1x128x128xbf16>
    %262 = vector.shape_cast %261 : vector<1x128x128xbf16> to vector<128x128xbf16>
    %cst_245 = arith.constant dense<0.000000e+00> : vector<8x128xf32>
    %263 = tpu.matmul %260, %262, %cst_245 {dimension_numbers = #tpu.dot_dimension_numbers<[1], [0], [0], [1], [0, 0, 1, 1], [], []>} : vector<8x128xbf16>, vector<128x128xbf16>, vector<8x128xf32> -> vector<8x128xf32>
    %264 = arith.addf %258, %263 : vector<8x128xf32>
    %c10_246 = arith.constant 10 : index
    %c0_247 = arith.constant 0 : index
    %265 = vector.load %arg14[%c10_246, %c0_247] : memref<48x128xf32, #tpu.memory_space<vmem>>, vector<8x128xf32>
    %266 = arith.truncf %265 : vector<8x128xf32> to vector<8x128xbf16>
    %c7_248 = arith.constant 7 : index
    %c0_249 = arith.constant 0 : index
    %c0_250 = arith.constant 0 : index
    %267 = vector.load %arg6[%c7_248, %c0_249, %c0_250] : memref<25x128x128xbf16, #tpu.memory_space<vmem>>, vector<1x128x128xbf16>
    %268 = vector.shape_cast %267 : vector<1x128x128xbf16> to vector<128x128xbf16>
    %cst_251 = arith.constant dense<0.000000e+00> : vector<8x128xf32>
    %269 = tpu.matmul %266, %268, %cst_251 {dimension_numbers = #tpu.dot_dimension_numbers<[1], [0], [0], [1], [0, 0, 1, 1], [], []>} : vector<8x128xbf16>, vector<128x128xbf16>, vector<8x128xf32> -> vector<8x128xf32>
    %270 = arith.addf %264, %269 : vector<8x128xf32>
    %c11_252 = arith.constant 11 : index
    %c0_253 = arith.constant 0 : index
    %271 = vector.load %arg14[%c11_252, %c0_253] : memref<48x128xf32, #tpu.memory_space<vmem>>, vector<8x128xf32>
    %272 = arith.truncf %271 : vector<8x128xf32> to vector<8x128xbf16>
    %c8_254 = arith.constant 8 : index
    %c0_255 = arith.constant 0 : index
    %c0_256 = arith.constant 0 : index
    %273 = vector.load %arg6[%c8_254, %c0_255, %c0_256] : memref<25x128x128xbf16, #tpu.memory_space<vmem>>, vector<1x128x128xbf16>
    %274 = vector.shape_cast %273 : vector<1x128x128xbf16> to vector<128x128xbf16>
    %cst_257 = arith.constant dense<0.000000e+00> : vector<8x128xf32>
    %275 = tpu.matmul %272, %274, %cst_257 {dimension_numbers = #tpu.dot_dimension_numbers<[1], [0], [0], [1], [0, 0, 1, 1], [], []>} : vector<8x128xbf16>, vector<128x128xbf16>, vector<8x128xf32> -> vector<8x128xf32>
    %276 = arith.addf %270, %275 : vector<8x128xf32>
    %c12_258 = arith.constant 12 : index
    %c0_259 = arith.constant 0 : index
    %277 = vector.load %arg14[%c12_258, %c0_259] : memref<48x128xf32, #tpu.memory_space<vmem>>, vector<8x128xf32>
    %278 = arith.truncf %277 : vector<8x128xf32> to vector<8x128xbf16>
    %c9_260 = arith.constant 9 : index
    %c0_261 = arith.constant 0 : index
    %c0_262 = arith.constant 0 : index
    %279 = vector.load %arg6[%c9_260, %c0_261, %c0_262] : memref<25x128x128xbf16, #tpu.memory_space<vmem>>, vector<1x128x128xbf16>
    %280 = vector.shape_cast %279 : vector<1x128x128xbf16> to vector<128x128xbf16>
    %cst_263 = arith.constant dense<0.000000e+00> : vector<8x128xf32>
    %281 = tpu.matmul %278, %280, %cst_263 {dimension_numbers = #tpu.dot_dimension_numbers<[1], [0], [0], [1], [0, 0, 1, 1], [], []>} : vector<8x128xbf16>, vector<128x128xbf16>, vector<8x128xf32> -> vector<8x128xf32>
    %282 = arith.addf %276, %281 : vector<8x128xf32>
    %c16_264 = arith.constant 16 : index
    %c0_265 = arith.constant 0 : index
    %283 = vector.load %arg14[%c16_264, %c0_265] : memref<48x128xf32, #tpu.memory_space<vmem>>, vector<8x128xf32>
    %284 = arith.truncf %283 : vector<8x128xf32> to vector<8x128xbf16>
    %c10_266 = arith.constant 10 : index
    %c0_267 = arith.constant 0 : index
    %c0_268 = arith.constant 0 : index
    %285 = vector.load %arg6[%c10_266, %c0_267, %c0_268] : memref<25x128x128xbf16, #tpu.memory_space<vmem>>, vector<1x128x128xbf16>
    %286 = vector.shape_cast %285 : vector<1x128x128xbf16> to vector<128x128xbf16>
    %cst_269 = arith.constant dense<0.000000e+00> : vector<8x128xf32>
    %287 = tpu.matmul %284, %286, %cst_269 {dimension_numbers = #tpu.dot_dimension_numbers<[1], [0], [0], [1], [0, 0, 1, 1], [], []>} : vector<8x128xbf16>, vector<128x128xbf16>, vector<8x128xf32> -> vector<8x128xf32>
    %288 = arith.addf %282, %287 : vector<8x128xf32>
    %c17_270 = arith.constant 17 : index
    %c0_271 = arith.constant 0 : index
    %289 = vector.load %arg14[%c17_270, %c0_271] : memref<48x128xf32, #tpu.memory_space<vmem>>, vector<8x128xf32>
    %290 = arith.truncf %289 : vector<8x128xf32> to vector<8x128xbf16>
    %c11_272 = arith.constant 11 : index
    %c0_273 = arith.constant 0 : index
    %c0_274 = arith.constant 0 : index
    %291 = vector.load %arg6[%c11_272, %c0_273, %c0_274] : memref<25x128x128xbf16, #tpu.memory_space<vmem>>, vector<1x128x128xbf16>
    %292 = vector.shape_cast %291 : vector<1x128x128xbf16> to vector<128x128xbf16>
    %cst_275 = arith.constant dense<0.000000e+00> : vector<8x128xf32>
    %293 = tpu.matmul %290, %292, %cst_275 {dimension_numbers = #tpu.dot_dimension_numbers<[1], [0], [0], [1], [0, 0, 1, 1], [], []>} : vector<8x128xbf16>, vector<128x128xbf16>, vector<8x128xf32> -> vector<8x128xf32>
    %294 = arith.addf %288, %293 : vector<8x128xf32>
    %c18_276 = arith.constant 18 : index
    %c0_277 = arith.constant 0 : index
    %295 = vector.load %arg14[%c18_276, %c0_277] : memref<48x128xf32, #tpu.memory_space<vmem>>, vector<8x128xf32>
    %296 = arith.truncf %295 : vector<8x128xf32> to vector<8x128xbf16>
    %c12_278 = arith.constant 12 : index
    %c0_279 = arith.constant 0 : index
    %c0_280 = arith.constant 0 : index
    %297 = vector.load %arg6[%c12_278, %c0_279, %c0_280] : memref<25x128x128xbf16, #tpu.memory_space<vmem>>, vector<1x128x128xbf16>
    %298 = vector.shape_cast %297 : vector<1x128x128xbf16> to vector<128x128xbf16>
    %cst_281 = arith.constant dense<0.000000e+00> : vector<8x128xf32>
    %299 = tpu.matmul %296, %298, %cst_281 {dimension_numbers = #tpu.dot_dimension_numbers<[1], [0], [0], [1], [0, 0, 1, 1], [], []>} : vector<8x128xbf16>, vector<128x128xbf16>, vector<8x128xf32> -> vector<8x128xf32>
    %300 = arith.addf %294, %299 : vector<8x128xf32>
    %c19_282 = arith.constant 19 : index
    %c0_283 = arith.constant 0 : index
    %301 = vector.load %arg14[%c19_282, %c0_283] : memref<48x128xf32, #tpu.memory_space<vmem>>, vector<8x128xf32>
    %302 = arith.truncf %301 : vector<8x128xf32> to vector<8x128xbf16>
    %c13_284 = arith.constant 13 : index
    %c0_285 = arith.constant 0 : index
    %c0_286 = arith.constant 0 : index
    %303 = vector.load %arg6[%c13_284, %c0_285, %c0_286] : memref<25x128x128xbf16, #tpu.memory_space<vmem>>, vector<1x128x128xbf16>
    %304 = vector.shape_cast %303 : vector<1x128x128xbf16> to vector<128x128xbf16>
    %cst_287 = arith.constant dense<0.000000e+00> : vector<8x128xf32>
    %305 = tpu.matmul %302, %304, %cst_287 {dimension_numbers = #tpu.dot_dimension_numbers<[1], [0], [0], [1], [0, 0, 1, 1], [], []>} : vector<8x128xbf16>, vector<128x128xbf16>, vector<8x128xf32> -> vector<8x128xf32>
    %306 = arith.addf %300, %305 : vector<8x128xf32>
    %c20_288 = arith.constant 20 : index
    %c0_289 = arith.constant 0 : index
    %307 = vector.load %arg14[%c20_288, %c0_289] : memref<48x128xf32, #tpu.memory_space<vmem>>, vector<8x128xf32>
    %308 = arith.truncf %307 : vector<8x128xf32> to vector<8x128xbf16>
    %c14_290 = arith.constant 14 : index
    %c0_291 = arith.constant 0 : index
    %c0_292 = arith.constant 0 : index
    %309 = vector.load %arg6[%c14_290, %c0_291, %c0_292] : memref<25x128x128xbf16, #tpu.memory_space<vmem>>, vector<1x128x128xbf16>
    %310 = vector.shape_cast %309 : vector<1x128x128xbf16> to vector<128x128xbf16>
    %cst_293 = arith.constant dense<0.000000e+00> : vector<8x128xf32>
    %311 = tpu.matmul %308, %310, %cst_293 {dimension_numbers = #tpu.dot_dimension_numbers<[1], [0], [0], [1], [0, 0, 1, 1], [], []>} : vector<8x128xbf16>, vector<128x128xbf16>, vector<8x128xf32> -> vector<8x128xf32>
    %312 = arith.addf %306, %311 : vector<8x128xf32>
    %c24_294 = arith.constant 24 : index
    %c0_295 = arith.constant 0 : index
    %313 = vector.load %arg14[%c24_294, %c0_295] : memref<48x128xf32, #tpu.memory_space<vmem>>, vector<8x128xf32>
    %314 = arith.truncf %313 : vector<8x128xf32> to vector<8x128xbf16>
    %c15_296 = arith.constant 15 : index
    %c0_297 = arith.constant 0 : index
    %c0_298 = arith.constant 0 : index
    %315 = vector.load %arg6[%c15_296, %c0_297, %c0_298] : memref<25x128x128xbf16, #tpu.memory_space<vmem>>, vector<1x128x128xbf16>
    %316 = vector.shape_cast %315 : vector<1x128x128xbf16> to vector<128x128xbf16>
    %cst_299 = arith.constant dense<0.000000e+00> : vector<8x128xf32>
    %317 = tpu.matmul %314, %316, %cst_299 {dimension_numbers = #tpu.dot_dimension_numbers<[1], [0], [0], [1], [0, 0, 1, 1], [], []>} : vector<8x128xbf16>, vector<128x128xbf16>, vector<8x128xf32> -> vector<8x128xf32>
    %318 = arith.addf %312, %317 : vector<8x128xf32>
    %c25 = arith.constant 25 : index
    %c0_300 = arith.constant 0 : index
    %319 = vector.load %arg14[%c25, %c0_300] : memref<48x128xf32, #tpu.memory_space<vmem>>, vector<8x128xf32>
    %320 = arith.truncf %319 : vector<8x128xf32> to vector<8x128xbf16>
    %c16_301 = arith.constant 16 : index
    %c0_302 = arith.constant 0 : index
    %c0_303 = arith.constant 0 : index
    %321 = vector.load %arg6[%c16_301, %c0_302, %c0_303] : memref<25x128x128xbf16, #tpu.memory_space<vmem>>, vector<1x128x128xbf16>
    %322 = vector.shape_cast %321 : vector<1x128x128xbf16> to vector<128x128xbf16>
    %cst_304 = arith.constant dense<0.000000e+00> : vector<8x128xf32>
    %323 = tpu.matmul %320, %322, %cst_304 {dimension_numbers = #tpu.dot_dimension_numbers<[1], [0], [0], [1], [0, 0, 1, 1], [], []>} : vector<8x128xbf16>, vector<128x128xbf16>, vector<8x128xf32> -> vector<8x128xf32>
    %324 = arith.addf %318, %323 : vector<8x128xf32>
    %c26 = arith.constant 26 : index
    %c0_305 = arith.constant 0 : index
    %325 = vector.load %arg14[%c26, %c0_305] : memref<48x128xf32, #tpu.memory_space<vmem>>, vector<8x128xf32>
    %326 = arith.truncf %325 : vector<8x128xf32> to vector<8x128xbf16>
    %c17_306 = arith.constant 17 : index
    %c0_307 = arith.constant 0 : index
    %c0_308 = arith.constant 0 : index
    %327 = vector.load %arg6[%c17_306, %c0_307, %c0_308] : memref<25x128x128xbf16, #tpu.memory_space<vmem>>, vector<1x128x128xbf16>
    %328 = vector.shape_cast %327 : vector<1x128x128xbf16> to vector<128x128xbf16>
    %cst_309 = arith.constant dense<0.000000e+00> : vector<8x128xf32>
    %329 = tpu.matmul %326, %328, %cst_309 {dimension_numbers = #tpu.dot_dimension_numbers<[1], [0], [0], [1], [0, 0, 1, 1], [], []>} : vector<8x128xbf16>, vector<128x128xbf16>, vector<8x128xf32> -> vector<8x128xf32>
    %330 = arith.addf %324, %329 : vector<8x128xf32>
    %c27 = arith.constant 27 : index
    %c0_310 = arith.constant 0 : index
    %331 = vector.load %arg14[%c27, %c0_310] : memref<48x128xf32, #tpu.memory_space<vmem>>, vector<8x128xf32>
    %332 = arith.truncf %331 : vector<8x128xf32> to vector<8x128xbf16>
    %c18_311 = arith.constant 18 : index
    %c0_312 = arith.constant 0 : index
    %c0_313 = arith.constant 0 : index
    %333 = vector.load %arg6[%c18_311, %c0_312, %c0_313] : memref<25x128x128xbf16, #tpu.memory_space<vmem>>, vector<1x128x128xbf16>
    %334 = vector.shape_cast %333 : vector<1x128x128xbf16> to vector<128x128xbf16>
    %cst_314 = arith.constant dense<0.000000e+00> : vector<8x128xf32>
    %335 = tpu.matmul %332, %334, %cst_314 {dimension_numbers = #tpu.dot_dimension_numbers<[1], [0], [0], [1], [0, 0, 1, 1], [], []>} : vector<8x128xbf16>, vector<128x128xbf16>, vector<8x128xf32> -> vector<8x128xf32>
    %336 = arith.addf %330, %335 : vector<8x128xf32>
    %c28 = arith.constant 28 : index
    %c0_315 = arith.constant 0 : index
    %337 = vector.load %arg14[%c28, %c0_315] : memref<48x128xf32, #tpu.memory_space<vmem>>, vector<8x128xf32>
    %338 = arith.truncf %337 : vector<8x128xf32> to vector<8x128xbf16>
    %c19_316 = arith.constant 19 : index
    %c0_317 = arith.constant 0 : index
    %c0_318 = arith.constant 0 : index
    %339 = vector.load %arg6[%c19_316, %c0_317, %c0_318] : memref<25x128x128xbf16, #tpu.memory_space<vmem>>, vector<1x128x128xbf16>
    %340 = vector.shape_cast %339 : vector<1x128x128xbf16> to vector<128x128xbf16>
    %cst_319 = arith.constant dense<0.000000e+00> : vector<8x128xf32>
    %341 = tpu.matmul %338, %340, %cst_319 {dimension_numbers = #tpu.dot_dimension_numbers<[1], [0], [0], [1], [0, 0, 1, 1], [], []>} : vector<8x128xbf16>, vector<128x128xbf16>, vector<8x128xf32> -> vector<8x128xf32>
    %342 = arith.addf %336, %341 : vector<8x128xf32>
    %c32 = arith.constant 32 : index
    %c0_320 = arith.constant 0 : index
    %343 = vector.load %arg14[%c32, %c0_320] : memref<48x128xf32, #tpu.memory_space<vmem>>, vector<8x128xf32>
    %344 = arith.truncf %343 : vector<8x128xf32> to vector<8x128xbf16>
    %c20_321 = arith.constant 20 : index
    %c0_322 = arith.constant 0 : index
    %c0_323 = arith.constant 0 : index
    %345 = vector.load %arg6[%c20_321, %c0_322, %c0_323] : memref<25x128x128xbf16, #tpu.memory_space<vmem>>, vector<1x128x128xbf16>
    %346 = vector.shape_cast %345 : vector<1x128x128xbf16> to vector<128x128xbf16>
    %cst_324 = arith.constant dense<0.000000e+00> : vector<8x128xf32>
    %347 = tpu.matmul %344, %346, %cst_324 {dimension_numbers = #tpu.dot_dimension_numbers<[1], [0], [0], [1], [0, 0, 1, 1], [], []>} : vector<8x128xbf16>, vector<128x128xbf16>, vector<8x128xf32> -> vector<8x128xf32>
    %348 = arith.addf %342, %347 : vector<8x128xf32>
    %c33 = arith.constant 33 : index
    %c0_325 = arith.constant 0 : index
    %349 = vector.load %arg14[%c33, %c0_325] : memref<48x128xf32, #tpu.memory_space<vmem>>, vector<8x128xf32>
    %350 = arith.truncf %349 : vector<8x128xf32> to vector<8x128xbf16>
    %c21_326 = arith.constant 21 : index
    %c0_327 = arith.constant 0 : index
    %c0_328 = arith.constant 0 : index
    %351 = vector.load %arg6[%c21_326, %c0_327, %c0_328] : memref<25x128x128xbf16, #tpu.memory_space<vmem>>, vector<1x128x128xbf16>
    %352 = vector.shape_cast %351 : vector<1x128x128xbf16> to vector<128x128xbf16>
    %cst_329 = arith.constant dense<0.000000e+00> : vector<8x128xf32>
    %353 = tpu.matmul %350, %352, %cst_329 {dimension_numbers = #tpu.dot_dimension_numbers<[1], [0], [0], [1], [0, 0, 1, 1], [], []>} : vector<8x128xbf16>, vector<128x128xbf16>, vector<8x128xf32> -> vector<8x128xf32>
    %354 = arith.addf %348, %353 : vector<8x128xf32>
    %c34 = arith.constant 34 : index
    %c0_330 = arith.constant 0 : index
    %355 = vector.load %arg14[%c34, %c0_330] : memref<48x128xf32, #tpu.memory_space<vmem>>, vector<8x128xf32>
    %356 = arith.truncf %355 : vector<8x128xf32> to vector<8x128xbf16>
    %c22_331 = arith.constant 22 : index
    %c0_332 = arith.constant 0 : index
    %c0_333 = arith.constant 0 : index
    %357 = vector.load %arg6[%c22_331, %c0_332, %c0_333] : memref<25x128x128xbf16, #tpu.memory_space<vmem>>, vector<1x128x128xbf16>
    %358 = vector.shape_cast %357 : vector<1x128x128xbf16> to vector<128x128xbf16>
    %cst_334 = arith.constant dense<0.000000e+00> : vector<8x128xf32>
    %359 = tpu.matmul %356, %358, %cst_334 {dimension_numbers = #tpu.dot_dimension_numbers<[1], [0], [0], [1], [0, 0, 1, 1], [], []>} : vector<8x128xbf16>, vector<128x128xbf16>, vector<8x128xf32> -> vector<8x128xf32>
    %360 = arith.addf %354, %359 : vector<8x128xf32>
    %c35 = arith.constant 35 : index
    %c0_335 = arith.constant 0 : index
    %361 = vector.load %arg14[%c35, %c0_335] : memref<48x128xf32, #tpu.memory_space<vmem>>, vector<8x128xf32>
    %362 = arith.truncf %361 : vector<8x128xf32> to vector<8x128xbf16>
    %c23_336 = arith.constant 23 : index
    %c0_337 = arith.constant 0 : index
    %c0_338 = arith.constant 0 : index
    %363 = vector.load %arg6[%c23_336, %c0_337, %c0_338] : memref<25x128x128xbf16, #tpu.memory_space<vmem>>, vector<1x128x128xbf16>
    %364 = vector.shape_cast %363 : vector<1x128x128xbf16> to vector<128x128xbf16>
    %cst_339 = arith.constant dense<0.000000e+00> : vector<8x128xf32>
    %365 = tpu.matmul %362, %364, %cst_339 {dimension_numbers = #tpu.dot_dimension_numbers<[1], [0], [0], [1], [0, 0, 1, 1], [], []>} : vector<8x128xbf16>, vector<128x128xbf16>, vector<8x128xf32> -> vector<8x128xf32>
    %366 = arith.addf %360, %365 : vector<8x128xf32>
    %c36 = arith.constant 36 : index
    %c0_340 = arith.constant 0 : index
    %367 = vector.load %arg14[%c36, %c0_340] : memref<48x128xf32, #tpu.memory_space<vmem>>, vector<8x128xf32>
    %368 = arith.truncf %367 : vector<8x128xf32> to vector<8x128xbf16>
    %c24_341 = arith.constant 24 : index
    %c0_342 = arith.constant 0 : index
    %c0_343 = arith.constant 0 : index
    %369 = vector.load %arg6[%c24_341, %c0_342, %c0_343] : memref<25x128x128xbf16, #tpu.memory_space<vmem>>, vector<1x128x128xbf16>
    %370 = vector.shape_cast %369 : vector<1x128x128xbf16> to vector<128x128xbf16>
    %cst_344 = arith.constant dense<0.000000e+00> : vector<8x128xf32>
    %371 = tpu.matmul %368, %370, %cst_344 {dimension_numbers = #tpu.dot_dimension_numbers<[1], [0], [0], [1], [0, 0, 1, 1], [], []>} : vector<8x128xbf16>, vector<128x128xbf16>, vector<8x128xf32> -> vector<8x128xf32>
    %372 = arith.addf %366, %371 : vector<8x128xf32>
    %c0_345 = arith.constant 0 : index
    %c0_346 = arith.constant 0 : index
    %373 = vector.load %arg7[%c0_345, %c0_346] : memref<1x128xf32, #tpu.memory_space<vmem>>, vector<1x128xf32>
    %374 = vector.broadcast %373 : vector<1x128xf32> to vector<8x128xf32>
    %375 = arith.addf %372, %374 : vector<8x128xf32>
    %cst_347 = arith.constant 0.000000e+00 : f32
    %376 = vector.broadcast %cst_347 : f32 to vector<8x128xf32>
    %377 = arith.maximumf %375, %376 : vector<8x128xf32>
    %378 = arith.truncf %377 : vector<8x128xf32> to vector<8x128xbf16>
    %c0_348 = arith.constant 0 : index
    %c0_349 = arith.constant 0 : index
    %379 = vector.load %arg8[%c0_348, %c0_349] : memref<128x128xbf16, #tpu.memory_space<vmem>>, vector<128x128xbf16>
    %cst_350 = arith.constant dense<0.000000e+00> : vector<8x128xf32>
    %380 = tpu.matmul %378, %379, %cst_350 {dimension_numbers = #tpu.dot_dimension_numbers<[1], [0], [0], [1], [0, 0, 1, 1], [], []>} : vector<8x128xbf16>, vector<128x128xbf16>, vector<8x128xf32> -> vector<8x128xf32>
    %c0_351 = arith.constant 0 : index
    %c0_352 = arith.constant 0 : index
    %381 = vector.load %arg9[%c0_351, %c0_352] : memref<1x128xf32, #tpu.memory_space<vmem>>, vector<1x128xf32>
    %382 = vector.broadcast %381 : vector<1x128xf32> to vector<8x128xf32>
    %383 = arith.addf %380, %382 : vector<8x128xf32>
    %cst_353 = arith.constant 0.000000e+00 : f32
    %384 = vector.broadcast %cst_353 : f32 to vector<8x128xf32>
    %385 = arith.maximumf %383, %384 : vector<8x128xf32>
    %386 = arith.truncf %385 : vector<8x128xf32> to vector<8x128xbf16>
    %c0_354 = arith.constant 0 : index
    %c0_355 = arith.constant 0 : index
    %387 = vector.load %arg10[%c0_354, %c0_355] : memref<128x128xbf16, #tpu.memory_space<vmem>>, vector<128x128xbf16>
    %cst_356 = arith.constant dense<0.000000e+00> : vector<8x128xf32>
    %388 = tpu.matmul %386, %387, %cst_356 {dimension_numbers = #tpu.dot_dimension_numbers<[1], [0], [0], [1], [0, 0, 1, 1], [], []>} : vector<8x128xbf16>, vector<128x128xbf16>, vector<8x128xf32> -> vector<8x128xf32>
    %c0_357 = arith.constant 0 : index
    %c0_358 = arith.constant 0 : index
    %389 = vector.load %arg11[%c0_357, %c0_358] : memref<1x128xf32, #tpu.memory_space<vmem>>, vector<1x128xf32>
    %390 = vector.broadcast %389 : vector<1x128xf32> to vector<8x128xf32>
    %391 = arith.addf %388, %390 : vector<8x128xf32>
    %392 = vector.shape_cast %391 : vector<8x128xf32> to vector<1x8x128xf32>
    %c0_359 = arith.constant 0 : index
    %c0_360 = arith.constant 0 : index
    %c0_361 = arith.constant 0 : index
    %393 = vector.load %arg12[%c0_359, %c0_360, %c0_361] : memref<1x8x128xf32, #tpu.memory_space<vmem>>, vector<1x8x128xf32>
    tpu.vector_store %arg12[%c0_359, %c0_360, %c0_361], %392 {strides = array<i32>} : memref<1x8x128xf32, #tpu.memory_space<vmem>>, vector<1x8x128xf32>,
    return
  }
  func.func @transform_0(%arg0: i32) -> (i32, i32, i32) {
    %c0_i32 = arith.constant 0 : i32
    %c0_i32_0 = arith.constant 0 : i32
    %c0_i32_1 = arith.constant 0 : i32
    return %arg0, %c0_i32, %c0_i32_0 : i32, i32, i32
  }
  func.func @transform_1(%arg0: i32) -> (i32, i32) {
    %c0_i32 = arith.constant 0 : i32
    %c0_i32_0 = arith.constant 0 : i32
    %c0_i32_1 = arith.constant 0 : i32
    return %c0_i32, %c0_i32_0 : i32, i32
  }
  func.func @transform_2(%arg0: i32) -> (i32, i32) {
    %c0_i32 = arith.constant 0 : i32
    %c0_i32_0 = arith.constant 0 : i32
    %c0_i32_1 = arith.constant 0 : i32
    return %c0_i32, %c0_i32_0 : i32, i32
  }
  func.func @transform_3(%arg0: i32) -> (i32, i32, i32) {
    %c0_i32 = arith.constant 0 : i32
    %c0_i32_0 = arith.constant 0 : i32
    %c0_i32_1 = arith.constant 0 : i32
    %c0_i32_2 = arith.constant 0 : i32
    return %c0_i32, %c0_i32_0, %c0_i32_1 : i32, i32, i32
  }
  func.func @transform_4(%arg0: i32) -> (i32, i32) {
    %c0_i32 = arith.constant 0 : i32
    %c0_i32_0 = arith.constant 0 : i32
    %c0_i32_1 = arith.constant 0 : i32
    return %c0_i32, %c0_i32_0 : i32, i32
  }
  func.func @transform_5(%arg0: i32) -> (i32, i32, i32) {
    %c0_i32 = arith.constant 0 : i32
    %c0_i32_0 = arith.constant 0 : i32
    %c0_i32_1 = arith.constant 0 : i32
    %c0_i32_2 = arith.constant 0 : i32
    return %c0_i32, %c0_i32_0, %c0_i32_1 : i32, i32, i32
  }
  func.func @transform_6(%arg0: i32) -> (i32, i32) {
    %c0_i32 = arith.constant 0 : i32
    %c0_i32_0 = arith.constant 0 : i32
    %c0_i32_1 = arith.constant 0 : i32
    return %c0_i32, %c0_i32_0 : i32, i32
  }
  func.func @transform_7(%arg0: i32) -> (i32, i32) {
    %c0_i32 = arith.constant 0 : i32
    %c0_i32_0 = arith.constant 0 : i32
    %c0_i32_1 = arith.constant 0 : i32
    return %c0_i32, %c0_i32_0 : i32, i32
  }
  func.func @transform_8(%arg0: i32) -> (i32, i32) {
    %c0_i32 = arith.constant 0 : i32
    %c0_i32_0 = arith.constant 0 : i32
    %c0_i32_1 = arith.constant 0 : i32
    return %c0_i32, %c0_i32_0 : i32, i32
  }
  func.func @transform_9(%arg0: i32) -> (i32, i32) {
    %c0_i32 = arith.constant 0 : i32
    %c0_i32_0 = arith.constant 0 : i32
    %c0_i32_1 = arith.constant 0 : i32
    return %c0_i32, %c0_i32_0 : i32, i32
  }
  func.func @transform_10(%arg0: i32) -> (i32, i32) {
    %c0_i32 = arith.constant 0 : i32
    %c0_i32_0 = arith.constant 0 : i32
    %c0_i32_1 = arith.constant 0 : i32
    return %c0_i32, %c0_i32_0 : i32, i32
  }
  func.func @transform_11(%arg0: i32) -> (i32, i32, i32) {
    %c0_i32 = arith.constant 0 : i32
    %c0_i32_0 = arith.constant 0 : i32
    %c0_i32_1 = arith.constant 0 : i32
    return %arg0, %c0_i32, %c0_i32_0 : i32, i32, i32
  }
}

</mosaic_0001>

<bundles_post_ra>
// kernel: vanilla_cnn_forward.1
= control target key start
LH: loop header
LB: loop body
LE: loop exit
PB: predicated region body
PF: predicated region fallthrough
CT: control target
= control target key end

     0   :  { %s8662_s17 = smov 0   ;;  %s10427_s0 = inlined_call_operand.vmem [shape: bf16[2,224,128], index: 0, kind: input, shape index: {}]   ;;  %s10428_s1 = inlined_call_operand.vmem [shape: bf16[128,128], index: 1, kind: input, shape index: {}]   ;;  %s10429_s2 = inlined_call_operand.vmem [shape: f32[1,128], index: 2, kind: input, shape index: {}]   ;;  %s10430_s3 = inlined_call_operand.vmem [shape: bf16[25,128,128], index: 3, kind: input, shape index: {}]   ;;  %s10431_s4 = inlined_call_operand.vmem [shape: f32[1,128], index: 4, kind: input, shape index: {}]   ;;  %s10432_s5 = inlined_call_operand.vmem [shape: bf16[25,128,128], index: 5, kind: input, shape index: {}]   ;;  %s10433_s6 = inlined_call_operand.vmem [shape: f32[1,128], index: 6, kind: input, shape index: {}]   ;;  %s10434_s7 = inlined_call_operand.vmem [shape: bf16[128,128], index: 7, kind: input, shape index: {}]   ;;  %s10435_s8 = inlined_call_operand.vmem [shape: f32[1,128], index: 8, kind: input, shape index: {}]   ;;  %s10436_s9 = inlined_call_operand.vmem [shape: bf16[128,128], index: 9, kind: input, shape index: {}]   ;;  %s10437_s10 = inlined_call_operand.vmem [shape: f32[1,128], index: 10, kind: input, shape index: {}]   ;;  %s10438_s11 = inlined_call_operand.vmem [shape: f32[2,8,128], index: 11, kind: output, shape index: {}]  }
   0x1 LB: > { %s5602_s18 = sadd.s32 4294967295, %s8599_s17   ;;  %p5606_p0 = scmp.ge.s32.totalorder %s8599_s17, 1  ;;  %s8599_s17 = sphi %s8662_s17, %s21_s17  }
   0x2   : > { %p337_p1 = scmp.lt.s32.totalorder %s8599_s17, 3 }
   0x4   : > { %p338_p2 = pnand %p5606_p0, %p337_p1 }
   0x5   : > { %p376_p3 = scmp.lt.s32.totalorder (!%p338_p2), %s5602_s18, 1 }
   0x6   : > { %341 = sbr.rel (%p338_p2) target bundleno = 1309 (0x51d), region = 64 }
   0xb   : > { %v8152_v0 = vld [vmem:[%s10428_s1 + $0x38] sm:$0xff]  ;;  %v8151_v1 = vld [vmem:[%s10428_s1 + $0x30] sm:$0xff]  ;;  %v8150_v2 = vld [vmem:[%s10428_s1 + $0x28] sm:$0xff]  ;;  %s10440_s18 = smov (!%p376_p3, %s5602_s18), 1  ;;  %v8601_v25 = vmov 0.0  }
   0xc   : > { %565 = vmatpush.bf16.msra.mxu0 %v8152_v0  ;;  %v8149_v3 = vld [vmem:[%s10428_s1 + $0x20] sm:$0xff]  ;;  %v8148_v4 = vld [vmem:[%s10428_s1 + $0x18] sm:$0xff]  ;;  %v8147_v5 = vld [vmem:[%s10428_s1 + $0x10] sm:$0xff]  ;;  %s8569_s14 = smul.u32 112, %s10440_s18  ;;  %700 = vst [vmem:[#allocation2 + $0x8] sm:$0xff] %v8601_v25  ;;  %s5608_s15 = sshll.u32 %s10440_s18, 3 }
   0xd   : > { %v8146_v6 = vld [vmem:[%s10428_s1 + $0x8] sm:$0xff]  ;;  %v8145_v7 = vld [vmem:[%s10428_s1] sm:$0xff]  ;;  %v8160_v13 = vld [vmem:[%s10430_s3 + $0x38] sm:$0xff]  ;;  %701 = vst [vmem:[#allocation2 + $0x18] sm:$0xff] %v8601_v25  ;;  %s384_s23 = scalar_lea.vmem %s10438_s11, %s5608_s15 }
   0xe   : > { %s8700_s21 = scalar_lea.vmem %s10427_s0, %s8569_s14  ;;  %909 = vmatpush.bf16.msra.mxu2 %v8160_v13  ;;  %v8159_v15 = vld [vmem:[%s10430_s3 + $0x30] sm:$0xff]  ;;  %v8176_v16 = vld [vmem:[%s10430_s3 + $0xb8] sm:$0xff]  ;;  %v8158_v18 = vld [vmem:[%s10430_s3 + $0x28] sm:$0xff]  ;;  %702 = vst [vmem:[#allocation2 + $0x28] sm:$0xff] %v8601_v25 }
   0xf   : > { %v8131_v8 = vld [vmem:[%s8700_s21] sm:$0xff]  ;;  %v8132_v9 = vld [vmem:[%s8700_s21 + $0x8] sm:$0xff]  ;;  %v8133_v10 = vld [vmem:[%s8700_s21 + $0x10] sm:$0xff]  ;;  %1007 = vmatpush.bf16.msra.mxu3 %v8176_v16  ;;  %703 = vst [vmem:[#allocation2 + $0x38] sm:$0xff] %v8601_v25 }
  0x10   : > { %566 = vmatpush.bf16.msra.mxu0 %v8151_v1  ;;  %v8134_v11 = vld [vmem:[%s8700_s21 + $0x18] sm:$0xff]  ;;  %v8135_v12 = vld [vmem:[%s8700_s21 + $0x20] sm:$0xff]  ;;  %v8136_v14 = vld [vmem:[%s8700_s21 + $0x28] sm:$0xff]  ;;  %704 = vst [vmem:[#allocation2 + $0x48] sm:$0xff] %v8601_v25 }
  0x11   : > { %v8175_v17 = vld [vmem:[%s10430_s3 + $0xb0] sm:$0xff]  ;;  %v8157_v19 = vld [vmem:[%s10430_s3 + $0x20] sm:$0xff]  ;;  %v8174_v20 = vld [vmem:[%s10430_s3 + $0xa8] sm:$0xff]  ;;  %705 = vst [vmem:[#allocation2 + $0x58] sm:$0xff] %v8601_v25 }
  0x12   : > { %910 = vmatpush.bf16.msra.mxu2 %v8159_v15  ;;  %v8156_v21 = vld [vmem:[%s10430_s3 + $0x18] sm:$0xff]  ;;  %v8137_v22 = vld [vmem:[%s8700_s21 + $0x30] sm:$0xff]  ;;  %v8173_v23 = vld [vmem:[%s10430_s3 + $0xa0] sm:$0xff]  ;;  %706 = vst [vmem:[#allocation2 + $0x68] sm:$0xff] %v8601_v25 }
  0x13   : > { %1008 = vmatpush.bf16.msra.mxu3 %v8175_v17  ;;  %v8155_v24 = vld [vmem:[%s10430_s3 + $0x10] sm:$0xff]  ;;  %v8172_v26 = vld [vmem:[%s10430_s3 + $0x98] sm:$0xff]  ;;  %v8154_v27 = vld [vmem:[%s10430_s3 + $0x8] sm:$0xff]  ;;  %707 = vst [vmem:[#allocation2 + $0x78] sm:$0xff] %v8601_v25 }
  0x14   : > { %567 = vmatpush.bf16.msra.mxu0 %v8150_v2  ;;  %v8171_v28 = vld [vmem:[%s10430_s3 + $0x90] sm:$0xff]  ;;  %v8153_v29 = vld [vmem:[%s10430_s3] sm:$0xff]  ;;  %708 = vst [vmem:[#allocation2 + $0x88] sm:$0xff] %v8601_v25  ;;  %v8170_v30 = vld [vmem:[%s10430_s3 + $0x88] sm:$0xff] }
  0x15   : > { %709 = vst [vmem:[#allocation2 + $0x98] sm:$0xff] %v8601_v25  ;;  %v8138_v31 = vld [vmem:[%s8700_s21 + $0x38] sm:$0xff]  ;;  %v8169_v32 = vld [vmem:[%s10430_s3 + $0x80] sm:$0xff]  ;;  %v8191_v38 = vld [vmem:[%s10430_s3 + $0x130] sm:$0xff] }
  0x16   : > { %911 = vmatpush.bf16.msra.mxu2 %v8158_v18  ;;  %710 = vst [vmem:[#allocation2 + $0xa8] sm:$0xff] %v8601_v25  ;;  %v8761_v33 = vld [vmem:[%s10429_s2] ss:$0 sm:$0xff]  ;;  %v8192_v34 = vld [vmem:[%s10430_s3 + $0x138] sm:$0xff]  ;;  %v8190_v41 = vld [vmem:[%s10430_s3 + $0x128] sm:$0xff] }
  0x17   : > { %1009 = vmatpush.bf16.msra.mxu3 %v8174_v20  ;;  %711 = vst [vmem:[#allocation2 + $0xb8] sm:$0xff] %v8601_v25  ;;  %v8139_v35 = vld [vmem:[%s8700_s21 + $0x40] sm:$0xff]  ;;  %v8168_v40 = vld [vmem:[%s10430_s3 + $0x78] sm:$0xff]  ;;  %v8167_v44 = vld [vmem:[%s10430_s3 + $0x70] sm:$0xff] }
  0x18   : > { %568 = vmatpush.bf16.msra.mxu0 %v8149_v3  ;;  %712 = vst [vmem:[#allocation2 + $0xc8] sm:$0xff] %v8601_v25  ;;  %837 = vmatpush.bf16.msra.mxu1 %v8168_v40  ;;  %v8189_v45 = vld [vmem:[%s10430_s3 + $0x120] sm:$0xff]  ;;  %v8166_v48 = vld [vmem:[%s10430_s3 + $0x68] sm:$0xff]  ;;  %v8188_v49 = vld [vmem:[%s10430_s3 + $0x118] sm:$0xff] }
  0x19   : > { %713 = vst [vmem:[#allocation2 + $0xd8] sm:$0xff] %v8601_v25  ;;  %v8140_v50 = vld [vmem:[%s8700_s21 + $0x48] sm:$0xff]  ;;  %v8165_v53 = vld [vmem:[%s10430_s3 + $0x60] sm:$0xff]  ;;  %v8187_v54 = vld [vmem:[%s10430_s3 + $0x110] sm:$0xff] }
  0x1a   : > { %912 = vmatpush.bf16.msra.mxu2 %v8157_v19  ;;  %714 = vst [vmem:[#allocation2 + $0xe8] sm:$0xff] %v8601_v25  ;;  %v8164_v59 = vld [vmem:[%s10430_s3 + $0x58] sm:$0xff]  ;;  %v8186_v60 = vld [vmem:[%s10430_s3 + $0x108] sm:$0xff]  ;;  %v8163_v63 = vld [vmem:[%s10430_s3 + $0x50] sm:$0xff] }
  0x1b   : > { %1010 = vmatpush.bf16.msra.mxu3 %v8173_v23  ;;  %715 = vst [vmem:[#allocation2 + $0xf8] sm:$0xff] %v8601_v25  ;;  %v8185_v0 = vld [vmem:[%s10430_s3 + $0x100] sm:$0xff]  ;;  %v8162_v3 = vld [vmem:[%s10430_s3 + $0x48] sm:$0xff]  ;;  %v8183_v40 = vld [vmem:[%s10430_s3 + $0xf0] sm:$0xff] }
  0x1c   : > { %569 = vmatpush.bf16.msra.mxu0 %v8148_v4  ;;  %716 = vst [vmem:[#allocation2 + $0x108] sm:$0xff] %v8601_v25  ;;  %838 = vmatpush.bf16.msra.mxu1 %v8167_v44  ;;  %v8141_v4 = vld [vmem:[%s8700_s21 + $0x50] sm:$0xff]  ;;  %v8182_v44 = vld [vmem:[%s10430_s3 + $0xe8] sm:$0xff] }
  0x1d   : > { %717 = vst [vmem:[#allocation2 + $0x118] sm:$0xff] %v8601_v25 }
  0x1e   : > { %913 = vmatpush.bf16.msra.mxu2 %v8156_v21  ;;  %718 = vst [vmem:[#allocation2 + $0x128] sm:$0xff] %v8601_v25 }
  0x1f   : > { %1011 = vmatpush.bf16.msra.mxu3 %v8172_v26  ;;  %719 = vst [vmem:[#allocation2 + $0x138] sm:$0xff] %v8601_v25 }
  0x20   : > { %570 = vmatpush.bf16.msra.mxu0 %v8147_v5  ;;  %720 = vst [vmem:[#allocation2 + $0x148] sm:$0xff] %v8601_v25  ;;  %839 = vmatpush.bf16.msra.mxu1 %v8166_v48 }
  0x21   : > { %721 = vst [vmem:[#allocation2 + $0x158] sm:$0xff] %v8601_v25 }
  0x22   : > { %914 = vmatpush.bf16.msra.mxu2 %v8155_v24  ;;  %722 = vst [vmem:[#allocation2 + $0x168] sm:$0xff] %v8601_v25 }
  0x23   : > { %1012 = vmatpush.bf16.msra.mxu3 %v8171_v28  ;;  %724 = vst [vmem:[#allocation2 + $0x188] sm:$0xff] %v8601_v25 }
  0x24   : > { %571 = vmatpush.bf16.msra.mxu0 %v8146_v6  ;;  %725 = vst [vmem:[#allocation2 + $0x198] sm:$0xff] %v8601_v25  ;;  %840 = vmatpush.bf16.msra.mxu1 %v8165_v53  ;;  %v8216_v53 = vld [vmem:[%s10430_s3 + $0x1f8] sm:$0xff] }
  0x25   : > { %726 = vst [vmem:[#allocation2 + $0x1a8] sm:$0xff] %v8601_v25 }
  0x26   : > { %915 = vmatpush.bf16.msra.mxu2 %v8154_v27  ;;  %727 = vst [vmem:[#allocation2 + $0x1b8] sm:$0xff] %v8601_v25 }
  0x27   : > { %1013 = vmatpush.bf16.msra.mxu3 %v8170_v30  ;;  %728 = vst [vmem:[#allocation2 + $0x1c8] sm:$0xff] %v8601_v25 }
  0x28   : > { %572 = vmatpush.bf16.msra.mxu0 %v8145_v7  ;;  %729 = vst [vmem:[#allocation2 + $0x1d8] sm:$0xff] %v8601_v25  ;;  %841 = vmatpush.bf16.msra.mxu1 %v8164_v59  ;;  %v8161_v7 = vld [vmem:[%s10430_s3 + $0x40] sm:$0xff] }
  0x29   : > { %730 = vst [vmem:[#allocation2 + $0x1e8] sm:$0xff] %v8601_v25 }
  0x2a   : > { %916 = vmatpush.bf16.msra.mxu2 %v8153_v29  ;;  %733 = vst [vmem:[#allocation2 + $0x70] sm:$0xff] %v8601_v25 }
  0x2b   : > { %573 = vmatmul.bf16.vlgmr.msra.gmra.mxu0 %v8131_v8  ;;  %1014 = vmatpush.bf16.msra.mxu3 %v8169_v32  ;;  %734 = vst [vmem:[#allocation2 + $0xf0] sm:$0xff] %v8601_v25 }
  0x2c   : > { %842 = vmatpush.bf16.msra.mxu1 %v8163_v63 }
  0x2e   : > { %1215 = vmatpush.bf16.msrb.mxu2 %v8192_v34  ;;  %v8184_v34 = vld [vmem:[%s10430_s3 + $0xf8] sm:$0xff] }
  0x30   : > { %843 = vmatpush.bf16.msra.mxu1 %v8162_v3  ;;  %v8214_v3 = vld [vmem:[%s10430_s3 + $0x1e8] sm:$0xff] }
  0x32   : > { %1216 = vmatpush.bf16.msrb.mxu2 %v8191_v38 }
  0x34   : > { %844 = vmatpush.bf16.msra.mxu1 %v8161_v7  ;;  %v8278_v7 = vld [vmem:[%s10430_s3 + $0x3e8] sm:$0xff] }
  0x36   : > { %1217 = vmatpush.bf16.msrb.mxu2 %v8190_v41 }
  0x38   : > { %1111 = vmatpush.bf16.msrb.mxu1 %v8184_v34 }
  0x3a   : > { %1218 = vmatpush.bf16.msrb.mxu2 %v8189_v45  ;;  %v8200_v45 = vld [vmem:[%s10430_s3 + $0x178] sm:$0xff] }
  0x3b   : > { %578 = vmatmul.bf16.gmra.mxu0 %v8132_v9  ;;  %1320 = vmatpush.bf16.msrb.mxu3 %v8200_v45 }
  0x3c   : > { %1112 = vmatpush.bf16.msrb.mxu1 %v8183_v40  ;;  %v8275_v40 = vld [vmem:[%s10430_s3 + $0x3d0] sm:$0xff] }
  0x3e   : > { %1219 = vmatpush.bf16.msrb.mxu2 %v8188_v49  ;;  %v8181_v49 = vld [vmem:[%s10430_s3 + $0xe0] sm:$0xff] }
  0x40   : > { %1113 = vmatpush.bf16.msrb.mxu1 %v8182_v44 }
  0x42   : > { %1220 = vmatpush.bf16.msrb.mxu2 %v8187_v54  ;;  %v8180_v54 = vld [vmem:[%s10430_s3 + $0xd8] sm:$0xff] }
  0x44   : > { %1114 = vmatpush.bf16.msrb.mxu1 %v8181_v49 }
  0x46   : > { %1221 = vmatpush.bf16.msrb.mxu2 %v8186_v60  ;;  %v8215_v60 = vld [vmem:[%s10430_s3 + $0x1f0] sm:$0xff] }
  0x48   : > { %1115 = vmatpush.bf16.msrb.mxu1 %v8180_v54 }
  0x4a   : > { %1222 = vmatpush.bf16.msrb.mxu2 %v8185_v0  ;;  %v8279_v0 = vld [vmem:[%s10430_s3 + $0x3f0] sm:$0xff] }
  0x4b   : > { %583 = vmatmul.bf16.gmra.mxu0 %v8133_v10 }
  0x5b   : > { %588 = vmatmul.bf16.gmra.mxu0 %v8134_v11 }
  0x6b   : > { %593 = vmatmul.bf16.gmra.mxu0 %v8135_v12 }
  0x7b   : > { %598 = vmatmul.bf16.gmra.mxu0 %v8136_v14 }
  0x8b   : > { %603 = vmatmul.bf16.gmra.mxu0 %v8137_v22  ;;  %v8142_v22 = vld [vmem:[%s8700_s21 + $0x58] sm:$0xff] }
  0x9b   : > { %608 = vmatmul.bf16.gmra.mxu0 %v8138_v31 }
  0xa8   : > { %v574_v36 = vpop.f32.mrf.mxu0 }
  0xa9   : > { %v575_v37 = vadd.f32 %v8761_v33, %v574_v36 }
  0xab   : > { %v644_v39 = vmax.f32 %v575_v37, 0.0  ;;  %613 = vmatmul.bf16.gmra.mxu0 %v8139_v35 }
  0xad   : > { %672 = vst [vmem:[#allocation2] sm:$0xff] %v644_v39 }
  0xb0   : > { %v576_v42 = vpop.f32.mrf.mxu0 }
  0xb1   : > { %v577_v43 = vadd.f32 %v8761_v33, %v576_v42 }
  0xb3   : > { %v645_v46 = vmax.f32 %v577_v43, 0.0 }
  0xb4   : > { %v933_v56 = vld [vmem:[#allocation2 + $0x1] sm:$0xff] }
  0xb5   : > { %673 = vst [vmem:[#allocation2 + $0x10] sm:$0xff] %v645_v46  ;;  %v743_v47 = vpack.c.bf16 %v645_v46, %v644_v39  ;;  %v1141_v42 = vld [vmem:[#allocation2 + $0x2] sm:$0xff] }
  0xb6   : > { %v8143_v46 = vld [vmem:[%s8700_s21 + $0x60] sm:$0xff] }
  0xb7   : > { %917 = vmatmul.bf16.vlgmr.msra.gmra.mxu2 %v743_v47 }
  0xb8   : > { %v579_v51 = vpop.f32.mrf.mxu0  ;;  %1529 = vmatpush.bf16.msra.mxu2 %v8216_v53 }
  0xb9   : > { %v580_v52 = vadd.f32 %v8761_v33, %v579_v51 }
  0xbb   : > { %v646_v55 = vmax.f32 %v580_v52, 0.0  ;;  %618 = vmatmul.bf16.gmra.mxu0 %v8140_v50  ;;  %v8199_v50 = vld [vmem:[%s10430_s3 + $0x170] sm:$0xff] }
  0xbc   : > { %v934_v57 = vld [vmem:[#allocation2 + $0x11] sm:$0xff]  ;;  %1321 = vmatpush.bf16.msrb.mxu3 %v8199_v50  ;;  %1530 = vmatpush.bf16.msra.mxu2 %v8215_v60 }
  0xbd   : > { %674 = vst [vmem:[#allocation2 + $0x20] sm:$0xff] %v646_v55  ;;  %v939_v58 = vpack.c.bf16 %v934_v57, %v933_v56  ;;  %v1142_v39 = vld [vmem:[#allocation2 + $0x12] sm:$0xff] }
  0xbe   : > { %v1147_v43 = vpack.c.bf16 %v1142_v39, %v1141_v42  ;;  %v8280_v56 = vld [vmem:[%s10430_s3 + $0x3f8] sm:$0xff]  ;;  %v8193_v39 = vld [vmem:[%s10430_s3 + $0x140] sm:$0xff] }
  0xbf   : > { %1015 = vmatmul.bf16.vlgmr.msra.gmra.mxu3 %v939_v58  ;;  %2364 = vmatpush.bf16.msrb.mxu0 %v8280_v56 }
  0xc0   : > { %v581_v61 = vpop.f32.mrf.mxu0  ;;  %1531 = vmatpush.bf16.msra.mxu2 %v8214_v3 }
  0xc1   : > { %v582_v62 = vadd.f32 %v8761_v33, %v581_v61  ;;  %v8179_v61 = vld [vmem:[%s10430_s3 + $0xd0] sm:$0xff] }
  0xc2   : > { %1116 = vmatpush.bf16.msrb.mxu1 %v8179_v61 }
  0xc3   : > { %v647_v1 = vmax.f32 %v582_v62, 0.0  ;;  %v8197_v62 = vld [vmem:[%s10430_s3 + $0x160] sm:$0xff]  ;;  %2365 = vmatpush.bf16.msrb.mxu0 %v8279_v0 }
  0xc4   : > { %v935_v9 = vld [vmem:[#allocation2 + $0x21] sm:$0xff] }
  0xc5   : > { %675 = vst [vmem:[#allocation2 + $0x30] sm:$0xff] %v647_v1  ;;  %v744_v2 = vpack.c.bf16 %v647_v1, %v646_v55  ;;  %v8819_v11 = vld [vmem:[#allocation2 + $0x21] sm:$0xff] }
  0xc6   : > { %v8821_v13 = vld [vmem:[#allocation2 + $0x22] sm:$0xff] }
  0xc7   : > { %922 = vmatmul.bf16.gmra.mxu2 %v744_v2  ;;  %v8198_v55 = vld [vmem:[%s10430_s3 + $0x168] sm:$0xff]  ;;  %2366 = vmatpush.bf16.msrb.mxu0 %v8278_v7  ;;  %v8312_v7 = vld [vmem:[%s10430_s3 + $0x4f8] sm:$0xff] }
  0xc8   : > { %v584_v5 = vpop.f32.mrf.mxu0  ;;  %1322 = vmatpush.bf16.msrb.mxu3 %v8198_v55  ;;  %v1143_v1 = vld [vmem:[#allocation2 + $0x22] sm:$0xff] }
  0xc9   : > { %v585_v6 = vadd.f32 %v8761_v33, %v584_v5  ;;  %v8196_v5 = vld [vmem:[%s10430_s3 + $0x158] sm:$0xff] }
  0xcb   : > { %v648_v8 = vmax.f32 %v585_v6, 0.0  ;;  %623 = vmatmul.bf16.gmra.mxu0 %v8141_v4  ;;  %v8178_v4 = vld [vmem:[%s10430_s3 + $0xc8] sm:$0xff] }
  0xcc   : > { %v936_v10 = vld [vmem:[#allocation2 + $0x31] sm:$0xff]  ;;  %1323 = vmatpush.bf16.msrb.mxu3 %v8197_v62  ;;  %v8144_v6 = vld [vmem:[%s8700_s21 + $0x68] sm:$0xff]  ;;  %1117 = vmatpush.bf16.msrb.mxu1 %v8178_v4 }
  0xcd   : > { %676 = vst [vmem:[#allocation2 + $0x40] sm:$0xff] %v648_v8  ;;  %v940_v12 = vpack.c.bf16 %v936_v10, %v935_v9  ;;  %v8823_v14 = vld [vmem:[#allocation2 + $0x31] sm:$0xff]  ;;  %v8213_v10 = vld [vmem:[%s10430_s3 + $0x1e0] sm:$0xff] }
  0xce   : > { %v8825_v15 = vld [vmem:[#allocation2 + $0x32] sm:$0xff]  ;;  %v3027_v16 = vpack.c.bf16 %v8823_v14, %v8819_v11  ;;  %1532 = vmatpush.bf16.msra.mxu2 %v8213_v10 }
  0xcf   : > { %v3235_v17 = vpack.c.bf16 %v8825_v15, %v8821_v13  ;;  %1020 = vmatmul.bf16.gmra.mxu3 %v940_v12  ;;  %v1144_v59 = vld [vmem:[#allocation2 + $0x32] sm:$0xff]  ;;  %v8177_v12 = vld [vmem:[%s10430_s3 + $0xc0] sm:$0xff] }
  0xd0   : > { %v586_v18 = vpop.f32.mrf.mxu0  ;;  %v1148_v2 = vpack.c.bf16 %v1144_v59, %v1143_v1  ;;  %1324 = vmatpush.bf16.msrb.mxu3 %v8196_v5  ;;  %1118 = vmatpush.bf16.msrb.mxu1 %v8177_v12  ;;  %v8240_v5 = vld [vmem:[%s10430_s3 + $0x2b8] sm:$0xff]  ;;  %v8239_v12 = vld [vmem:[%s10430_s3 + $0x2b0] sm:$0xff] }
  0xd1   : > { %v587_v19 = vadd.f32 %v8761_v33, %v586_v18  ;;  %v8195_v18 = vld [vmem:[%s10430_s3 + $0x150] sm:$0xff] }
  0xd3   : > { %v649_v20 = vmax.f32 %v587_v19, 0.0 }
  0xd4   : > { %v937_v26 = vld [vmem:[#allocation2 + $0x41] sm:$0xff]  ;;  %1325 = vmatpush.bf16.msrb.mxu3 %v8195_v18  ;;  %v8207_v18 = vld [vmem:[%s10430_s3 + $0x1b0] sm:$0xff] }
  0xd5   : > { %677 = vst [vmem:[#allocation2 + $0x50] sm:$0xff] %v649_v20  ;;  %v745_v21 = vpack.c.bf16 %v649_v20, %v648_v8  ;;  %v8834_v28 = vld [vmem:[#allocation2 + $0x41] sm:$0xff] }
  0xd6   : > { %v8836_v30 = vld [vmem:[#allocation2 + $0x42] sm:$0xff] }
  0xd7   : > { %927 = vmatmul.bf16.gmra.mxu2 %v745_v21  ;;  %v8277_v20 = vld [vmem:[%s10430_s3 + $0x3e0] sm:$0xff] }
  0xd8   : > { %v589_v23 = vpop.f32.mrf.mxu0  ;;  %2367 = vmatpush.bf16.msrb.mxu0 %v8277_v20  ;;  %v1145_v42 = vld [vmem:[#allocation2 + $0x42] sm:$0xff] }
  0xd9   : > { %v590_v24 = vadd.f32 %v8761_v33, %v589_v23 }
  0xdb   : > { %v650_v25 = vmax.f32 %v590_v24, 0.0  ;;  %628 = vmatmul.bf16.gmra.mxu0 %v8142_v22 }
  0xdc   : > { %v938_v27 = vld [vmem:[#allocation2 + $0x51] sm:$0xff] }
  0xdd   : > { %678 = vst [vmem:[#allocation2 + $0x60] sm:$0xff] %v650_v25  ;;  %v941_v29 = vpack.c.bf16 %v938_v27, %v937_v26  ;;  %v8838_v31 = vld [vmem:[#allocation2 + $0x51] sm:$0xff]  ;;  %v8194_v26 = vld [vmem:[%s10430_s3 + $0x148] sm:$0xff] }
  0xde   : > { %v8840_v32 = vld [vmem:[#allocation2 + $0x52] sm:$0xff]  ;;  %v3028_v35 = vpack.c.bf16 %v8838_v31, %v8834_v28  ;;  %1326 = vmatpush.bf16.msrb.mxu3 %v8194_v26  ;;  %v8206_v26 = vld [vmem:[%s10430_s3 + $0x1a8] sm:$0xff] }
  0xdf   : > { %v3236_v36 = vpack.c.bf16 %v8840_v32, %v8836_v30  ;;  %1025 = vmatmul.bf16.gmra.mxu3 %v941_v29  ;;  %v8212_v25 = vld [vmem:[%s10430_s3 + $0x1d8] sm:$0xff] }
  0xe0   : > { %v591_v37 = vpop.f32.mrf.mxu0  ;;  %v8276_v27 = vld [vmem:[%s10430_s3 + $0x3d8] sm:$0xff]  ;;  %1533 = vmatpush.bf16.msra.mxu2 %v8212_v25  ;;  %v8238_v25 = vld [vmem:[%s10430_s3 + $0x2a8] sm:$0xff] }
  0xe1   : > { %v592_v38 = vadd.f32 %v8761_v33, %v591_v37  ;;  %v1146_v37 = vld [vmem:[#allocation2 + $0x52] sm:$0xff]  ;;  %2368 = vmatpush.bf16.msrb.mxu0 %v8276_v27 }
  0xe2   : > { %v1149_v45 = vpack.c.bf16 %v1146_v37, %v1145_v42  ;;  %1327 = vmatpush.bf16.msrb.mxu3 %v8193_v39  ;;  %v8237_v39 = vld [vmem:[%s10430_s3 + $0x2a0] sm:$0xff] }
  0xe3   : > { %v651_v41 = vmax.f32 %v592_v38, 0.0  ;;  %v8211_v38 = vld [vmem:[%s10430_s3 + $0x1d0] sm:$0xff] }
  0xe4   : > { %1534 = vmatpush.bf16.msra.mxu2 %v8211_v38  ;;  %v8223_v38 = vld [vmem:[%s10430_s3 + $0x230] sm:$0xff] }
  0xe5   : > { %679 = vst [vmem:[#allocation2 + $0x80] sm:$0xff] %v651_v41  ;;  %2369 = vmatpush.bf16.msrb.mxu0 %v8275_v40  ;;  %v8205_v40 = vld [vmem:[%s10430_s3 + $0x1a0] sm:$0xff] }
  0xe7   : > { %1223 = vmatmul.bf16.vlgmr.msrb.gmra.mxu2 %v1147_v43 }
  0xe8   : > { %v594_v47 = vpop.f32.mrf.mxu0 }
  0xe9   : > { %v595_v48 = vadd.f32 %v8761_v33, %v594_v47  ;;  %v8210_v47 = vld [vmem:[%s10430_s3 + $0x1c8] sm:$0xff] }
  0xea   : > { %1535 = vmatpush.bf16.msra.mxu2 %v8210_v47 }
  0xeb   : > { %v652_v51 = vmax.f32 %v595_v48, 0.0  ;;  %633 = vmatmul.bf16.gmra.mxu0 %v8143_v46  ;;  %v8274_v48 = vld [vmem:[%s10430_s3 + $0x3c8] sm:$0xff] }
  0xec   : > { %2370 = vmatpush.bf16.msrb.mxu0 %v8274_v48  ;;  %v1037_v3 = vld [vmem:[#allocation2 + $0x81] sm:$0xff] }
  0xed   : > { %680 = vst [vmem:[#allocation2 + $0x90] sm:$0xff] %v652_v51  ;;  %v769_v52 = vpack.c.bf16 %v652_v51, %v651_v41  ;;  %v8209_v51 = vld [vmem:[%s10430_s3 + $0x1c0] sm:$0xff] }
  0xee   : > { %1536 = vmatpush.bf16.msra.mxu2 %v8209_v51  ;;  %v8236_v51 = vld [vmem:[%s10430_s3 + $0x298] sm:$0xff] }
  0xef   : > { %845 = vmatmul.bf16.vlgmr.msra.gmra.mxu1 %v769_v52  ;;  %v8273_v52 = vld [vmem:[%s10430_s3 + $0x3c0] sm:$0xff] }
  0xf0   : > { %v596_v57 = vpop.f32.mrf.mxu0  ;;  %2371 = vmatpush.bf16.msrb.mxu0 %v8273_v52  ;;  %v8204_v52 = vld [vmem:[%s10430_s3 + $0x198] sm:$0xff] }
  0xf1   : > { %v597_v58 = vadd.f32 %v8761_v33, %v596_v57 }
  0xf2   : > { %1842 = vmatpush.bf16.msrb.mxu2 %v8240_v5  ;;  %v8234_v5 = vld [vmem:[%s10430_s3 + $0x288] sm:$0xff] }
  0xf3   : > { %v653_v63 = vmax.f32 %v597_v58, 0.0 }
  0xf4   : > { %v8918_v21 = vld [vmem:[#allocation2 + $0x91] sm:$0xff]  ;;  %2781 = vmatpush.bf16.msra.mxu0 %v8312_v7 }
  0xf5   : > { %681 = vst [vmem:[#allocation2 + $0xa0] sm:$0xff] %v653_v63  ;;  %v1043_v4 = vpack.c.bf16 %v8918_v21, %v1037_v3 }
  0xf6   : > { %1843 = vmatpush.bf16.msrb.mxu2 %v8239_v12 }
  0xf7   : > { %1228 = vmatmul.bf16.gmra.mxu2 %v1148_v2 }
  0xf8   : > { %v599_v8 = vpop.f32.mrf.mxu0 }
  0xf9   : > { %v600_v9 = vadd.f32 %v8761_v33, %v599_v8 }
  0xfa   : > { %1844 = vmatpush.bf16.msrb.mxu2 %v8238_v25 }
  0xfb   : > { %v654_v19 = vmax.f32 %v600_v9, 0.0  ;;  %638 = vmatmul.bf16.gmra.mxu0 %v8144_v6  ;;  %v8208_v6 = vld [vmem:[%s10430_s3 + $0x1b8] sm:$0xff] }
  0xfc   : > { %v8920_v22 = vld [vmem:[#allocation2 + $0xa1] sm:$0xff]  ;;  %1425 = vmatpush.bf16.msra.mxu1 %v8208_v6 }
  0xfd   : > { %682 = vst [vmem:[#allocation2 + $0xb0] sm:$0xff] %v654_v19  ;;  %v770_v23 = vpack.c.bf16 %v654_v19, %v653_v63  ;;  %v2087_v24 = vpack.c.bf16 %v8920_v22, %v8918_v21  ;;  %v8943_v43 = vld [vmem:[#allocation2 + $0xa0] sm:$0xff]  ;;  %v8311_v19 = vld [vmem:[%s10430_s3 + $0x4f0] sm:$0xff]  ;;  %v8202_v6 = vld [vmem:[%s10430_s3 + $0x188] sm:$0xff] }
  0xfe   : > { %2782 = vmatpush.bf16.msra.mxu0 %v8311_v19  ;;  %1845 = vmatpush.bf16.msrb.mxu2 %v8237_v39  ;;  %v8233_v19 = vld [vmem:[%s10430_s3 + $0x280] sm:$0xff] }
  0xff   : > { %850 = vmatmul.bf16.gmra.mxu1 %v770_v23  ;;  %v8224_v23 = vld [vmem:[%s10430_s3 + $0x238] sm:$0xff]  ;;  %v8269_v21 = vld [vmem:[%s10430_s3 + $0x3a0] sm:$0xff] }
 0x100   : > { %v601_v29 = vpop.f32.mrf.mxu0  ;;  %1426 = vmatpush.bf16.msra.mxu1 %v8207_v18  ;;  %1633 = vmatpush.bf16.msra.mxu3 %v8224_v23  ;;  %v8219_v18 = vld [vmem:[%s10430_s3 + $0x210] sm:$0xff] }
 0x101   : > { %v602_v34 = vadd.f32 %v8761_v33, %v601_v29  ;;  %v8310_v29 = vld [vmem:[%s10430_s3 + $0x4e8] sm:$0xff] }
 0x102   : > { %2783 = vmatpush.bf16.msra.mxu0 %v8310_v29  ;;  %1846 = vmatpush.bf16.msrb.mxu2 %v8236_v51 }
 0x103   : > { %v655_v41 = vmax.f32 %v602_v34, 0.0 }
 0x104   : > { %v8945_v44 = vld [vmem:[#allocation2 + $0xb0] sm:$0xff]  ;;  %1427 = vmatpush.bf16.msra.mxu1 %v8206_v26  ;;  %1634 = vmatpush.bf16.msra.mxu3 %v8223_v38  ;;  %v8305_v26 = vld [vmem:[%s10430_s3 + $0x4c0] sm:$0xff] }
 0x105   : > { %683 = vst [vmem:[#allocation2 + $0xc0] sm:$0xff] %v655_v41  ;;  %v2923_v46 = vpack.c.bf16 %v8945_v44, %v8943_v43  ;;  %v8962_v54 = vld [vmem:[#allocation2 + $0xb1] sm:$0xff] }
 0x106   : > { %v9023_v48 = vpack.c.bf16 %v8962_v54, %v8920_v22  ;;  %v8291_v22 = vld [vmem:[%s10430_s3 + $0x450] sm:$0xff] }
 0x107   : > { %1233 = vmatmul.bf16.gmra.mxu2 %v1149_v45  ;;  %v8309_v45 = vld [vmem:[%s10430_s3 + $0x4e0] sm:$0xff] }
 0x108   : > { %v604_v49 = vpop.f32.mrf.mxu0  ;;  %1428 = vmatpush.bf16.msra.mxu1 %v8205_v40  ;;  %2784 = vmatpush.bf16.msra.mxu0 %v8309_v45 }
 0x109   : > { %v605_v50 = vadd.f32 %v8761_v33, %v604_v49 }
 0x10b   : > { %v656_v53 = vmax.f32 %v605_v50, 0.0  ;;  %v8222_v50 = vld [vmem:[%s10430_s3 + $0x228] sm:$0xff] }
 0x10c   : > { %v8964_v55 = vld [vmem:[#allocation2 + $0xc1] sm:$0xff]  ;;  %1635 = vmatpush.bf16.msra.mxu3 %v8222_v50  ;;  %1429 = vmatpush.bf16.msra.mxu1 %v8204_v52 }
 0x10d   : > { %684 = vst [vmem:[#allocation2 + $0xd0] sm:$0xff] %v656_v53  ;;  %v771_v56 = vpack.c.bf16 %v656_v53, %v655_v41  ;;  %v2088_v57 = vpack.c.bf16 %v8964_v55, %v8962_v54  ;;  %v8969_v61 = vld [vmem:[#allocation2 + $0xc0] sm:$0xff] }
 0x10f   : > { %855 = vmatmul.bf16.gmra.mxu1 %v771_v56  ;;  %v8308_v56 = vld [vmem:[%s10430_s3 + $0x4d8] sm:$0xff] }
 0x110   : > { %v606_v58 = vpop.f32.mrf.mxu0  ;;  %2785 = vmatpush.bf16.msra.mxu0 %v8308_v56 }
 0x111   : > { %v607_v59 = vadd.f32 %v8761_v33, %v606_v58 }
 0x113   : > { %v657_v60 = vmax.f32 %v607_v59, 0.0 }
 0x114   : > { %v8971_v62 = vld [vmem:[#allocation2 + $0xd0] sm:$0xff] }
 0x115   : > { %685 = vst [vmem:[#allocation2 + $0xe0] sm:$0xff] %v657_v60  ;;  %v2924_v63 = vpack.c.bf16 %v8971_v62, %v8969_v61  ;;  %v8221_v60 = vld [vmem:[%s10430_s3 + $0x220] sm:$0xff] }
 0x116   : > { %1636 = vmatpush.bf16.msra.mxu3 %v8221_v60  ;;  %v8344_v60 = vld [vmem:[%s10430_s3 + $0x5f8] sm:$0xff] }
 0x118   : > { %v609_v0 = vpop.f32.mrf.mxu0 }
 0x119   : > { %v610_v1 = vadd.f32 %v8761_v33, %v609_v0  ;;  %v8235_v0 = vld [vmem:[%s10430_s3 + $0x290] sm:$0xff] }
 0x11a   : > { %1847 = vmatpush.bf16.msrb.mxu2 %v8235_v0 }
 0x11b   : > { %v658_v2 = vmax.f32 %v610_v1, 0.0  ;;  %v8203_v1 = vld [vmem:[%s10430_s3 + $0x190] sm:$0xff] }
 0x11c   : > { %1430 = vmatpush.bf16.msra.mxu1 %v8203_v1 }
 0x11d   : > { %686 = vst [vmem:[#allocation2 + $0x100] sm:$0xff] %v658_v2 }
 0x11e   : > { %1848 = vmatpush.bf16.msrb.mxu2 %v8234_v5  ;;  %v8231_v5 = vld [vmem:[%s10430_s3 + $0x270] sm:$0xff] }
 0x11f   : > { %1119 = vmatmul.bf16.vlgmr.msrb.gmra.mxu1 %v1043_v4  ;;  %v8220_v4 = vld [vmem:[%s10430_s3 + $0x218] sm:$0xff] }
 0x120   : > { %v611_v8 = vpop.f32.mrf.mxu0  ;;  %1637 = vmatpush.bf16.msra.mxu3 %v8220_v4  ;;  %1431 = vmatpush.bf16.msra.mxu1 %v8202_v6  ;;  %v8263_v4 = vld [vmem:[%s10430_s3 + $0x370] sm:$0xff] }
 0x121   : > { %v612_v9 = vadd.f32 %v8761_v33, %v611_v8  ;;  %v8306_v8 = vld [vmem:[%s10430_s3 + $0x4c8] sm:$0xff]  ;;  %v8343_v6 = vld [vmem:[%s10430_s3 + $0x5f0] sm:$0xff] }
 0x122   : > { %1849 = vmatpush.bf16.msrb.mxu2 %v8233_v19 }
 0x123   : > { %v659_v10 = vmax.f32 %v612_v9, 0.0 }
 0x124   : > { %v1455_v41 = vld [vmem:[#allocation2 + $0x101] sm:$0xff]  ;;  %1638 = vmatpush.bf16.msra.mxu3 %v8219_v18 }
 0x125   : > { %687 = vst [vmem:[#allocation2 + $0x110] sm:$0xff] %v659_v10  ;;  %v1252_v20 = vpack.c.bf16 %v659_v10, %v658_v2  ;;  %v8307_v2 = vld [vmem:[%s10430_s3 + $0x4d0] sm:$0xff]  ;;  %v8342_v18 = vld [vmem:[%s10430_s3 + $0x5e8] sm:$0xff] }
 0x126   : > { %2786 = vmatpush.bf16.msra.mxu0 %v8307_v2 }
 0x127   : > { %1328 = vmatmul.bf16.vlgmr.msrb.gmra.mxu3 %v1252_v20  ;;  %v8201_v20 = vld [vmem:[%s10430_s3 + $0x180] sm:$0xff] }
 0x128   : > { %v614_v27 = vpop.f32.mrf.mxu0  ;;  %1432 = vmatpush.bf16.msra.mxu1 %v8201_v20  ;;  %v1769_v20 = vld [vmem:[#allocation2 + $0x20] sm:$0xff] }
 0x129   : > { %v615_v34 = vadd.f32 %v8761_v33, %v614_v27 }
 0x12a   : > { %2787 = vmatpush.bf16.msra.mxu0 %v8306_v8  ;;  %v8262_v8 = vld [vmem:[%s10430_s3 + $0x368] sm:$0xff] }
 0x12b   : > { %v660_v37 = vmax.f32 %v615_v34, 0.0 }
 0x12c   : > { %v1456_v42 = vld [vmem:[#allocation2 + $0x111] sm:$0xff] }
 0x12d   : > { %688 = vst [vmem:[#allocation2 + $0x120] sm:$0xff] %v660_v37  ;;  %v1461_v47 = vpack.c.bf16 %v1456_v42, %v1455_v41  ;;  %v2296_v49 = vpack.c.bf16 %v660_v37, %v659_v10  ;;  %v9064_v10 = vld [vmem:[#allocation2 + $0xd1] sm:$0xff]  ;;  %v8217_v41 = vld [vmem:[%s10430_s3 + $0x200] sm:$0xff] }
 0x12e   : > { %v9080_v29 = vpack.c.bf16 %v9064_v10, %v8964_v55  ;;  %2788 = vmatpush.bf16.msra.mxu0 %v8305_v26  ;;  %v8247_v26 = vld [vmem:[%s10430_s3 + $0x2f0] sm:$0xff]  ;;  %v1880_v55 = vpack.c.bf16 %v8969_v61, %v8945_v44 }
 0x12f   : > { %1537 = vmatmul.bf16.vlgmr.msra.gmra.mxu2 %v1461_v47  ;;  %1124 = vmatmul.bf16.gmra.mxu1 %v9023_v48 }
 0x130   : > { %v616_v53 = vpop.f32.mrf.mxu0  ;;  %2372 = vmatmul.bf16.vlgmr.msrb.gmra.mxu0 %v2296_v49 }
 0x131   : > { %v617_v58 = vadd.f32 %v8761_v33, %v616_v53 }
 0x132   : > { %3199 = vmatpush.bf16.msrb.mxu0 %v8344_v60  ;;  %v8259_v60 = vld [vmem:[%s10430_s3 + $0x350] sm:$0xff] }
 0x133   : > { %v661_v59 = vmax.f32 %v617_v58, 0.0  ;;  %v8264_v58 = vld [vmem:[%s10430_s3 + $0x378] sm:$0xff] }
 0x134   : > { %v1457_v23 = vld [vmem:[#allocation2 + $0x121] sm:$0xff]  ;;  %2155 = vmatpush.bf16.msra.mxu2 %v8264_v58 }
 0x135   : > { %689 = vst [vmem:[#allocation2 + $0x130] sm:$0xff] %v661_v59  ;;  %v1253_v3 = vpack.c.bf16 %v661_v59, %v660_v37  ;;  %v8218_v37 = vld [vmem:[%s10430_s3 + $0x208] sm:$0xff] }
 0x136   : > { %1639 = vmatpush.bf16.msra.mxu3 %v8218_v37  ;;  %3200 = vmatpush.bf16.msrb.mxu0 %v8343_v6 }
 0x137   : > { %1333 = vmatmul.bf16.gmra.mxu3 %v1253_v3 }
 0x138   : > { %v619_v7 = vpop.f32.mrf.mxu0  ;;  %2156 = vmatpush.bf16.msra.mxu2 %v8263_v4  ;;  %v8339_v4 = vld [vmem:[%s10430_s3 + $0x5d0] sm:$0xff] }
 0x139   : > { %v620_v9 = vadd.f32 %v8761_v33, %v619_v7  ;;  %v8248_v7 = vld [vmem:[%s10430_s3 + $0x2f8] sm:$0xff] }
 0x13a   : > { %1640 = vmatpush.bf16.msra.mxu3 %v8217_v41  ;;  %v9090_v45 = vpop.f32.mrf.mxu2  ;;  %3201 = vmatpush.bf16.msrb.mxu0 %v8342_v18  ;;  %v8226_v18 = vld [vmem:[%s10430_s3 + $0x248] sm:$0xff] }
 0x13b   : > { %v662_v12 = vmax.f32 %v620_v9, 0.0  ;;  %v8230_v9 = vld [vmem:[%s10430_s3 + $0x268] sm:$0xff] }
 0x13c   : > { %v1458_v25 = vld [vmem:[#allocation2 + $0x131] sm:$0xff]  ;;  %2157 = vmatpush.bf16.msra.mxu2 %v8262_v8 }
 0x13d   : > { %690 = vst [vmem:[#allocation2 + $0x140] sm:$0xff] %v662_v12  ;;  %v1462_v27 = vpack.c.bf16 %v1458_v25, %v1457_v23  ;;  %v2297_v34 = vpack.c.bf16 %v662_v12, %v661_v59  ;;  %v8232_v59 = vld [vmem:[%s10430_s3 + $0x278] sm:$0xff]  ;;  %v9127_v23 = vld [vmem:[#allocation2 + $0x122] sm:$0xff] }
 0x13e   : > { %1737 = vmatpush.bf16.msrb.mxu1 %v8232_v59  ;;  %1947 = vmatpush.bf16.msrb.mxu3 %v8248_v7  ;;  %v8245_v59 = vld [vmem:[%s10430_s3 + $0x2e0] sm:$0xff]  ;;  %v8244_v8 = vld [vmem:[%s10430_s3 + $0x2d8] sm:$0xff] }
 0x13f   : > { %1542 = vmatmul.bf16.gmra.mxu2 %v1462_v27  ;;  %1129 = vmatmul.bf16.gmra.mxu1 %v9080_v29  ;;  %v8261_v27 = vld [vmem:[%s10430_s3 + $0x360] sm:$0xff] }
 0x140   : > { %v621_v38 = vpop.f32.mrf.mxu0  ;;  %2377 = vmatmul.bf16.gmra.mxu0 %v2297_v34  ;;  %v8229_v34 = vld [vmem:[%s10430_s3 + $0x260] sm:$0xff]  ;;  %2158 = vmatpush.bf16.msra.mxu2 %v8261_v27 }
 0x141   : > { %v622_v39 = vadd.f32 %v8761_v33, %v621_v38  ;;  %v1768_v38 = vld [vmem:[#allocation2 + $0x10] sm:$0xff]  ;;  %v1771_v27 = vld [vmem:[#allocation2 + $0x40] sm:$0xff] }
 0x142   : > { %v9103_v2 = vpop.f32.mrf.mxu2  ;;  %1738 = vmatpush.bf16.msrb.mxu1 %v8231_v5  ;;  %1948 = vmatpush.bf16.msrb.mxu3 %v8247_v26  ;;  %v1016_v5 = vpop.f32.mrf.mxu3  ;;  %v8257_v26 = vld [vmem:[%s10430_s3 + $0x340] sm:$0xff] }
 0x143   : > { %v663_v40 = vmax.f32 %v622_v39, 0.0  ;;  %v8341_v39 = vld [vmem:[%s10430_s3 + $0x5e0] sm:$0xff] }
 0x144   : > { %v1459_v51 = vld [vmem:[#allocation2 + $0x141] sm:$0xff]  ;;  %3202 = vmatpush.bf16.msrb.mxu0 %v8341_v39 }
 0x145   : > { %691 = vst [vmem:[#allocation2 + $0x150] sm:$0xff] %v663_v40  ;;  %v1254_v42 = vpack.c.bf16 %v663_v40, %v662_v12  ;;  %v8225_v39 = vld [vmem:[%s10430_s3 + $0x240] sm:$0xff] }
 0x146   : > { %1739 = vmatpush.bf16.msrb.mxu1 %v8230_v9  ;;  %v8258_v9 = vld [vmem:[%s10430_s3 + $0x348] sm:$0xff] }
 0x147   : > { %1338 = vmatmul.bf16.gmra.mxu3 %v1254_v42  ;;  %v9143_v42 = vld [vmem:[#allocation2 + $0x112] sm:$0xff] }
 0x148   : > { %v624_v47 = vpop.f32.mrf.mxu0 }
 0x149   : > { %v625_v49 = vadd.f32 %v8761_v33, %v624_v47  ;;  %v2713_v47 = vpack.c.bf16 %v9127_v23, %v9143_v42 }
 0x14a   : > { %v9138_v37 = vpop.f32.mrf.mxu2  ;;  %1740 = vmatpush.bf16.msrb.mxu1 %v8229_v34 }
 0x14b   : > { %v664_v50 = vmax.f32 %v625_v49, 0.0  ;;  %v8246_v49 = vld [vmem:[%s10430_s3 + $0x2e8] sm:$0xff] }
 0x14c   : > { %v1460_v52 = vld [vmem:[#allocation2 + $0x151] sm:$0xff]  ;;  %1949 = vmatpush.bf16.msrb.mxu3 %v8246_v49 }
 0x14d   : > { %692 = vst [vmem:[#allocation2 + $0x160] sm:$0xff] %v664_v50  ;;  %v1463_v53 = vpack.c.bf16 %v1460_v52, %v1459_v51  ;;  %v2298_v56 = vpack.c.bf16 %v664_v50, %v663_v40  ;;  %v1774_v40 = vpack.c.bf16 %v1769_v20, %v1768_v38  ;;  %v8260_v50 = vld [vmem:[%s10430_s3 + $0x358] sm:$0xff]  ;;  %v9193_v38 = vld [vmem:[#allocation2 + $0x142] sm:$0xff] }
 0x14e   : > { %v8228_v51 = vld [vmem:[%s10430_s3 + $0x258] sm:$0xff]  ;;  %2159 = vmatpush.bf16.msra.mxu2 %v8260_v50 }
 0x14f   : > { %1547 = vmatmul.bf16.gmra.mxu2 %v1463_v53  ;;  %v8340_v53 = vld [vmem:[%s10430_s3 + $0x5d8] sm:$0xff]  ;;  %1741 = vmatpush.bf16.msrb.mxu1 %v8228_v51 }
 0x150   : > { %v626_v0 = vpop.f32.mrf.mxu0  ;;  %2382 = vmatmul.bf16.gmra.mxu0 %v2298_v56  ;;  %1950 = vmatpush.bf16.msrb.mxu3 %v8245_v59  ;;  %v8242_v59 = vld [vmem:[%s10430_s3 + $0x2c8] sm:$0xff] }
 0x151   : > { %v627_v1 = vadd.f32 %v8761_v33, %v626_v0  ;;  %3203 = vmatpush.bf16.msrb.mxu0 %v8340_v53  ;;  %v8227_v0 = vld [vmem:[%s10430_s3 + $0x250] sm:$0xff] }
 0x152   : > { %2160 = vmatpush.bf16.msra.mxu2 %v8259_v60  ;;  %v9172_v7 = vpop.f32.mrf.mxu2 }
 0x153   : > { %v665_v3 = vmax.f32 %v627_v1, 0.0  ;;  %1742 = vmatpush.bf16.msrb.mxu1 %v8227_v0 }
 0x154   : > { %1951 = vmatpush.bf16.msrb.mxu3 %v8244_v8 }
 0x155   : > { %693 = vst [vmem:[#allocation2 + $0x180] sm:$0xff] %v665_v3  ;;  %3204 = vmatpush.bf16.msrb.mxu0 %v8339_v4 }
 0x156   : > { %2161 = vmatpush.bf16.msra.mxu2 %v8258_v9 }
 0x157   : > { %1743 = vmatpush.bf16.msrb.mxu1 %v8226_v18 }
 0x158   : > { %v629_v12 = vpop.f32.mrf.mxu0 }
 0x159   : > { %v630_v19 = vadd.f32 %v8761_v33, %v629_v12 }
 0x15a   : > { %2162 = vmatpush.bf16.msra.mxu2 %v8257_v26  ;;  %v2712_v26 = vld [vmem:[#allocation2 + $0x162] sm:$0xff] }
 0x15b   : > { %v666_v25 = vmax.f32 %v630_v19, 0.0  ;;  %v8338_v19 = vld [vmem:[%s10430_s3 + $0x5c8] sm:$0xff]  ;;  %1744 = vmatpush.bf16.msrb.mxu1 %v8225_v39 }
 0x15c   : > { %v1559_v1 = vld [vmem:[#allocation2 + $0x181] sm:$0xff]  ;;  %3205 = vmatpush.bf16.msrb.mxu0 %v8338_v19 }
 0x15d   : > { %694 = vst [vmem:[#allocation2 + $0x190] sm:$0xff] %v666_v25  ;;  %v1357_v41 = vpack.c.bf16 %v666_v25, %v665_v3  ;;  %v8243_v25 = vld [vmem:[%s10430_s3 + $0x2d0] sm:$0xff] }
 0x15e   : > { %1952 = vmatpush.bf16.msrb.mxu3 %v8243_v25 }
 0x15f   : > { %1850 = vmatmul.bf16.vlgmr.msrb.gmra.mxu2 %v1774_v40  ;;  %1433 = vmatmul.bf16.vlgmr.msra.gmra.mxu1 %v1357_v41  ;;  %v8337_v40 = vld [vmem:[%s10430_s3 + $0x5c0] sm:$0xff]  ;;  %v1770_v41 = vld [vmem:[#allocation2 + $0x30] sm:$0xff] }
 0x160   : > { %v631_v52 = vpop.f32.mrf.mxu0  ;;  %2789 = vmatmul.bf16.vlgmr.msra.gmra.mxu0 %v2713_v47  ;;  %v1775_v49 = vpack.c.bf16 %v1771_v27, %v1770_v41  ;;  %v1772_v27 = vld [vmem:[#allocation2 + $0x50] sm:$0xff] }
 0x161   : > { %v632_v56 = vadd.f32 %v8761_v33, %v631_v52  ;;  %v9202_v52 = vld [vmem:[#allocation2 + $0x132] sm:$0xff]  ;;  %3206 = vmatpush.bf16.msrb.mxu0 %v8337_v40 }
 0x162   : > { %v2714_v53 = vpack.c.bf16 %v9193_v38, %v9202_v52  ;;  %1953 = vmatpush.bf16.msrb.mxu3 %v8242_v59 }
 0x163   : > { %v667_v58 = vmax.f32 %v632_v56, 0.0  ;;  %v9206_v56 = vpop.f32.mrf.mxu3 }
 0x164   : > { %v1560_v3 = vld [vmem:[#allocation2 + $0x191] sm:$0xff] }
 0x165   : > { %695 = vst [vmem:[#allocation2 + $0x1a0] sm:$0xff] %v667_v58  ;;  %v1565_v6 = vpack.c.bf16 %v1560_v3, %v1559_v1  ;;  %v8241_v1 = vld [vmem:[%s10430_s3 + $0x2c0] sm:$0xff] }
 0x166   : > { %1954 = vmatpush.bf16.msrb.mxu3 %v8241_v1 }
 0x167   : > { %1641 = vmatmul.bf16.vlgmr.msra.gmra.mxu3 %v1565_v6 }
 0x168   : > { %v634_v12 = vpop.f32.mrf.mxu0 }
 0x169   : > { %v635_v20 = vadd.f32 %v8761_v33, %v634_v12 }
 0x16b   : > { %v668_v34 = vmax.f32 %v635_v20, 0.0  ;;  %v1021_v12 = vpop.f32.mrf.mxu3  ;;  %v1773_v20 = vld [vmem:[#allocation2 + $0x60] sm:$0xff] }
 0x16c   : > { %v846_v47 = vpop.f32.mrf.mxu1  ;;  %v1561_v4 = vld [vmem:[#allocation2 + $0x1a1] sm:$0xff]  ;;  %v1776_v39 = vpack.c.bf16 %v1773_v20, %v1772_v27 }
 0x16d   : > { %696 = vst [vmem:[#allocation2 + $0x1b0] sm:$0xff] %v668_v34  ;;  %v919_v50 = vadd.f32 %v9090_v45, %v846_v47  ;;  %v1358_v51 = vpack.c.bf16 %v668_v34, %v667_v58  ;;  %v9213_v45 = vpop.f32.mrf.mxu2  ;;  %v9225_v47 = vld [vmem:[#allocation2 + $0x152] sm:$0xff]  ;;  %v8254_v20 = vld [vmem:[%s10430_s3 + $0x328] sm:$0xff]  ;;  %v8253_v27 = vld [vmem:[%s10430_s3 + $0x320] sm:$0xff] }
 0x16f   : > { %1855 = vmatmul.bf16.gmra.mxu2 %v1775_v49  ;;  %1438 = vmatmul.bf16.gmra.mxu1 %v1358_v51  ;;  %v9211_v60 = vadd.f32 %v1016_v5, %v919_v50  ;;  %v2715_v49 = vpack.c.bf16 %v2712_v26, %v9225_v47  ;;  %v8296_v50 = vld [vmem:[%s10430_s3 + $0x478] sm:$0xff]  ;;  %v8293_v26 = vld [vmem:[%s10430_s3 + $0x460] sm:$0xff] }
 0x170   : > { %v636_v58 = vpop.f32.mrf.mxu0  ;;  %2794 = vmatmul.bf16.gmra.mxu0 %v2714_v53  ;;  %v8256_v51 = vld [vmem:[%s10430_s3 + $0x338] sm:$0xff]  ;;  %2573 = vmatpush.bf16.msrb.mxu2 %v8296_v50 }
 0x171   : > { %v637_v0 = vadd.f32 %v8761_v33, %v636_v58  ;;  %v8295_v58 = vld [vmem:[%s10430_s3 + $0x470] sm:$0xff]  ;;  %2051 = vmatpush.bf16.msra.mxu1 %v8256_v51  ;;  %v8270_v51 = vld [vmem:[%s10430_s3 + $0x3a8] sm:$0xff] }
 0x173   : > { %v669_v3 = vmax.f32 %v637_v0, 0.0  ;;  %v9240_v0 = vpop.f32.mrf.mxu3 }
 0x174   : > { %v1562_v6 = vld [vmem:[#allocation2 + $0x1b1] sm:$0xff]  ;;  %v9219_v8 = vpop.f32.mrf.mxu1  ;;  %2574 = vmatpush.bf16.msrb.mxu2 %v8295_v58 }
 0x175   : > { %697 = vst [vmem:[#allocation2 + $0x1c0] sm:$0xff] %v669_v3  ;;  %v1566_v9 = vpack.c.bf16 %v1562_v6, %v1561_v4  ;;  %v9222_v19 = vpop.f32.mrf.mxu2 }
 0x177   : > { %1646 = vmatmul.bf16.gmra.mxu3 %v1566_v9 }
 0x178   : > { %v639_v5 = vpop.f32.mrf.mxu0 }
 0x179   : > { %v640_v18 = vadd.f32 %v8761_v33, %v639_v5 }
 0x17b   : > { %v670_v25 = vmax.f32 %v640_v18, 0.0  ;;  %v8294_v18 = vld [vmem:[%s10430_s3 + $0x468] sm:$0xff] }
 0x17c   : > { %v851_v34 = vpop.f32.mrf.mxu1  ;;  %v9247_v6 = vld [vmem:[#allocation2 + $0x1c1] sm:$0xff]  ;;  %2575 = vmatpush.bf16.msrb.mxu2 %v8294_v18  ;;  %v8267_v18 = vld [vmem:[%s10430_s3 + $0x390] sm:$0xff] }
 0x17d   : > { %698 = vst [vmem:[#allocation2 + $0x1d0] sm:$0xff] %v670_v25  ;;  %v924_v40 = vadd.f32 %v9138_v37, %v851_v34  ;;  %v1359_v41 = vpack.c.bf16 %v670_v25, %v669_v3  ;;  %v8255_v3 = vld [vmem:[%s10430_s3 + $0x330] sm:$0xff]  ;;  %v9245_v4 = vpop.f32.mrf.mxu2 }
 0x17e   : > { %2052 = vmatpush.bf16.msra.mxu1 %v8255_v3  ;;  %v8271_v25 = vld [vmem:[%s10430_s3 + $0x3b0] sm:$0xff]  ;;  %v8290_v3 = vld [vmem:[%s10430_s3 + $0x448] sm:$0xff] }
 0x17f   : > { %1860 = vmatmul.bf16.gmra.mxu2 %v1776_v39  ;;  %1443 = vmatmul.bf16.gmra.mxu1 %v1359_v41  ;;  %v9234_v53 = vadd.f32 %v1021_v12, %v924_v40  ;;  %v8272_v12 = vld [vmem:[%s10430_s3 + $0x3b8] sm:$0xff]  ;;  %v1663_v39 = vld [vmem:[#allocation2 + $0x102] sm:$0xff] }
 0x180   : > { %v641_v59 = vpop.f32.mrf.mxu0  ;;  %2799 = vmatmul.bf16.gmra.mxu0 %v2715_v49  ;;  %2259 = vmatpush.bf16.msra.mxu3 %v8272_v12  ;;  %v1669_v41 = vpack.c.bf16 %v9143_v42, %v1663_v39  ;;  %v1026_v49 = vpop.f32.mrf.mxu3  ;;  %v8252_v42 = vld [vmem:[%s10430_s3 + $0x318] sm:$0xff] }
 0x181   : > { %v642_v37 = vadd.f32 %v8761_v33, %v641_v59  ;;  %2576 = vmatpush.bf16.msrb.mxu2 %v8293_v26 }
 0x182   : > { %2053 = vmatpush.bf16.msra.mxu1 %v8254_v20  ;;  %v8289_v20 = vld [vmem:[%s10430_s3 + $0x440] sm:$0xff] }
 0x183   : > { %v671_v1 = vmax.f32 %v642_v37, 0.0  ;;  %v1873_v37 = vld [vmem:[#allocation2 + $0x90] sm:$0xff] }
 0x184   : > { %v9249_v9 = vld [vmem:[#allocation2 + $0x1d1] sm:$0xff]  ;;  %v9251_v33 = vpop.f32.mrf.mxu1  ;;  %2260 = vmatpush.bf16.msra.mxu3 %v8271_v25  ;;  %v8249_v25 = vld [vmem:[%s10430_s3 + $0x300] sm:$0xff] }
 0x185   : > { %699 = vst [vmem:[#allocation2 + $0x1e0] sm:$0xff] %v671_v1  ;;  %v1567_v5 = vpack.c.bf16 %v9249_v9, %v9247_v6  ;;  %v9275_v50 = vpop.f32.mrf.mxu2  ;;  %v8268_v1 = vld [vmem:[%s10430_s3 + $0x398] sm:$0xff] }
 0x186   : > { %2054 = vmatpush.bf16.msra.mxu1 %v8253_v27 }
 0x187   : > { %1651 = vmatmul.bf16.gmra.mxu3 %v1567_v5  ;;  %v8250_v5 = vld [vmem:[%s10430_s3 + $0x308] sm:$0xff] }
 0x188   : > { %2261 = vmatpush.bf16.msra.mxu3 %v8270_v51 }
 0x18a   : > { %2055 = vmatpush.bf16.msra.mxu1 %v8252_v42 }
 0x18c   : > { %v856_v34 = vpop.f32.mrf.mxu1  ;;  %2262 = vmatpush.bf16.msra.mxu3 %v8269_v21  ;;  %v1671_v21 = vpack.c.bf16 %v9225_v47, %v9193_v38  ;;  %v8327_v38 = vld [vmem:[%s10430_s3 + $0x570] sm:$0xff] }
 0x18d   : > { %v929_v40 = vadd.f32 %v9213_v45, %v856_v34  ;;  %v8292_v45 = vld [vmem:[%s10430_s3 + $0x458] sm:$0xff]  ;;  %v1229_v12 = vpop.f32.mrf.mxu2  ;;  %v1670_v34 = vpack.c.bf16 %v9202_v52, %v9127_v23  ;;  %v8265_v52 = vld [vmem:[%s10430_s3 + $0x380] sm:$0xff]  ;;  %v8287_v47 = vld [vmem:[%s10430_s3 + $0x430] sm:$0xff] }
 0x18e   : > { %2577 = vmatpush.bf16.msrb.mxu2 %v8292_v45 }
 0x18f   : > { %2163 = vmatmul.bf16.vlgmr.msra.gmra.mxu2 %v2087_v24  ;;  %1745 = vmatmul.bf16.vlgmr.msrb.gmra.mxu1 %v1669_v41  ;;  %v9289_v59 = vadd.f32 %v1026_v49, %v929_v40  ;;  %v8251_v24 = vld [vmem:[%s10430_s3 + $0x310] sm:$0xff]  ;;  %v8266_v40 = vld [vmem:[%s10430_s3 + $0x388] sm:$0xff] }
 0x190   : > { %3207 = vmatmul.bf16.vlgmr.msrb.gmra.mxu0 %v9023_v48  ;;  %v1879_v48 = vpack.c.bf16 %v8943_v43, %v1873_v37  ;;  %2056 = vmatpush.bf16.msra.mxu1 %v8251_v24  ;;  %v8328_v37 = vld [vmem:[%s10430_s3 + $0x578] sm:$0xff] }
 0x191   : > { %2263 = vmatpush.bf16.msra.mxu3 %v8268_v1 }
 0x192   : > { %2578 = vmatpush.bf16.msrb.mxu2 %v8291_v22 }
 0x194   : > { %v9301_v58 = vpop.f32.mrf.mxu1  ;;  %2057 = vmatpush.bf16.msra.mxu1 %v8250_v5 }
 0x195   : > { %2264 = vmatpush.bf16.msra.mxu3 %v8267_v18  ;;  %v9335_v23 = vpop.f32.mrf.mxu2  ;;  %v8326_v18 = vld [vmem:[%s10430_s3 + $0x568] sm:$0xff] }
 0x196   : > { %2579 = vmatpush.bf16.msrb.mxu2 %v8290_v3 }
 0x197   : > { %1955 = vmatmul.bf16.vlgmr.msrb.gmra.mxu3 %v1879_v48  ;;  %v8288_v48 = vld [vmem:[%s10430_s3 + $0x438] sm:$0xff] }
 0x198   : > { %2058 = vmatpush.bf16.msra.mxu1 %v8249_v25  ;;  %v2500_v25 = vld [vmem:[#allocation2 + $0x121] sm:$0xff] }
 0x199   : > { %2265 = vmatpush.bf16.msra.mxu3 %v8266_v40  ;;  %v8285_v40 = vld [vmem:[%s10430_s3 + $0x420] sm:$0xff] }
 0x19a   : > { %2580 = vmatpush.bf16.msrb.mxu2 %v8289_v20  ;;  %v8286_v20 = vld [vmem:[%s10430_s3 + $0x428] sm:$0xff] }
 0x19c   : > { %v1120_v26 = vpop.f32.mrf.mxu1  ;;  %2469 = vmatpush.bf16.msrb.mxu1 %v8288_v48  ;;  %v8323_v48 = vld [vmem:[%s10430_s3 + $0x550] sm:$0xff] }
 0x19d   : > { %v1135_v27 = vadd.f32 %v1120_v26, %v9211_v60  ;;  %v9333_v60 = vpop.f32.mrf.mxu3  ;;  %2266 = vmatpush.bf16.msra.mxu3 %v8265_v52  ;;  %v1234_v49 = vpop.f32.mrf.mxu2  ;;  %v2499_v52 = vld [vmem:[#allocation2 + $0x111] sm:$0xff] }
 0x19e   : > { %2991 = vmatpush.bf16.msra.mxu2 %v8328_v37 }
 0x19f   : > { %2168 = vmatmul.bf16.gmra.mxu2 %v2088_v57  ;;  %1750 = vmatmul.bf16.gmra.mxu1 %v1670_v34  ;;  %v1239_v39 = vadd.f32 %v9245_v4, %v1135_v27  ;;  %v2086_v57 = vld [vmem:[#allocation2 + $0xe1] sm:$0xff]  ;;  %v8303_v27 = vld [vmem:[%s10430_s3 + $0x4b0] sm:$0xff] }
 0x1a0   : > { %3212 = vmatmul.bf16.gmra.mxu0 %v9080_v29  ;;  %v3130_v29 = vld [vmem:[#allocation2 + $0xf1] sm:$0xff]  ;;  %v2089_v45 = vpack.c.bf16 %v2086_v57, %v9064_v10  ;;  %v9356_v10 = vld [vmem:[#allocation2 + $0xe0] sm:$0xff]  ;;  %2470 = vmatpush.bf16.msrb.mxu1 %v8287_v47 }
 0x1a1   : > { %v3133_v22 = vpack.c.bf16 %v3130_v29, %v2086_v57  ;;  %v1881_v3 = vpack.c.bf16 %v9356_v10, %v8971_v62  ;;  %v8325_v34 = vld [vmem:[%s10430_s3 + $0x560] sm:$0xff]  ;;  %v1977_v57 = vld [vmem:[#allocation2 + $0x11] sm:$0xff] }
 0x1a2   : > { %2992 = vmatpush.bf16.msra.mxu2 %v8327_v38  ;;  %v8283_v38 = vld [vmem:[%s10430_s3 + $0x410] sm:$0xff] }
 0x1a3   : > { %v2185_v47 = vld [vmem:[#allocation2 + $0x12] sm:$0xff] }
 0x1a4   : > { %v9340_v54 = vpop.f32.mrf.mxu1  ;;  %2471 = vmatpush.bf16.msrb.mxu1 %v8286_v20  ;;  %v8322_v20 = vld [vmem:[%s10430_s3 + $0x548] sm:$0xff] }
 0x1a5   : > { %v9370_v5 = vpop.f32.mrf.mxu2 }
 0x1a6   : > { %2993 = vmatpush.bf16.msra.mxu2 %v8326_v18  ;;  %v8300_v18 = vld [vmem:[%s10430_s3 + $0x498] sm:$0xff] }
 0x1a7   : > { %1960 = vmatmul.bf16.gmra.mxu3 %v1880_v55 }
 0x1a8   : > { %2472 = vmatpush.bf16.msrb.mxu1 %v8285_v40 }
 0x1aa   : > { %v1329_v4 = vpop.f32.mrf.mxu3  ;;  %2994 = vmatpush.bf16.msra.mxu2 %v8325_v34 }
 0x1ab   : > { %v9344_v41 = vadd.f32 %v1329_v4, %v1239_v39  ;;  %v2505_v4 = vpack.c.bf16 %v2500_v25, %v2499_v52  ;;  %v8282_v25 = vld [vmem:[%s10430_s3 + $0x408] sm:$0xff]  ;;  %v8299_v52 = vld [vmem:[%s10430_s3 + $0x490] sm:$0xff] }
 0x1ac   : > { %v1125_v51 = vpop.f32.mrf.mxu1 }
 0x1ad   : > { %v1137_v42 = vadd.f32 %v1125_v51, %v9234_v53  ;;  %v8584_v51 = vld [vmem:[#allocation2 + $0x21] sm:$0xff]  ;;  %v2373_v28 = vpop.f32.mrf.mxu0 }
 0x1af   : > { %2173 = vmatmul.bf16.gmra.mxu2 %v2089_v45  ;;  %1755 = vmatmul.bf16.gmra.mxu1 %v1671_v21  ;;  %v1241_v24 = vadd.f32 %v1229_v12, %v1137_v42  ;;  %v8304_v12 = vld [vmem:[%s10430_s3 + $0x4b8] sm:$0xff]  ;;  %v1983_v45 = vpack.c.bf16 %v8584_v51, %v1977_v57  ;;  %v8281_v57 = vld [vmem:[%s10430_s3 + $0x400] sm:$0xff] }
 0x1b0   : > { %3217 = vmatmul.bf16.gmra.mxu0 %v3133_v22  ;;  %2677 = vmatpush.bf16.msrb.mxu3 %v8304_v12  ;;  %v8302_v22 = vld [vmem:[%s10430_s3 + $0x4a8] sm:$0xff]  ;;  %v8586_v51 = vld [vmem:[#allocation2 + $0x31] sm:$0xff] }
 0x1b2   : > { %v9358_v53 = vpop.f32.mrf.mxu3  ;;  %v9393_v42 = vpop.f32.mrf.mxu2 }
 0x1b4   : > { %v9366_v1 = vpop.f32.mrf.mxu1  ;;  %2678 = vmatpush.bf16.msrb.mxu3 %v8303_v27  ;;  %v2502_v27 = vld [vmem:[#allocation2 + $0x141] sm:$0xff] }
 0x1b7   : > { %1965 = vmatmul.bf16.gmra.mxu3 %v1881_v3  ;;  %v8585_v3 = vld [vmem:[#allocation2 + $0x22] sm:$0xff] }
 0x1b8   : > { %2679 = vmatpush.bf16.msrb.mxu3 %v8302_v22  ;;  %v2191_v12 = vpack.c.bf16 %v8585_v3, %v2185_v47  ;;  %v921_v3 = vadd.f32 %v9103_v2, %v9219_v8 }
 0x1ba   : > { %v1334_v26 = vpop.f32.mrf.mxu3 }
 0x1bb   : > { %v9387_v39 = vadd.f32 %v1334_v26, %v1241_v24  ;;  %v8324_v24 = vld [vmem:[%s10430_s3 + $0x558] sm:$0xff]  ;;  %v1540_v26 = vpop.f32.mrf.mxu2 }
 0x1bc   : > { %v1130_v55 = vpop.f32.mrf.mxu1  ;;  %2995 = vmatpush.bf16.msra.mxu2 %v8324_v24 }
 0x1bd   : > { %v1139_v29 = vadd.f32 %v1130_v55, %v9289_v59  ;;  %v8284_v59 = vld [vmem:[%s10430_s3 + $0x418] sm:$0xff]  ;;  %v8321_v55 = vld [vmem:[%s10430_s3 + $0x540] sm:$0xff] }
 0x1be   : > { %2473 = vmatpush.bf16.msrb.mxu1 %v8284_v59  ;;  %v8297_v59 = vld [vmem:[%s10430_s3 + $0x480] sm:$0xff] }
 0x1bf   : > { %2581 = vmatmul.bf16.vlgmr.msrb.gmra.mxu2 %v2505_v4  ;;  %2059 = vmatmul.bf16.vlgmr.msra.gmra.mxu1 %v1983_v45  ;;  %v1243_v21 = vadd.f32 %v1234_v49, %v1139_v29  ;;  %v8301_v49 = vld [vmem:[%s10430_s3 + $0x4a0] sm:$0xff]  ;;  %v2501_v4 = vld [vmem:[#allocation2 + $0x131] sm:$0xff] }
 0x1c0   : > { %2680 = vmatpush.bf16.msrb.mxu3 %v8301_v49  ;;  %2996 = vmatpush.bf16.msra.mxu2 %v8323_v48  ;;  %v2506_v29 = vpack.c.bf16 %v2502_v27, %v2501_v4  ;;  %v8587_v45 = vld [vmem:[#allocation2 + $0x41] sm:$0xff]  ;;  %v8588_v48 = vld [vmem:[#allocation2 + $0x32] sm:$0xff] }
 0x1c1   : > { %v1984_v22 = vpack.c.bf16 %v8587_v45, %v8586_v51  ;;  %v2503_v27 = vld [vmem:[#allocation2 + $0x151] sm:$0xff] }
 0x1c2   : > { %v9404_v37 = vpop.f32.mrf.mxu3  ;;  %2474 = vmatpush.bf16.msrb.mxu1 %v8283_v38  ;;  %v8589_v38 = vld [vmem:[#allocation2 + $0x42] sm:$0xff]  ;;  %v8590_v4 = vld [vmem:[#allocation2 + $0x51] sm:$0xff] }
 0x1c3   : > { %v1543_v24 = vpop.f32.mrf.mxu2  ;;  %v2192_v47 = vpack.c.bf16 %v8589_v38, %v8588_v48  ;;  %v8319_v45 = vld [vmem:[%s10430_s3 + $0x530] sm:$0xff] }
 0x1c4   : > { %2681 = vmatpush.bf16.msrb.mxu3 %v8300_v18  ;;  %2997 = vmatpush.bf16.msra.mxu2 %v8322_v20  ;;  %v9441_v49 = vpop.f32.mrf.mxu1  ;;  %v9445_v18 = vld [vmem:[#allocation2 + $0x61] sm:$0xff]  ;;  %v1032_v20 = vadd.f32 %v9206_v56, %v921_v3  ;;  %v8320_v56 = vld [vmem:[%s10430_s3 + $0x538] sm:$0xff] }
 0x1c6   : > { %2475 = vmatpush.bf16.msrb.mxu1 %v8282_v25 }
 0x1c7   : > { %2267 = vmatmul.bf16.vlgmr.msra.gmra.mxu3 %v2191_v12  ;;  %v2504_v12 = vld [vmem:[#allocation2 + $0x161] sm:$0xff] }
 0x1c8   : > { %2682 = vmatpush.bf16.msrb.mxu3 %v8299_v52  ;;  %2998 = vmatpush.bf16.msra.mxu2 %v8321_v55  ;;  %v1136_v52 = vadd.f32 %v9340_v54, %v1032_v20  ;;  %v2507_v55 = vpack.c.bf16 %v2504_v12, %v2503_v27  ;;  %v9460_v54 = vld [vmem:[#allocation2 + $0x62] sm:$0xff] }
 0x1c9   : > { %v2396_v12 = vld [vmem:[#allocation2 + $0x1a0] sm:$0xff] }
 0x1ca   : > { %v1339_v34 = vpop.f32.mrf.mxu3  ;;  %2476 = vmatpush.bf16.msrb.mxu1 %v8281_v57  ;;  %v1240_v8 = vadd.f32 %v9275_v50, %v1136_v52  ;;  %v926_v50 = vadd.f32 %v9172_v7, %v9251_v33  ;;  %v8335_v7 = vld [vmem:[%s10430_s3 + $0x5b0] sm:$0xff]  ;;  %v8317_v33 = vld [vmem:[%s10430_s3 + $0x520] sm:$0xff] }
 0x1cb   : > { %v9424_v40 = vadd.f32 %v1339_v34, %v1243_v21  ;;  %v8298_v21 = vld [vmem:[%s10430_s3 + $0x488] sm:$0xff]  ;;  %v9448_v25 = vpop.f32.mrf.mxu2 }
 0x1cc   : > { %2683 = vmatpush.bf16.msrb.mxu3 %v8298_v21  ;;  %v8591_v21 = vld [vmem:[#allocation2 + $0x52] sm:$0xff]  ;;  %v1034_v20 = vadd.f32 %v9240_v0, %v926_v50 }
 0x1ce   : > { %2886 = vmatpush.bf16.msra.mxu1 %v8320_v56  ;;  %v1138_v52 = vadd.f32 %v9366_v1, %v1034_v20  ;;  %v2604_v56 = vld [vmem:[#allocation2 + $0x1a1] sm:$0xff] }
 0x1cf   : > { %2586 = vmatmul.bf16.gmra.mxu2 %v2506_v29  ;;  %2064 = vmatmul.bf16.gmra.mxu1 %v1984_v22  ;;  %v1985_v29 = vpack.c.bf16 %v9445_v18, %v8590_v4  ;;  %v8334_v4 = vld [vmem:[%s10430_s3 + $0x5a8] sm:$0xff] }
 0x1d0   : > { %2684 = vmatpush.bf16.msrb.mxu3 %v8297_v59 }
 0x1d2   : > { %v9458_v51 = vpop.f32.mrf.mxu3  ;;  %2887 = vmatpush.bf16.msra.mxu1 %v8319_v45 }
 0x1d3   : > { %v9467_v48 = vpop.f32.mrf.mxu2 }
 0x1d7   : > { %2272 = vmatmul.bf16.gmra.mxu3 %v2192_v47  ;;  %v8318_v47 = vld [vmem:[%s10430_s3 + $0x528] sm:$0xff] }
 0x1d8   : > { %2888 = vmatpush.bf16.msra.mxu1 %v8318_v47 }
 0x1db   : > { %v1550_v1 = vpop.f32.mrf.mxu2 }
 0x1dc   : > { %v1434_v34 = vpop.f32.mrf.mxu1  ;;  %2889 = vmatpush.bf16.msra.mxu1 %v8317_v33 }
 0x1dd   : > { %v1449_v57 = vadd.f32 %v1434_v34, %v9344_v41  ;;  %v1345_v41 = vadd.f32 %v9358_v53, %v1240_v8  ;;  %v8336_v53 = vld [vmem:[%s10430_s3 + $0x5b8] sm:$0xff]  ;;  %v2395_v34 = vld [vmem:[#allocation2 + $0x190] sm:$0xff] }
 0x1de   : > { %3095 = vmatpush.bf16.msra.mxu3 %v8336_v53  ;;  %v2603_v8 = vld [vmem:[#allocation2 + $0x191] sm:$0xff] }
 0x1df   : > { %2591 = vmatmul.bf16.gmra.mxu2 %v2507_v55  ;;  %2069 = vmatmul.bf16.gmra.mxu1 %v1985_v29  ;;  %v1553_v2 = vadd.f32 %v9393_v42, %v1449_v57  ;;  %v2193_v42 = vpack.c.bf16 %v9460_v54, %v8591_v21  ;;  %v2401_v57 = vpack.c.bf16 %v2396_v12, %v2395_v34  ;;  %v8316_v29 = vld [vmem:[%s10430_s3 + $0x518] sm:$0xff] }
 0x1e0   : > { %2890 = vmatpush.bf16.msra.mxu1 %v8316_v29  ;;  %v2609_v45 = vpack.c.bf16 %v2604_v56, %v2603_v8  ;;  %v8332_v21 = vld [vmem:[%s10430_s3 + $0x598] sm:$0xff]  ;;  %v2608_v8 = vld [vmem:[#allocation2 + $0x1e1] sm:$0xff] }
 0x1e2   : > { %3096 = vmatpush.bf16.msra.mxu3 %v8335_v7 }
 0x1e4   : > { %v1436_v22 = vpop.f32.mrf.mxu1 }
 0x1e5   : > { %v1450_v59 = vadd.f32 %v1436_v22, %v1345_v41  ;;  %v931_v22 = vadd.f32 %v9222_v19, %v9301_v58  ;;  %v8331_v19 = vld [vmem:[%s10430_s3 + $0x590] sm:$0xff]  ;;  %v8313_v58 = vld [vmem:[%s10430_s3 + $0x500] sm:$0xff] }
 0x1e6   : > { %3097 = vmatpush.bf16.msra.mxu3 %v8334_v4 }
 0x1e7   : > { %2277 = vmatmul.bf16.gmra.mxu3 %v2193_v42  ;;  %v1554_v38 = vadd.f32 %v1540_v26, %v1450_v59  ;;  %v8314_v42 = vld [vmem:[%s10430_s3 + $0x508] sm:$0xff]  ;;  %v1851_v59 = vpop.f32.mrf.mxu2  ;;  %v1036_v53 = vadd.f32 %v9333_v60, %v931_v22 }
 0x1e8   : > { %v8330_v60 = vld [vmem:[%s10430_s3 + $0x588] sm:$0xff] }
 0x1e9   : > { %v1140_v12 = vadd.f32 %v9441_v49, %v1036_v53  ;;  %v8350_v22 = vld [vmem:[%s10430_s3 + $0x628] sm:$0xff] }
 0x1ea   : > { %v1642_v3 = vpop.f32.mrf.mxu3 }
 0x1eb   : > { %v9478_v27 = vadd.f32 %v1642_v3, %v1553_v2  ;;  %v2397_v3 = vld [vmem:[#allocation2 + $0x1b0] sm:$0xff] }
 0x1ec   : > { %v1439_v26 = vpop.f32.mrf.mxu1 }
 0x1ed   : > { %v1451_v55 = vadd.f32 %v1439_v26, %v9387_v39  ;;  %v1242_v39 = vadd.f32 %v9335_v23, %v1138_v52  ;;  %v1244_v26 = vadd.f32 %v9370_v5, %v1140_v12  ;;  %v8329_v52 = vld [vmem:[%s10430_s3 + $0x580] sm:$0xff]  ;;  %v8347_v12 = vld [vmem:[%s10430_s3 + $0x610] sm:$0xff] }
 0x1ef   : > { %2999 = vmatmul.bf16.vlgmr.msra.gmra.mxu2 %v2923_v46  ;;  %2477 = vmatmul.bf16.vlgmr.msrb.gmra.mxu1 %v2401_v57  ;;  %v1555_v0 = vadd.f32 %v1543_v24, %v1451_v55  ;;  %v1347_v43 = vadd.f32 %v9404_v37, %v1242_v39  ;;  %v8333_v46 = vld [vmem:[%s10430_s3 + $0x5a0] sm:$0xff]  ;;  %v8315_v24 = vld [vmem:[%s10430_s3 + $0x510] sm:$0xff]  ;;  %v9537_v55 = vpop.f32.mrf.mxu2  ;;  %v9540_v39 = vld [vmem:[#allocation2 + $0x8] sm:$0xff] }
 0x1f0   : > { %3098 = vmatpush.bf16.msra.mxu3 %v8333_v46  ;;  %2891 = vmatpush.bf16.msra.mxu1 %v8315_v24  ;;  %v2605_v57 = vld [vmem:[#allocation2 + $0x1b1] sm:$0xff] }
 0x1f1   : > { %v2610_v61 = vpack.c.bf16 %v9247_v6, %v2605_v57 }
 0x1f2   : > { %v1644_v2 = vpop.f32.mrf.mxu3 }
 0x1f3   : > { %v9499_v44 = vadd.f32 %v1644_v2, %v1554_v38  ;;  %v2398_v38 = vld [vmem:[#allocation2 + $0x1c0] sm:$0xff]  ;;  %v2925_v2 = vpack.c.bf16 %v9540_v39, %v9356_v10 }
 0x1f4   : > { %v1441_v41 = vpop.f32.mrf.mxu1  ;;  %3099 = vmatpush.bf16.msra.mxu3 %v8332_v21  ;;  %2892 = vmatpush.bf16.msra.mxu1 %v8314_v42  ;;  %v2402_v7 = vpack.c.bf16 %v2398_v38, %v2397_v3  ;;  %v2813_v42 = vld [vmem:[#allocation2 + $0x30] sm:$0xff]  ;;  %v2812_v38 = vld [vmem:[#allocation2 + $0x20] sm:$0xff] }
 0x1f5   : > { %v1452_v23 = vadd.f32 %v1441_v41, %v1347_v43  ;;  %v2818_v53 = vpack.c.bf16 %v2813_v42, %v2812_v38 }
 0x1f7   : > { %2685 = vmatmul.bf16.vlgmr.msrb.gmra.mxu3 %v2609_v45  ;;  %v1556_v37 = vadd.f32 %v9448_v25, %v1452_v23  ;;  %v1856_v46 = vpop.f32.mrf.mxu2  ;;  %v8351_v45 = vld [vmem:[%s10430_s3 + $0x630] sm:$0xff] }
 0x1f8   : > { %3100 = vmatpush.bf16.msra.mxu3 %v8331_v19  ;;  %2893 = vmatpush.bf16.msra.mxu1 %v8313_v58  ;;  %v8348_v58 = vld [vmem:[%s10430_s3 + $0x618] sm:$0xff] }
 0x1fa   : > { %v1647_v50 = vpop.f32.mrf.mxu3 }
 0x1fb   : > { %v1659_v47 = vadd.f32 %v1647_v50, %v1555_v0  ;;  %v8349_v50 = vld [vmem:[%s10430_s3 + $0x620] sm:$0xff] }
 0x1fc   : > { %v1444_v25 = vpop.f32.mrf.mxu1  ;;  %3101 = vmatpush.bf16.msra.mxu3 %v8330_v60 }
 0x1fd   : > { %v1453_v20 = vadd.f32 %v1444_v25, %v9424_v40  ;;  %v1349_v40 = vadd.f32 %v9458_v51, %v1244_v26  ;;  %v2399_v51 = vld [vmem:[#allocation2 + $0x1d0] sm:$0xff] }
 0x1ff   : > { %3004 = vmatmul.bf16.gmra.mxu2 %v2924_v63  ;;  %2482 = vmatmul.bf16.gmra.mxu1 %v2402_v7  ;;  %v1557_v33 = vadd.f32 %v9467_v48, %v1453_v20  ;;  %v2400_v48 = vld [vmem:[#allocation2 + $0x1e0] sm:$0xff] }
 0x200   : > { %3102 = vmatpush.bf16.msra.mxu3 %v8329_v52  ;;  %v2403_v43 = vpack.c.bf16 %v2400_v48, %v2399_v51  ;;  %v2814_v52 = vld [vmem:[#allocation2 + $0x40] sm:$0xff] }
 0x202   : > { %v1649_v49 = vpop.f32.mrf.mxu3 }
 0x203   : > { %v1660_v34 = vadd.f32 %v1649_v49, %v1556_v37  ;;  %v9558_v37 = vpop.f32.mrf.mxu2  ;;  %v8345_v49 = vld [vmem:[%s10430_s3 + $0x600] sm:$0xff] }
 0x204   : > { %v1446_v0 = vpop.f32.mrf.mxu1 }
 0x205   : > { %v1454_v62 = vadd.f32 %v1446_v0, %v1349_v40 }
 0x207   : > { %2690 = vmatmul.bf16.gmra.mxu3 %v2610_v61  ;;  %v1558_v63 = vadd.f32 %v1550_v1, %v1454_v62  ;;  %v8352_v1 = vld [vmem:[%s10430_s3 + $0x638] sm:$0xff] }
 0x208   : > { %3303 = vmatpush.bf16.msrb.mxu1 %v8352_v1 }
 0x20a   : > { %v1652_v5 = vpop.f32.mrf.mxu3 }
 0x20b   : > { %v1661_v4 = vadd.f32 %v1652_v5, %v1557_v33  ;;  %v1861_v25 = vpop.f32.mrf.mxu2  ;;  %v2815_v33 = vld [vmem:[#allocation2 + $0x50] sm:$0xff]  ;;  %v2816_v5 = vld [vmem:[#allocation2 + $0x60] sm:$0xff] }
 0x20c   : > { %v1746_v29 = vpop.f32.mrf.mxu1  ;;  %3304 = vmatpush.bf16.msrb.mxu1 %v8351_v45  ;;  %v2819_v0 = vpack.c.bf16 %v2815_v33, %v2814_v52  ;;  %v9602_v45 = vpop.f32.mrf.mxu0  ;;  %v8360_v33 = vld [vmem:[%s10432_s5 + $0x38] sm:$0xff] }
 0x20d   : > { %v1761_v56 = vadd.f32 %v1746_v29, %v9478_v27  ;;  %v2611_v27 = vpack.c.bf16 %v2608_v8, %v9249_v9  ;;  %3501 = vmatpush.bf16.msrb.mxu3 %v8360_v33  ;;  %v8372_v33 = vld [vmem:[%s10432_s5 + $0x98] sm:$0xff] }
 0x20f   : > { %3009 = vmatmul.bf16.gmra.mxu2 %v2925_v2  ;;  %2487 = vmatmul.bf16.gmra.mxu1 %v2403_v43  ;;  %v1866_v6 = vadd.f32 %v1851_v59, %v1761_v56 }
 0x210   : > { %3305 = vmatpush.bf16.msrb.mxu1 %v8350_v22 }
 0x212   : > { %v1654_v24 = vpop.f32.mrf.mxu3 }
 0x213   : > { %v1662_v41 = vadd.f32 %v1654_v24, %v1558_v63  ;;  %v9582_v40 = vpop.f32.mrf.mxu2 }
 0x214   : > { %v1748_v10 = vpop.f32.mrf.mxu1  ;;  %3306 = vmatpush.bf16.msrb.mxu1 %v8349_v50  ;;  %v2378_v42 = vpop.f32.mrf.mxu0 }
 0x215   : > { %v9553_v23 = vadd.f32 %v1748_v10, %v9499_v44 }
 0x217   : > { %2695 = vmatmul.bf16.gmra.mxu3 %v2611_v27 }
 0x218   : > { %3307 = vmatpush.bf16.msrb.mxu1 %v8348_v58 }
 0x21a   : > { %v1956_v21 = vpop.f32.mrf.mxu3 }
 0x21b   : > { %v1971_v59 = vadd.f32 %v1956_v21, %v1866_v6  ;;  %v2164_v62 = vpop.f32.mrf.mxu2 }
 0x21c   : > { %v1751_v9 = vpop.f32.mrf.mxu1  ;;  %3308 = vmatpush.bf16.msrb.mxu1 %v8347_v12  ;;  %v9617_v38 = vpop.f32.mrf.mxu0 }
 0x21d   : > { %v1763_v44 = vadd.f32 %v1751_v9, %v1659_v47  ;;  %v8346_v47 = vld [vmem:[%s10430_s3 + $0x608] sm:$0xff] }
 0x21f   : > { %2894 = vmatmul.bf16.vlgmr.msra.gmra.mxu1 %v2818_v53  ;;  %v1868_v19 = vadd.f32 %v1856_v46, %v1763_v44  ;;  %v3026_v46 = vld [vmem:[#allocation2 + $0x71] sm:$0xff] }
 0x220   : > { %3309 = vmatpush.bf16.msrb.mxu1 %v8346_v47  ;;  %v3029_v1 = vpack.c.bf16 %v3026_v46, %v9445_v18  ;;  %v3234_v53 = vld [vmem:[#allocation2 + $0x72] sm:$0xff] }
 0x222   : > { %v9566_v3 = vpop.f32.mrf.mxu3 }
 0x223   : > { %v9592_v56 = vpop.f32.mrf.mxu2 }
 0x224   : > { %v1753_v20 = vpop.f32.mrf.mxu1  ;;  %3310 = vmatpush.bf16.msrb.mxu1 %v8345_v49  ;;  %v2383_v47 = vpop.f32.mrf.mxu0 }
 0x225   : > { %v9571_v7 = vadd.f32 %v1753_v20, %v1660_v34  ;;  %v3237_v20 = vpack.c.bf16 %v3234_v53, %v9460_v54  ;;  %v8373_v53 = vld [vmem:[%s10432_s5 + $0xa0] sm:$0xff] }
 0x227   : > { %3103 = vmatmul.bf16.vlgmr.msra.gmra.mxu3 %v3027_v16 }
 0x22a   : > { %v1961_v60 = vpop.f32.mrf.mxu3 }
 0x22b   : > { %v1973_v26 = vadd.f32 %v1961_v60, %v1868_v19  ;;  %v2169_v31 = vpop.f32.mrf.mxu2 }
 0x22c   : > { %v1756_v34 = vpop.f32.mrf.mxu1  ;;  %v9628_v60 = vpop.f32.mrf.mxu0 }
 0x22d   : > { %v1765_v57 = vadd.f32 %v1756_v34, %v1661_v4  ;;  %v2820_v4 = vpack.c.bf16 %v9540_v39, %v2816_v5  ;;  %v8399_v5 = vld [vmem:[%s10432_s5 + $0x170] sm:$0xff] }
 0x22f   : > { %2899 = vmatmul.bf16.gmra.mxu1 %v2819_v0  ;;  %v1870_v11 = vadd.f32 %v1861_v25, %v1765_v57  ;;  %v8359_v57 = vld [vmem:[%s10432_s5 + $0x30] sm:$0xff]  ;;  %v8358_v0 = vld [vmem:[%s10432_s5 + $0x28] sm:$0xff] }
 0x230   : > { %3502 = vmatpush.bf16.msrb.mxu3 %v8359_v57  ;;  %v8391_v57 = vld [vmem:[%s10432_s5 + $0x130] sm:$0xff] }
 0x232   : > { %v9584_v14 = vpop.f32.mrf.mxu3 }
 0x233   : > { %v9606_v27 = vpop.f32.mrf.mxu2 }
 0x234   : > { %v1758_v16 = vpop.f32.mrf.mxu1  ;;  %3503 = vmatpush.bf16.msrb.mxu3 %v8358_v0 }
 0x235   : > { %v9586_v61 = vadd.f32 %v1758_v16, %v1662_v41  ;;  %v9648_v16 = vpop.f32.mrf.mxu0 }
 0x237   : > { %3108 = vmatmul.bf16.gmra.mxu3 %v3028_v35 }
 0x23a   : > { %v1966_v63 = vpop.f32.mrf.mxu3 }
 0x23b   : > { %v1975_v48 = vadd.f32 %v1966_v63, %v1870_v11  ;;  %v2174_v9 = vpop.f32.mrf.mxu2  ;;  %v8400_v11 = vld [vmem:[%s10432_s5 + $0x178] sm:$0xff]  ;;  %v8357_v63 = vld [vmem:[%s10432_s5 + $0x20] sm:$0xff] }
 0x23c   : > { %v2060_v29 = vpop.f32.mrf.mxu1  ;;  %3824 = vmatpush.bf16.msra.mxu1 %v8400_v11  ;;  %3504 = vmatpush.bf16.msrb.mxu3 %v8357_v63  ;;  %v8363_v63 = vld [vmem:[%s10432_s5 + $0x50] sm:$0xff] }
 0x23d   : > { %v2075_v51 = vadd.f32 %v2060_v29, %v1971_v59 }
 0x23f   : > { %2904 = vmatmul.bf16.gmra.mxu1 %v2820_v4  ;;  %v2179_v2 = vadd.f32 %v2164_v62, %v2075_v51  ;;  %v8368_v51 = vld [vmem:[%s10432_s5 + $0x78] sm:$0xff] }
 0x240   : > { %3825 = vmatpush.bf16.msra.mxu1 %v8399_v5  ;;  %v8376_v4 = vld [vmem:[%s10432_s5 + $0xb8] sm:$0xff]  ;;  %3440 = vmatpush.bf16.msrb.mxu2 %v8368_v51  ;;  %v8371_v5 = vld [vmem:[%s10432_s5 + $0x90] sm:$0xff]  ;;  %v8393_v51 = vld [vmem:[%s10432_s5 + $0x140] sm:$0xff] }
 0x241   : > { %3581 = vmatpush.bf16.msra.mxu0 %v8376_v4  ;;  %v8390_v4 = vld [vmem:[%s10432_s5 + $0x128] sm:$0xff] }
 0x242   : > { %v9594_v43 = vpop.f32.mrf.mxu3 }
 0x243   : > { %v9622_v30 = vpop.f32.mrf.mxu2 }
 0x244   : > { %v9596_v6 = vpop.f32.mrf.mxu1 }
 0x247   : > { %3113 = vmatmul.bf16.gmra.mxu3 %v3029_v1  ;;  %v8398_v1 = vld [vmem:[%s10432_s5 + $0x168] sm:$0xff] }
 0x248   : > { %3826 = vmatpush.bf16.msra.mxu1 %v8398_v1  ;;  %v8362_v1 = vld [vmem:[%s10432_s5 + $0x48] sm:$0xff] }
 0x24a   : > { %v2268_v35 = vpop.f32.mrf.mxu3 }
 0x24b   : > { %v2283_v24 = vadd.f32 %v2268_v35, %v2179_v2  ;;  %v9633_v34 = vpop.f32.mrf.mxu2  ;;  %v8356_v2 = vld [vmem:[%s10432_s5 + $0x18] sm:$0xff]  ;;  %v9676_v35 = vpop.f32.mrf.mxu0 }
 0x24c   : > { %v2065_v8 = vpop.f32.mrf.mxu1  ;;  %3505 = vmatpush.bf16.msrb.mxu3 %v8356_v2  ;;  %v8432_v2 = vld [vmem:[%s10432_s5 + $0x278] sm:$0xff] }
 0x24d   : > { %v2077_v41 = vadd.f32 %v2065_v8, %v1973_v26  ;;  %v2388_v58 = vadd.f32 %v2373_v28, %v2283_v24  ;;  %v8367_v24 = vld [vmem:[%s10432_s5 + $0x70] sm:$0xff] }
 0x24e   : > { %v8375_v8 = vld [vmem:[%s10432_s5 + $0xb0] sm:$0xff]  ;;  %3441 = vmatpush.bf16.msrb.mxu2 %v8367_v24  ;;  %v8389_v24 = vld [vmem:[%s10432_s5 + $0x120] sm:$0xff] }
 0x24f   : > { %3311 = vmatmul.bf16.vlgmr.msrb.gmra.mxu1 %v3235_v17  ;;  %v2181_v39 = vadd.f32 %v2169_v31, %v2077_v41  ;;  %v8355_v41 = vld [vmem:[%s10432_s5 + $0x10] sm:$0xff]  ;;  %3582 = vmatpush.bf16.msra.mxu0 %v8375_v8 }
 0x250   : > { %3506 = vmatpush.bf16.msrb.mxu3 %v8355_v41  ;;  %v8431_v8 = vld [vmem:[%s10432_s5 + $0x270] sm:$0xff] }
 0x252   : > { %v9604_v10 = vpop.f32.mrf.mxu3 }
 0x254   : > { %v9608_v22 = vpop.f32.mrf.mxu1 }
 0x25a   : > { %v2273_v18 = vpop.f32.mrf.mxu3 }
 0x25b   : > { %v2285_v21 = vadd.f32 %v2273_v18, %v2181_v39  ;;  %v8397_v39 = vld [vmem:[%s10432_s5 + $0x160] sm:$0xff] }
 0x25c   : > { %v2070_v59 = vpop.f32.mrf.mxu1  ;;  %3827 = vmatpush.bf16.msra.mxu1 %v8397_v39 }
 0x25d   : > { %v2079_v50 = vadd.f32 %v2070_v59, %v1975_v48  ;;  %v2390_v26 = vadd.f32 %v2378_v42, %v2285_v21  ;;  %v9658_v48 = vpop.f32.mrf.mxu2  ;;  %v8366_v42 = vld [vmem:[%s10432_s5 + $0x68] sm:$0xff] }
 0x25e   : > { %v8374_v59 = vld [vmem:[%s10432_s5 + $0xa8] sm:$0xff]  ;;  %3442 = vmatpush.bf16.msrb.mxu2 %v8366_v42 }
 0x25f   : > { %3316 = vmatmul.bf16.gmra.mxu1 %v3236_v36  ;;  %v2183_v13 = vadd.f32 %v2174_v9, %v2079_v50  ;;  %v8354_v50 = vld [vmem:[%s10432_s5 + $0x8] sm:$0xff]  ;;  %v8396_v9 = vld [vmem:[%s10432_s5 + $0x158] sm:$0xff]  ;;  %3583 = vmatpush.bf16.msra.mxu0 %v8374_v59  ;;  %v8361_v59 = vld [vmem:[%s10432_s5 + $0x40] sm:$0xff] }
 0x260   : > { %3507 = vmatpush.bf16.msrb.mxu3 %v8354_v50  ;;  %3828 = vmatpush.bf16.msra.mxu1 %v8396_v9  ;;  %v8369_v50 = vld [vmem:[%s10432_s5 + $0x80] sm:$0xff]  ;;  %v8384_v9 = vld [vmem:[%s10432_s5 + $0xf8] sm:$0xff] }
 0x262   : > { %v9613_v15 = vpop.f32.mrf.mxu3 }
 0x263   : > { %3584 = vmatpush.bf16.msra.mxu0 %v8373_v53  ;;  %v8388_v53 = vld [vmem:[%s10432_s5 + $0x118] sm:$0xff] }
 0x264   : > { %v9615_v17 = vpop.f32.mrf.mxu1 }
 0x265   : > { %v9690_v18 = vpop.f32.mrf.mxu2 }
 0x267   : > { %3585 = vmatpush.bf16.msra.mxu0 %v8372_v33 }
 0x26a   : > { %v2278_v44 = vpop.f32.mrf.mxu3 }
 0x26b   : > { %v2287_v19 = vadd.f32 %v2278_v44, %v2183_v13  ;;  %v8365_v44 = vld [vmem:[%s10432_s5 + $0x60] sm:$0xff]  ;;  %3586 = vmatpush.bf16.msra.mxu0 %v8371_v5 }
 0x26c   : > { %v2478_v25 = vpop.f32.mrf.mxu1  ;;  %3443 = vmatpush.bf16.msrb.mxu2 %v8365_v44  ;;  %v8408_v44 = vld [vmem:[%s10432_s5 + $0x1b8] sm:$0xff] }
 0x26d   : > { %v9619_v12 = vadd.f32 %v2478_v25, %v2388_v58  ;;  %v2392_v46 = vadd.f32 %v2383_v47, %v2287_v19  ;;  %v8353_v19 = vld [vmem:[%s10432_s5] sm:$0xff]  ;;  %v8395_v58 = vld [vmem:[%s10432_s5 + $0x150] sm:$0xff]  ;;  %v8392_v25 = vld [vmem:[%s10432_s5 + $0x138] sm:$0xff] }
 0x26e   : > { %3508 = vmatpush.bf16.msrb.mxu3 %v8353_v19  ;;  %3829 = vmatpush.bf16.msra.mxu1 %v8395_v58  ;;  %v8364_v47 = vld [vmem:[%s10432_s5 + $0x58] sm:$0xff]  ;;  %v8430_v19 = vld [vmem:[%s10432_s5 + $0x268] sm:$0xff]  ;;  %v8383_v58 = vld [vmem:[%s10432_s5 + $0xf0] sm:$0xff] }
 0x26f   : > { %3321 = vmatmul.bf16.gmra.mxu1 %v3237_v20  ;;  %v9723_v20 = vpop.f32.mrf.mxu0 }
 0x270   : > { %3444 = vmatpush.bf16.msrb.mxu2 %v8364_v47  ;;  %v8387_v47 = vld [vmem:[%s10432_s5 + $0x110] sm:$0xff] }
 0x272   : > { %v9624_v32 = vpop.f32.mrf.mxu3  ;;  %3743 = vmatpush.bf16.msra.mxu3 %v8392_v25  ;;  %v8407_v25 = vld [vmem:[%s10432_s5 + $0x1b0] sm:$0xff] }
 0x274   : > { %v9626_v36 = vpop.f32.mrf.mxu1  ;;  %3445 = vmatpush.bf16.msrb.mxu2 %v8363_v63  ;;  %v1867_v63 = vadd.f32 %v9537_v55, %v9553_v23  ;;  %v8386_v55 = vld [vmem:[%s10432_s5 + $0x108] sm:$0xff] }
 0x276   : > { %3744 = vmatpush.bf16.msra.mxu3 %v8391_v57  ;;  %v8429_v57 = vld [vmem:[%s10432_s5 + $0x260] sm:$0xff]  ;;  %v1972_v5 = vadd.f32 %v9566_v3, %v1867_v63  ;;  %v8428_v3 = vld [vmem:[%s10432_s5 + $0x258] sm:$0xff]  ;;  %v8379_v63 = vld [vmem:[%s10432_s5 + $0xd0] sm:$0xff] }
 0x278   : > { %3446 = vmatpush.bf16.msrb.mxu2 %v8362_v1  ;;  %v2076_v1 = vadd.f32 %v9596_v6, %v1972_v5  ;;  %v8427_v6 = vld [vmem:[%s10432_s5 + $0x250] sm:$0xff] }
 0x279   : > { %v8403_v5 = vld [vmem:[%s10432_s5 + $0x190] sm:$0xff] }
 0x27a   : > { %v9637_v52 = vpop.f32.mrf.mxu3  ;;  %3745 = vmatpush.bf16.msra.mxu3 %v8390_v4  ;;  %v8382_v4 = vld [vmem:[%s10432_s5 + $0xe8] sm:$0xff] }
 0x27c   : > { %v2483_v49 = vpop.f32.mrf.mxu1  ;;  %3447 = vmatpush.bf16.msrb.mxu2 %v8361_v59 }
 0x27d   : > { %v9635_v54 = vadd.f32 %v2483_v49, %v2390_v26  ;;  %v8394_v26 = vld [vmem:[%s10432_s5 + $0x148] sm:$0xff]  ;;  %v9734_v49 = vpop.f32.mrf.mxu2 }
 0x27e   : > { %3830 = vmatpush.bf16.msra.mxu1 %v8394_v26  ;;  %3746 = vmatpush.bf16.msra.mxu3 %v8389_v24  ;;  %v8405_v24 = vld [vmem:[%s10432_s5 + $0x1a0] sm:$0xff] }
 0x280   : > { %3662 = vmatpush.bf16.msra.mxu2 %v8384_v9 }
 0x282   : > { %v9660_v29 = vpop.f32.mrf.mxu3  ;;  %3831 = vmatpush.bf16.msra.mxu1 %v8393_v51  ;;  %3747 = vmatpush.bf16.msra.mxu3 %v8388_v53  ;;  %v8380_v53 = vld [vmem:[%s10432_s5 + $0xd8] sm:$0xff] }
 0x284   : > { %v9650_v62 = vpop.f32.mrf.mxu1  ;;  %3663 = vmatpush.bf16.msra.mxu2 %v8383_v58 }
 0x285   : > { %v9774_v39 = vpop.f32.mrf.mxu2 }
 0x286   : > { %4148 = vmatpush.bf16.msrb.mxu1 %v8432_v2  ;;  %3748 = vmatpush.bf16.msra.mxu3 %v8387_v47  ;;  %v8406_v2 = vld [vmem:[%s10432_s5 + $0x1a8] sm:$0xff] }
 0x288   : > { %3664 = vmatpush.bf16.msra.mxu2 %v8382_v4  ;;  %v1869_v4 = vadd.f32 %v9558_v37, %v9571_v7 }
 0x28a   : > { %v9692_v21 = vpop.f32.mrf.mxu3  ;;  %4149 = vmatpush.bf16.msrb.mxu1 %v8431_v8  ;;  %3749 = vmatpush.bf16.msra.mxu3 %v8386_v55  ;;  %v8385_v8 = vld [vmem:[%s10432_s5 + $0x100] sm:$0xff]  ;;  %v8378_v55 = vld [vmem:[%s10432_s5 + $0xc8] sm:$0xff] }
 0x28c   : > { %v2488_v28 = vpop.f32.mrf.mxu1 }
 0x28d   : > { %v9674_v31 = vadd.f32 %v2488_v28, %v2392_v46  ;;  %v9758_v46 = vpop.f32.mrf.mxu0  ;;  %v8370_v28 = vld [vmem:[%s10432_s5 + $0x88] sm:$0xff]  ;;  %v9815_v51 = vpop.f32.mrf.mxu2 }
 0x28e   : > { %3587 = vmatpush.bf16.msra.mxu0 %v8370_v28  ;;  %4150 = vmatpush.bf16.msrb.mxu1 %v8430_v19  ;;  %v8381_v28 = vld [vmem:[%s10432_s5 + $0xe0] sm:$0xff]  ;;  %v8404_v19 = vld [vmem:[%s10432_s5 + $0x198] sm:$0xff] }
 0x28f   : > { %3665 = vmatpush.bf16.msra.mxu2 %v8381_v28  ;;  %3750 = vmatpush.bf16.msra.mxu3 %v8385_v8  ;;  %v8377_v28 = vld [vmem:[%s10432_s5 + $0xc0] sm:$0xff] }
 0x292   : > { %v9739_v0 = vpop.f32.mrf.mxu3  ;;  %3588 = vmatpush.bf16.msra.mxu0 %v8369_v50  ;;  %4151 = vmatpush.bf16.msrb.mxu1 %v8429_v57  ;;  %v2180_v50 = vadd.f32 %v9592_v56, %v2076_v1  ;;  %v8426_v56 = vld [vmem:[%s10432_s5 + $0x248] sm:$0xff] }
 0x293   : > { %3666 = vmatpush.bf16.msra.mxu2 %v8380_v53 }
 0x294   : > { %v9706_v13 = vpop.f32.mrf.mxu1 }
 0x295   : > { %v9805_v33 = vpop.f32.mrf.mxu0  ;;  %v3000_v58 = vpop.f32.mrf.mxu2 }
 0x296   : > { %3905 = vmatpush.bf16.msrb.mxu0 %v8408_v44  ;;  %4152 = vmatpush.bf16.msrb.mxu1 %v8428_v3  ;;  %v2284_v44 = vadd.f32 %v9604_v10, %v2180_v50  ;;  %v8402_v3 = vld [vmem:[%s10432_s5 + $0x188] sm:$0xff] }
 0x297   : > { %3667 = vmatpush.bf16.msra.mxu2 %v8379_v63 }
 0x298   : > { %v2389_v57 = vadd.f32 %v9602_v45, %v2284_v44  ;;  %v1974_v45 = vadd.f32 %v9584_v14, %v1869_v4  ;;  %v2599_v44 = vadd.f32 %v9690_v18, %v9635_v54 }
 0x29a   : > { %v9776_v42 = vpop.f32.mrf.mxu3  ;;  %3906 = vmatpush.bf16.msrb.mxu0 %v8407_v25  ;;  %4153 = vmatpush.bf16.msrb.mxu1 %v8427_v6  ;;  %v2597_v25 = vadd.f32 %v9633_v34, %v9619_v12  ;;  %v8425_v12 = vld [vmem:[%s10432_s5 + $0x240] sm:$0xff]  ;;  %v2078_v37 = vadd.f32 %v9608_v22, %v1974_v45 }
 0x29b   : > { %3668 = vmatpush.bf16.msra.mxu2 %v8378_v55 }
 0x29c   : > { %v9741_v11 = vpop.f32.mrf.mxu1  ;;  %v2701_v10 = vadd.f32 %v9637_v52, %v2597_v25  ;;  %v2494_v52 = vadd.f32 %v9626_v36, %v2389_v57  ;;  %v2182_v22 = vadd.f32 %v9606_v27, %v2078_v37  ;;  %v9908_v27 = vld [vmem:[%s10431_s4] ss:$0 sm:$0xff] }
 0x29d   : > { %v9847_v9 = vpop.f32.mrf.mxu0  ;;  %v3002_v14 = vpop.f32.mrf.mxu2 }
 0x29e   : > { %3907 = vmatpush.bf16.msrb.mxu0 %v8406_v2  ;;  %4154 = vmatpush.bf16.msrb.mxu1 %v8426_v56  ;;  %v2805_v2 = vadd.f32 %v9648_v16, %v2701_v10  ;;  %v2598_v7 = vadd.f32 %v9658_v48, %v2494_v52  ;;  %v2703_v56 = vadd.f32 %v9692_v21, %v2599_v44 }
 0x29f   : > { %3669 = vmatpush.bf16.msra.mxu2 %v8377_v28 }
 0x2a0   : > { %v2910_v36 = vadd.f32 %v9741_v11, %v2805_v2  ;;  %v2702_v16 = vadd.f32 %v9660_v29, %v2598_v7  ;;  %v2286_v11 = vadd.f32 %v9613_v15, %v2182_v22  ;;  %v1871_v15 = vadd.f32 %v9582_v40, %v9586_v61 }
 0x2a2   : > { %v9826_v23 = vpop.f32.mrf.mxu3  ;;  %3908 = vmatpush.bf16.msrb.mxu0 %v8405_v24  ;;  %4155 = vmatpush.bf16.msrb.mxu1 %v8425_v12  ;;  %v8401_v24 = vld [vmem:[%s10432_s5 + $0x180] sm:$0xff]  ;;  %v3015_v48 = vadd.f32 %v3000_v58, %v2910_v36  ;;  %v2806_v29 = vadd.f32 %v9676_v35, %v2702_v16  ;;  %v2391_v25 = vadd.f32 %v9617_v38, %v2286_v11  ;;  %v8422_v16 = vld [vmem:[%s10432_s5 + $0x228] sm:$0xff] }
 0x2a3   : > { %v2807_v38 = vadd.f32 %v9723_v20, %v2703_v56  ;;  %v8416_v56 = vld [vmem:[%s10432_s5 + $0x1f8] sm:$0xff] }
 0x2a4   : > { %v9772_v41 = vpop.f32.mrf.mxu1  ;;  %v2496_v54 = vadd.f32 %v9650_v62, %v2391_v25  ;;  %v8424_v62 = vld [vmem:[%s10432_s5 + $0x238] sm:$0xff] }
 0x2a5   : > { %v3208_v1 = vpop.f32.mrf.mxu0  ;;  %v2911_v53 = vadd.f32 %v9772_v41, %v2806_v29  ;;  %v3005_v58 = vpop.f32.mrf.mxu2  ;;  %v8440_v25 = vld [vmem:[%s10432_s5 + $0x2b8] sm:$0xff] }
 0x2a6   : > { %3909 = vmatpush.bf16.msrb.mxu0 %v8404_v19  ;;  %v2600_v12 = vadd.f32 %v9734_v49, %v2496_v54 }
 0x2a7   : > { %v3016_v18 = vadd.f32 %v3002_v14, %v2911_v53 }
 0x2a8   : > { %v2704_v4 = vadd.f32 %v9739_v0, %v2600_v12 }
 0x2aa   : > { %v3104_v47 = vpop.f32.mrf.mxu3  ;;  %3910 = vmatpush.bf16.msrb.mxu0 %v8403_v5  ;;  %v2808_v0 = vadd.f32 %v9758_v46, %v2704_v4  ;;  %v8464_v46 = vld [vmem:[%s10432_s5 + $0x378] sm:$0xff]  ;;  %v8419_v4 = vld [vmem:[%s10432_s5 + $0x210] sm:$0xff] }
 0x2ab   : > { %v3119_v50 = vadd.f32 %v3104_v47, %v3015_v48  ;;  %v1976_v47 = vadd.f32 %v9594_v43, %v1871_v15  ;;  %v8421_v48 = vld [vmem:[%s10432_s5 + $0x220] sm:$0xff] }
 0x2ac   : > { %v9807_v26 = vpop.f32.mrf.mxu1 }
 0x2ad   : > { %v3210_v19 = vpop.f32.mrf.mxu0  ;;  %v3223_v10 = vadd.f32 %v3208_v1, %v3119_v50  ;;  %v2080_v5 = vadd.f32 %v9615_v17, %v1976_v47  ;;  %v2912_v40 = vadd.f32 %v9807_v26, %v2807_v38  ;;  %v8423_v26 = vld [vmem:[%s10432_s5 + $0x230] sm:$0xff] }
 0x2ae   : > { %3911 = vmatpush.bf16.msrb.mxu0 %v8402_v3  ;;  %v3007_v3 = vpop.f32.mrf.mxu2  ;;  %v8415_v38 = vld [vmem:[%s10432_s5 + $0x1f0] sm:$0xff] }
 0x2af   : > { %v2184_v20 = vadd.f32 %v9622_v30, %v2080_v5  ;;  %v3017_v55 = vadd.f32 %v3005_v58, %v2912_v40  ;;  %v2601_v30 = vadd.f32 %v9774_v39, %v9674_v31 }
 0x2b1   : > { %v2288_v49 = vadd.f32 %v9624_v32, %v2184_v20  ;;  %v2705_v28 = vadd.f32 %v9776_v42, %v2601_v30  ;;  %v8463_v42 = vld [vmem:[%s10432_s5 + $0x370] sm:$0xff] }
 0x2b2   : > { %v3106_v8 = vpop.f32.mrf.mxu3  ;;  %3912 = vmatpush.bf16.msrb.mxu0 %v8401_v24 }
 0x2b3   : > { %v3120_v57 = vadd.f32 %v3106_v8, %v3016_v18  ;;  %v2393_v32 = vadd.f32 %v9628_v60, %v2288_v49  ;;  %v2809_v50 = vadd.f32 %v9805_v33, %v2705_v28 }
 0x2b4   : > { %v9841_v59 = vpop.f32.mrf.mxu1 }
 0x2b5   : > { %v3224_v43 = vadd.f32 %v3210_v19, %v3120_v57  ;;  %v3213_v45 = vpop.f32.mrf.mxu0  ;;  %v2913_v36 = vadd.f32 %v9841_v59, %v2808_v0  ;;  %v2498_v31 = vadd.f32 %v9706_v13, %v2393_v32 }
 0x2b6   : > { %v3010_v44 = vpop.f32.mrf.mxu2 }
 0x2b7   : > { %v3018_v59 = vadd.f32 %v3007_v3, %v2913_v36  ;;  %v2602_v29 = vadd.f32 %v9815_v51, %v2498_v31  ;;  %v8418_v3 = vld [vmem:[%s10432_s5 + $0x208] sm:$0xff]  ;;  %v8436_v31 = vld [vmem:[%s10432_s5 + $0x298] sm:$0xff] }
 0x2ba   : > { %v3109_v21 = vpop.f32.mrf.mxu3 }
 0x2bb   : > { %v3121_v1 = vadd.f32 %v3109_v21, %v3017_v55 }
 0x2bc   : > { %v9872_v34 = vpop.f32.mrf.mxu1 }
 0x2bd   : > { %v3225_v24 = vadd.f32 %v3213_v45, %v3121_v1  ;;  %v3215_v60 = vpop.f32.mrf.mxu0  ;;  %v2914_v53 = vadd.f32 %v9872_v34, %v2809_v50  ;;  %v8438_v45 = vld [vmem:[%s10432_s5 + $0x2a8] sm:$0xff] }
 0x2bf   : > { %v3019_v21 = vadd.f32 %v3010_v44, %v2914_v53 }
 0x2c2   : > { %v3111_v7 = vpop.f32.mrf.mxu3 }
 0x2c3   : > { %v3122_v11 = vadd.f32 %v3111_v7, %v3018_v59  ;;  %v8437_v7 = vld [vmem:[%s10432_s5 + $0x2a0] sm:$0xff] }
 0x2c4   : > { %v9895_v6 = vpop.f32.mrf.mxu1 }
 0x2c5   : > { %v3226_v34 = vadd.f32 %v3215_v60, %v3122_v11  ;;  %v8456_v60 = vld [vmem:[%s10432_s5 + $0x338] sm:$0xff] }
 0x2ca   : > { %v3114_v33 = vpop.f32.mrf.mxu3 }
 0x2cb   : > { %v3123_v5 = vadd.f32 %v3114_v33, %v3019_v21  ;;  %v8453_v21 = vld [vmem:[%s10432_s5 + $0x320] sm:$0xff] }
 0x2cc   : > { %v3312_v35 = vpop.f32.mrf.mxu1 }
 0x2cd   : > { %v3327_v41 = vadd.f32 %v3312_v35, %v3223_v10  ;;  %v2706_v10 = vadd.f32 %v9826_v23, %v2602_v29  ;;  %v8420_v23 = vld [vmem:[%s10432_s5 + $0x218] sm:$0xff]  ;;  %v8435_v29 = vld [vmem:[%s10432_s5 + $0x290] sm:$0xff] }
 0x2cf   : > { %v3337_v63 = vadd.f32 %v9908_v27, %v3327_v41  ;;  %v8462_v41 = vld [vmem:[%s10432_s5 + $0x368] sm:$0xff]  ;;  %v2810_v12 = vadd.f32 %v9847_v9, %v2706_v10  ;;  %v8496_v10 = vld [vmem:[%s10432_s5 + $0x478] sm:$0xff] }
 0x2d0   : > { %v8414_v9 = vld [vmem:[%s10432_s5 + $0x1e8] sm:$0xff] }
 0x2d1   : > { %v3343_v61 = vmax.f32 %v3337_v63, 0.0  ;;  %v8439_v63 = vld [vmem:[%s10432_s5 + $0x2b0] sm:$0xff] }
 0x2d2   : > { %v3116_v49 = vpop.f32.mrf.mxu3 }
 0x2d3   : > { %3349 = vst [vmem:[#allocation3] sm:$0xff] %v3343_v61  ;;  %v3356_v52 = vpack.c.bf16 %v3343_v61, %v3343_v61  ;;  %v8461_v61 = vld [vmem:[%s10432_s5 + $0x360] sm:$0xff] }
 0x2d4   : > { %v3314_v2 = vpop.f32.mrf.mxu1 }
 0x2d5   : > { %v3328_v17 = vadd.f32 %v3314_v2, %v3224_v43  ;;  %3509 = vmatmul.bf16.vlgmr.msrb.gmra.mxu3 %v3356_v52  ;;  %v2915_v43 = vadd.f32 %v9895_v6, %v2810_v12  ;;  %v3012_v2 = vpop.f32.mrf.mxu2  ;;  %v8460_v6 = vld [vmem:[%s10432_s5 + $0x358] sm:$0xff]  ;;  %v8471_v12 = vld [vmem:[%s10432_s5 + $0x3b0] sm:$0xff] }
 0x2d6   : > { %4067 = vmatpush.bf16.msrb.mxu3 %v8424_v62  ;;  %v3218_v62 = vpop.f32.mrf.mxu0 }
 0x2d7   : > { %v3338_v37 = vadd.f32 %v9908_v27, %v3328_v17  ;;  %v3227_v55 = vadd.f32 %v3218_v62, %v3123_v5  ;;  %v3020_v1 = vadd.f32 %v3012_v2, %v2915_v43  ;;  %v8447_v5 = vld [vmem:[%s10432_s5 + $0x2f0] sm:$0xff]  ;;  %v8470_v62 = vld [vmem:[%s10432_s5 + $0x3a8] sm:$0xff]  ;;  %v8492_v43 = vld [vmem:[%s10432_s5 + $0x458] sm:$0xff] }
 0x2d8   : > { %v8491_v2 = vld [vmem:[%s10432_s5 + $0x450] sm:$0xff] }
 0x2d9   : > { %v3344_v14 = vmax.f32 %v3338_v37, 0.0  ;;  %v8413_v37 = vld [vmem:[%s10432_s5 + $0x1e0] sm:$0xff]  ;;  %v3124_v30 = vadd.f32 %v3116_v49, %v3020_v1  ;;  %v8490_v49 = vld [vmem:[%s10432_s5 + $0x448] sm:$0xff]  ;;  %v8467_v1 = vld [vmem:[%s10432_s5 + $0x390] sm:$0xff] }
 0x2da   : > { %4068 = vmatpush.bf16.msrb.mxu3 %v8423_v26 }
 0x2db   : > { %3350 = vst [vmem:[#allocation3 + $0x8] sm:$0xff] %v3344_v14  ;;  %v3758_v8 = vpack.c.bf16 %v3344_v14, %v3344_v14  ;;  %v8459_v14 = vld [vmem:[%s10432_s5 + $0x350] sm:$0xff] }
 0x2dc   : > { %v3317_v39 = vpop.f32.mrf.mxu1 }
 0x2dd   : > { %v3329_v22 = vadd.f32 %v3317_v39, %v3225_v24  ;;  %3832 = vmatmul.bf16.vlgmr.msra.gmra.mxu1 %v3758_v8  ;;  %v8412_v8 = vld [vmem:[%s10432_s5 + $0x1d8] sm:$0xff] }
 0x2de   : > { %4069 = vmatpush.bf16.msrb.mxu3 %v8422_v16  ;;  %4472 = vmatpush.bf16.msra.mxu1 %v8464_v46  ;;  %v8417_v46 = vld [vmem:[%s10432_s5 + $0x200] sm:$0xff]  ;;  %v3220_v24 = vpop.f32.mrf.mxu0 }
 0x2df   : > { %v3339_v13 = vadd.f32 %v9908_v27, %v3329_v22  ;;  %v3228_v39 = vadd.f32 %v3220_v24, %v3124_v30  ;;  %v8528_v30 = vld [vmem:[%s10432_s5 + $0x578] sm:$0xff]  ;;  %v8527_v24 = vld [vmem:[%s10432_s5 + $0x570] sm:$0xff] }
 0x2e1   : > { %v9952_v19 = vmax.f32 %v3339_v13, 0.0  ;;  %v8411_v13 = vld [vmem:[%s10432_s5 + $0x1d0] sm:$0xff] }
 0x2e2   : > { %v3373_v15 = vld [vmem:[#allocation3 + $0x1] sm:$0xff]  ;;  %4070 = vmatpush.bf16.msrb.mxu3 %v8421_v48  ;;  %4473 = vmatpush.bf16.msra.mxu1 %v8463_v42 }
 0x2e3   : > { %v3514_v35 = vld [vmem:[#allocation3 + $0x2] sm:$0xff]  ;;  %3351 = vst [vmem:[#allocation3 + $0x10] sm:$0xff] %v9952_v19  ;;  %v3374_v58 = vpack.c.bf16 %v3373_v15, %v3373_v15 }
 0x2e4   : > { %v3676_v51 = vld [vmem:[#allocation3 + $0x4] sm:$0xff]  ;;  %v3515_v54 = vpack.c.bf16 %v3514_v35, %v3514_v35  ;;  %v3319_v47 = vpop.f32.mrf.mxu1 }
 0x2e5   : > { %v3677_v18 = vpack.c.bf16 %v3676_v51, %v3676_v51  ;;  %v3330_v57 = vadd.f32 %v3319_v47, %v3226_v34  ;;  %3448 = vmatmul.bf16.vlgmr.msrb.gmra.mxu2 %v3374_v58  ;;  %v3595_v32 = vld [vmem:[#allocation3 + $0x3] sm:$0xff]  ;;  %v8495_v34 = vld [vmem:[%s10432_s5 + $0x470] sm:$0xff]  ;;  %v8472_v47 = vld [vmem:[%s10432_s5 + $0x3b8] sm:$0xff] }
 0x2e6   : > { %3589 = vmatmul.bf16.vlgmr.msra.gmra.mxu0 %v3515_v54  ;;  %3986 = vmatpush.bf16.msrb.mxu2 %v8416_v56  ;;  %v3596_v59 = vpack.c.bf16 %v3595_v32, %v3595_v32  ;;  %v8458_v42 = vld [vmem:[%s10432_s5 + $0x348] sm:$0xff]  ;;  %v8455_v56 = vld [vmem:[%s10432_s5 + $0x330] sm:$0xff]  ;;  %v8409_v54 = vld [vmem:[%s10432_s5 + $0x1c0] sm:$0xff] }
 0x2e7   : > { %4229 = vmatpush.bf16.msra.mxu0 %v8440_v25  ;;  %v3340_v40 = vadd.f32 %v9908_v27, %v3330_v57  ;;  %3751 = vmatmul.bf16.vlgmr.msra.gmra.mxu3 %v3677_v18  ;;  %v8457_v25 = vld [vmem:[%s10432_s5 + $0x340] sm:$0xff]  ;;  %v8434_v15 = vld [vmem:[%s10432_s5 + $0x288] sm:$0xff] }
 0x2e8   : > { %4474 = vmatpush.bf16.msra.mxu1 %v8462_v41  ;;  %4071 = vmatpush.bf16.msrb.mxu3 %v8420_v23  ;;  %v8454_v51 = vld [vmem:[%s10432_s5 + $0x328] sm:$0xff]  ;;  %v8433_v18 = vld [vmem:[%s10432_s5 + $0x280] sm:$0xff]  ;;  %v8448_v41 = vld [vmem:[%s10432_s5 + $0x2f8] sm:$0xff] }
 0x2e9   : > { %v9983_v52 = vmax.f32 %v3340_v40, 0.0  ;;  %v8494_v57 = vld [vmem:[%s10432_s5 + $0x468] sm:$0xff]  ;;  %v8452_v40 = vld [vmem:[%s10432_s5 + $0x318] sm:$0xff] }
 0x2ea   : > { %3987 = vmatpush.bf16.msrb.mxu2 %v8415_v38  ;;  %v4081_v20 = vld [vmem:[#allocation3 + $0xc] sm:$0xff] }
 0x2eb   : > { %4230 = vmatpush.bf16.msra.mxu0 %v8439_v63  ;;  %3352 = vst [vmem:[#allocation3 + $0x18] sm:$0xff] %v9983_v52  ;;  %v4082_v17 = vpack.c.bf16 %v4081_v20, %v4081_v20  ;;  %v3838_v16 = vld [vmem:[#allocation3 + $0x9] sm:$0xff]  ;;  %v4163_v63 = vpack.c.bf16 %v9952_v19, %v9952_v19 }
 0x2ec   : > { %4475 = vmatpush.bf16.msra.mxu1 %v8461_v61  ;;  %v3322_v26 = vpop.f32.mrf.mxu1  ;;  %4072 = vmatpush.bf16.msrb.mxu3 %v8419_v4  ;;  %v3839_v22 = vpack.c.bf16 %v3838_v16, %v3838_v16  ;;  %v4000_v48 = vld [vmem:[#allocation3 + $0xb] sm:$0xff]  ;;  %v8493_v61 = vld [vmem:[%s10432_s5 + $0x460] sm:$0xff] }
 0x2ed   : > { %v3331_v0 = vadd.f32 %v3322_v26, %v3227_v55  ;;  %4156 = vmatmul.bf16.vlgmr.msrb.gmra.mxu1 %v4082_v17  ;;  %v4001_v44 = vpack.c.bf16 %v4000_v48, %v4000_v48  ;;  %v3919_v23 = vld [vmem:[#allocation3 + $0xa] sm:$0xff]  ;;  %v8444_v55 = vld [vmem:[%s10432_s5 + $0x2d8] sm:$0xff] }
 0x2ee   : > { %3988 = vmatpush.bf16.msrb.mxu2 %v8414_v9  ;;  %v3920_v38 = vpack.c.bf16 %v3919_v23, %v3919_v23  ;;  %v8446_v19 = vld [vmem:[%s10432_s5 + $0x2e8] sm:$0xff]  ;;  %v8451_v4 = vld [vmem:[%s10432_s5 + $0x310] sm:$0xff]  ;;  %v8445_v9 = vld [vmem:[%s10432_s5 + $0x2e0] sm:$0xff] }
 0x2ef   : > { %4231 = vmatpush.bf16.msra.mxu0 %v8438_v45  ;;  %v3341_v36 = vadd.f32 %v9908_v27, %v3331_v0  ;;  %v8469_v45 = vld [vmem:[%s10432_s5 + $0x3a0] sm:$0xff]  ;;  %v8450_v20 = vld [vmem:[%s10432_s5 + $0x308] sm:$0xff]  ;;  %v8468_v17 = vld [vmem:[%s10432_s5 + $0x398] sm:$0xff] }
 0x2f0   : > { %4476 = vmatpush.bf16.msra.mxu1 %v8460_v6  ;;  %4073 = vmatpush.bf16.msrb.mxu3 %v8418_v3  ;;  %v8449_v6 = vld [vmem:[%s10432_s5 + $0x300] sm:$0xff]  ;;  %v8488_v26 = vld [vmem:[%s10432_s5 + $0x438] sm:$0xff]  ;;  %v8443_v3 = vld [vmem:[%s10432_s5 + $0x2d0] sm:$0xff] }
 0x2f1   : > { %v10011_v28 = vmax.f32 %v3341_v36, 0.0  ;;  %v8466_v32 = vld [vmem:[%s10432_s5 + $0x388] sm:$0xff]  ;;  %v8475_v23 = vld [vmem:[%s10432_s5 + $0x3d0] sm:$0xff] }
 0x2f2   : > { %3989 = vmatpush.bf16.msrb.mxu2 %v8413_v37  ;;  %v4405_v35 = vld [vmem:[#allocation3 + $0x13] sm:$0xff]  ;;  %v8489_v37 = vld [vmem:[%s10432_s5 + $0x440] sm:$0xff] }
 0x2f3   : > { %4232 = vmatpush.bf16.msra.mxu0 %v8437_v7  ;;  %3353 = vst [vmem:[#allocation3 + $0x20] sm:$0xff] %v10011_v28  ;;  %v4406_v58 = vpack.c.bf16 %v4405_v35, %v4405_v35  ;;  %v4324_v0 = vld [vmem:[#allocation3 + $0x12] sm:$0xff]  ;;  %v8501_v35 = vld [vmem:[%s10432_s5 + $0x4a0] sm:$0xff] }
 0x2f4   : > { %4477 = vmatpush.bf16.msra.mxu1 %v8459_v14  ;;  %v3324_v11 = vpop.f32.mrf.mxu1  ;;  %4074 = vmatpush.bf16.msrb.mxu3 %v8417_v46  ;;  %v8487_v7 = vld [vmem:[%s10432_s5 + $0x430] sm:$0xff]  ;;  %v4325_v36 = vpack.c.bf16 %v4324_v0, %v4324_v0  ;;  %v8442_v14 = vld [vmem:[%s10432_s5 + $0x2c8] sm:$0xff]  ;;  %v8509_v0 = vld [vmem:[%s10432_s5 + $0x4e0] sm:$0xff] }
 0x2f5   : > { %v3332_v50 = vadd.f32 %v3324_v11, %v3228_v39  ;;  %3670 = vmatmul.bf16.vlgmr.msra.gmra.mxu2 %v3596_v59  ;;  %v8486_v46 = vld [vmem:[%s10432_s5 + $0x428] sm:$0xff]  ;;  %v8465_v39 = vld [vmem:[%s10432_s5 + $0x380] sm:$0xff]  ;;  %v8480_v59 = vld [vmem:[%s10432_s5 + $0x3f8] sm:$0xff] }
 0x2f6   : > { %3913 = vmatmul.bf16.vlgmr.msrb.gmra.mxu0 %v3839_v22  ;;  %3990 = vmatpush.bf16.msrb.mxu2 %v8412_v8  ;;  %v8504_v22 = vld [vmem:[%s10432_s5 + $0x4b8] sm:$0xff]  ;;  %v8526_v11 = vld [vmem:[%s10432_s5 + $0x568] sm:$0xff] }
 0x2f7   : > { %4233 = vmatpush.bf16.msra.mxu0 %v8436_v31  ;;  %v3342_v53 = vadd.f32 %v9908_v27, %v3332_v50  ;;  %4075 = vmatmul.bf16.vlgmr.msrb.gmra.mxu3 %v4001_v44  ;;  %v8410_v27 = vld [vmem:[%s10432_s5 + $0x1c8] sm:$0xff]  ;;  %v8441_v31 = vld [vmem:[%s10432_s5 + $0x2c0] sm:$0xff]  ;;  %v4486_v48 = vld [vmem:[#allocation3 + $0x14] sm:$0xff] }
 0x2f8   : > { %4391 = vmatpush.bf16.msra.mxu3 %v8456_v60  ;;  %4478 = vmatpush.bf16.msra.mxu1 %v8458_v42  ;;  %v4243_v60 = vld [vmem:[#allocation3 + $0x11] sm:$0xff]  ;;  %v8485_v42 = vld [vmem:[%s10432_s5 + $0x420] sm:$0xff] }
 0x2f9   : > { %v3348_v33 = vmax.f32 %v3342_v53, 0.0  ;;  %v4244_v50 = vpack.c.bf16 %v4243_v60, %v4243_v60  ;;  %v8503_v44 = vld [vmem:[%s10432_s5 + $0x4b0] sm:$0xff]  ;;  %v8484_v53 = vld [vmem:[%s10432_s5 + $0x418] sm:$0xff] }
 0x2fa   : > { %3991 = vmatpush.bf16.msrb.mxu2 %v8411_v13  ;;  %v4729_v16 = vld [vmem:[#allocation3 + $0x1a] sm:$0xff]  ;;  %v4487_v13 = vpack.c.bf16 %v4486_v48, %v4486_v48 }
 0x2fb   : > { %4234 = vmatpush.bf16.msra.mxu0 %v8435_v29  ;;  %3354 = vst [vmem:[#allocation3 + $0x28] sm:$0xff] %v3348_v33  ;;  %v4730_v8 = vpack.c.bf16 %v4729_v16, %v4729_v16  ;;  %v8479_v29 = vld [vmem:[%s10432_s5 + $0x3f0] sm:$0xff]  ;;  %v8544_v60 = vld [vmem:[%s10432_s5 + $0x5f8] sm:$0xff] }
 0x2fc   : > { %4392 = vmatpush.bf16.msra.mxu3 %v8455_v56  ;;  %4479 = vmatpush.bf16.msra.mxu1 %v8457_v25  ;;  %v8525_v56 = vld [vmem:[%s10432_s5 + $0x560] sm:$0xff]  ;;  %v8478_v25 = vld [vmem:[%s10432_s5 + $0x3e8] sm:$0xff]  ;;  %v8483_v33 = vld [vmem:[%s10432_s5 + $0x410] sm:$0xff] }
 0x2fd   : > { %v8507_v16 = vld [vmem:[%s10432_s5 + $0x4d0] sm:$0xff]  ;;  %v4891_v48 = vld [vmem:[#allocation3 + $0x1c] sm:$0xff] }
 0x2fe   : > { %3992 = vmatpush.bf16.msrb.mxu2 %v8410_v27  ;;  %v8524_v27 = vld [vmem:[%s10432_s5 + $0x558] sm:$0xff] }
 0x2ff   : > { %4235 = vmatpush.bf16.msra.mxu0 %v8434_v15  ;;  %4480 = vmatmul.bf16.vlgmr.msra.gmra.mxu1 %v4406_v58  ;;  %v8477_v15 = vld [vmem:[%s10432_s5 + $0x3e0] sm:$0xff]  ;;  %v8476_v58 = vld [vmem:[%s10432_s5 + $0x3d8] sm:$0xff] }
 0x300   : > { %4796 = vmatpush.bf16.msrb.mxu1 %v8496_v10  ;;  %4393 = vmatpush.bf16.msra.mxu3 %v8454_v51  ;;  %v8502_v10 = vld [vmem:[%s10432_s5 + $0x4a8] sm:$0xff] }
 0x301   : > { %v8482_v51 = vld [vmem:[%s10432_s5 + $0x408] sm:$0xff] }
 0x302   : > { %3993 = vmatpush.bf16.msrb.mxu2 %v8409_v54  ;;  %v8500_v54 = vld [vmem:[%s10432_s5 + $0x498] sm:$0xff] }
 0x303   : > { %4236 = vmatpush.bf16.msra.mxu0 %v8433_v18  ;;  %v8481_v18 = vld [vmem:[%s10432_s5 + $0x400] sm:$0xff] }
 0x304   : > { %4797 = vmatpush.bf16.msrb.mxu1 %v8495_v34  ;;  %4394 = vmatpush.bf16.msra.mxu3 %v8453_v21  ;;  %v8523_v34 = vld [vmem:[%s10432_s5 + $0x550] sm:$0xff] }
 0x305   : > { %3994 = vmatmul.bf16.vlgmr.msrb.gmra.mxu2 %v3920_v38  ;;  %v8499_v21 = vld [vmem:[%s10432_s5 + $0x490] sm:$0xff]  ;;  %v8521_v38 = vld [vmem:[%s10432_s5 + $0x540] sm:$0xff] }
 0x306   : > { %4310 = vmatpush.bf16.msra.mxu2 %v8448_v41  ;;  %4237 = vmatmul.bf16.vlgmr.msra.gmra.mxu0 %v4163_v63  ;;  %v8522_v41 = vld [vmem:[%s10432_s5 + $0x548] sm:$0xff]  ;;  %v8519_v63 = vld [vmem:[%s10432_s5 + $0x530] sm:$0xff] }
 0x307   : > { %4553 = vmatpush.bf16.msrb.mxu0 %v8472_v47  ;;  %v8520_v47 = vld [vmem:[%s10432_s5 + $0x538] sm:$0xff] }
 0x308   : > { %4798 = vmatpush.bf16.msrb.mxu1 %v8494_v57  ;;  %4395 = vmatpush.bf16.msra.mxu3 %v8452_v40  ;;  %v4648_v57 = vld [vmem:[#allocation3 + $0x19] sm:$0xff]  ;;  %v8498_v40 = vld [vmem:[%s10432_s5 + $0x488] sm:$0xff] }
 0x30a   : > { %4311 = vmatpush.bf16.msra.mxu2 %v8447_v5  ;;  %v4649_v5 = vpack.c.bf16 %v4648_v57, %v4648_v57 }
 0x30b   : > { %4554 = vmatpush.bf16.msrb.mxu0 %v8471_v12  ;;  %v8474_v12 = vld [vmem:[%s10432_s5 + $0x3c8] sm:$0xff] }
 0x30c   : > { %4799 = vmatpush.bf16.msrb.mxu1 %v8493_v61  ;;  %4396 = vmatpush.bf16.msra.mxu3 %v8451_v4  ;;  %v5053_v61 = vld [vmem:[#allocation3 + $0x21] sm:$0xff] }
 0x30d   : > { %v8473_v4 = vld [vmem:[%s10432_s5 + $0x3c0] sm:$0xff] }
 0x30e   : > { %4312 = vmatpush.bf16.msra.mxu2 %v8446_v19  ;;  %v8518_v19 = vld [vmem:[%s10432_s5 + $0x528] sm:$0xff] }
 0x30f   : > { %4555 = vmatpush.bf16.msrb.mxu0 %v8470_v62  ;;  %v5054_v62 = vpack.c.bf16 %v5053_v61, %v5053_v61  ;;  %v8537_v61 = vld [vmem:[%s10432_s5 + $0x5c0] sm:$0xff] }
 0x310   : > { %4800 = vmatpush.bf16.msrb.mxu1 %v8492_v43  ;;  %4397 = vmatpush.bf16.msra.mxu3 %v8450_v20  ;;  %v8497_v43 = vld [vmem:[%s10432_s5 + $0x480] sm:$0xff] }
 0x311   : > { %v4810_v20 = vld [vmem:[#allocation3 + $0x1b] sm:$0xff] }
 0x312   : > { %4313 = vmatpush.bf16.msra.mxu2 %v8445_v9  ;;  %v8512_v9 = vld [vmem:[%s10432_s5 + $0x4f8] sm:$0xff] }
 0x313   : > { %4556 = vmatpush.bf16.msrb.mxu0 %v8469_v45  ;;  %v8536_v45 = vld [vmem:[%s10432_s5 + $0x5b8] sm:$0xff] }
 0x314   : > { %4801 = vmatpush.bf16.msrb.mxu1 %v8491_v2  ;;  %4398 = vmatpush.bf16.msra.mxu3 %v8449_v6  ;;  %v8517_v2 = vld [vmem:[%s10432_s5 + $0x520] sm:$0xff]  ;;  %v8511_v6 = vld [vmem:[%s10432_s5 + $0x4f0] sm:$0xff] }
 0x316   : > { %4314 = vmatpush.bf16.msra.mxu2 %v8444_v55  ;;  %v4568_v55 = vpack.c.bf16 %v9983_v52, %v9983_v52  ;;  %v8510_v52 = vld [vmem:[%s10432_s5 + $0x4e8] sm:$0xff] }
 0x317   : > { %4557 = vmatpush.bf16.msrb.mxu0 %v8468_v17  ;;  %4399 = vmatmul.bf16.vlgmr.msra.gmra.mxu3 %v4325_v36  ;;  %v4811_v17 = vpack.c.bf16 %v4810_v20, %v4810_v20  ;;  %v8532_v36 = vld [vmem:[%s10432_s5 + $0x598] sm:$0xff] }
 0x318   : > { %4802 = vmatpush.bf16.msrb.mxu1 %v8490_v49  ;;  %4715 = vmatpush.bf16.msrb.mxu3 %v8488_v26  ;;  %v8535_v49 = vld [vmem:[%s10432_s5 + $0x5b0] sm:$0xff]  ;;  %v8516_v26 = vld [vmem:[%s10432_s5 + $0x518] sm:$0xff] }
 0x31a   : > { %4315 = vmatpush.bf16.msra.mxu2 %v8443_v3  ;;  %v8534_v3 = vld [vmem:[%s10432_s5 + $0x5a8] sm:$0xff] }
 0x31b   : > { %4558 = vmatpush.bf16.msrb.mxu0 %v8467_v1  ;;  %v8515_v1 = vld [vmem:[%s10432_s5 + $0x510] sm:$0xff] }
 0x31c   : > { %4803 = vmatpush.bf16.msrb.mxu1 %v8489_v37  ;;  %4716 = vmatpush.bf16.msrb.mxu3 %v8487_v7  ;;  %v8533_v37 = vld [vmem:[%s10432_s5 + $0x5a0] sm:$0xff]  ;;  %v8514_v7 = vld [vmem:[%s10432_s5 + $0x508] sm:$0xff] }
 0x31e   : > { %4316 = vmatpush.bf16.msra.mxu2 %v8442_v14  ;;  %v8513_v14 = vld [vmem:[%s10432_s5 + $0x500] sm:$0xff] }
 0x31f   : > { %4559 = vmatpush.bf16.msrb.mxu0 %v8466_v32  ;;  %4804 = vmatmul.bf16.vlgmr.msrb.gmra.mxu1 %v4730_v8  ;;  %v8552_v32 = vld [vmem:[%s10432_s5 + $0x638] sm:$0xff]  ;;  %v4973_v8 = vpack.c.bf16 %v10011_v28, %v10011_v28  ;;  %v8505_v28 = vld [vmem:[%s10432_s5 + $0x4c0] sm:$0xff] }
 0x320   : > { %5120 = vmatpush.bf16.msra.mxu1 %v8528_v30  ;;  %4717 = vmatpush.bf16.msrb.mxu3 %v8486_v46  ;;  %v8508_v30 = vld [vmem:[%s10432_s5 + $0x4d8] sm:$0xff]  ;;  %v8531_v46 = vld [vmem:[%s10432_s5 + $0x590] sm:$0xff] }
 0x322   : > { %4317 = vmatpush.bf16.msra.mxu2 %v8441_v31  ;;  %v8506_v31 = vld [vmem:[%s10432_s5 + $0x4c8] sm:$0xff] }
 0x323   : > { %4560 = vmatpush.bf16.msrb.mxu0 %v8465_v39  ;;  %v8530_v39 = vld [vmem:[%s10432_s5 + $0x588] sm:$0xff] }
 0x324   : > { %5121 = vmatpush.bf16.msra.mxu1 %v8527_v24  ;;  %4718 = vmatpush.bf16.msrb.mxu3 %v8485_v42  ;;  %v8551_v24 = vld [vmem:[%s10432_s5 + $0x630] sm:$0xff]  ;;  %v5134_v42 = vld [vmem:[#allocation3 + $0x22] sm:$0xff] }
 0x325   : > { %4318 = vmatmul.bf16.vlgmr.msra.gmra.mxu2 %v4244_v50 }
 0x326   : > { %4634 = vmatpush.bf16.msrb.mxu2 %v8480_v59  ;;  %4561 = vmatmul.bf16.vlgmr.msrb.gmra.mxu0 %v4487_v13  ;;  %v8550_v59 = vld [vmem:[%s10432_s5 + $0x628] sm:$0xff]  ;;  %v4892_v13 = vpack.c.bf16 %v4891_v48, %v4891_v48 }
 0x327   : > { %4877 = vmatpush.bf16.msra.mxu0 %v8504_v22  ;;  %v8529_v22 = vld [vmem:[%s10432_s5 + $0x580] sm:$0xff] }
 0x328   : > { %5122 = vmatpush.bf16.msra.mxu1 %v8526_v11  ;;  %4719 = vmatpush.bf16.msrb.mxu3 %v8484_v53  ;;  %v8549_v11 = vld [vmem:[%s10432_s5 + $0x620] sm:$0xff] }
 0x32a   : > { %4635 = vmatpush.bf16.msrb.mxu2 %v8479_v29  ;;  %v5135_v29 = vpack.c.bf16 %v5134_v42, %v5134_v42 }
 0x32b   : > { %4878 = vmatpush.bf16.msra.mxu0 %v8503_v44  ;;  %v8543_v44 = vld [vmem:[%s10432_s5 + $0x5f0] sm:$0xff] }
 0x32c   : > { %5123 = vmatpush.bf16.msra.mxu1 %v8525_v56  ;;  %4720 = vmatpush.bf16.msrb.mxu3 %v8483_v33  ;;  %v8548_v56 = vld [vmem:[%s10432_s5 + $0x618] sm:$0xff] }
 0x32e   : > { %4636 = vmatpush.bf16.msrb.mxu2 %v8478_v25  ;;  %v8542_v25 = vld [vmem:[%s10432_s5 + $0x5e8] sm:$0xff] }
 0x32f   : > { %4879 = vmatpush.bf16.msra.mxu0 %v8502_v10  ;;  %v8547_v10 = vld [vmem:[%s10432_s5 + $0x610] sm:$0xff] }
 0x330   : > { %5124 = vmatpush.bf16.msra.mxu1 %v8524_v27  ;;  %4721 = vmatpush.bf16.msrb.mxu3 %v8482_v51  ;;  %v8546_v51 = vld [vmem:[%s10432_s5 + $0x608] sm:$0xff] }
 0x332   : > { %4637 = vmatpush.bf16.msrb.mxu2 %v8477_v15  ;;  %v8541_v15 = vld [vmem:[%s10432_s5 + $0x5e0] sm:$0xff] }
 0x333   : > { %4880 = vmatpush.bf16.msra.mxu0 %v8501_v35 }
 0x334   : > { %5125 = vmatpush.bf16.msra.mxu1 %v8523_v34  ;;  %4722 = vmatpush.bf16.msrb.mxu3 %v8481_v18  ;;  %v8540_v34 = vld [vmem:[%s10432_s5 + $0x5d8] sm:$0xff] }
 0x336   : > { %4638 = vmatpush.bf16.msrb.mxu2 %v8476_v58  ;;  %v8545_v58 = vld [vmem:[%s10432_s5 + $0x600] sm:$0xff] }
 0x337   : > { %4881 = vmatpush.bf16.msra.mxu0 %v8500_v54  ;;  %4723 = vmatmul.bf16.vlgmr.msrb.gmra.mxu3 %v4649_v5  ;;  %v8538_v5 = vld [vmem:[%s10432_s5 + $0x5c8] sm:$0xff] }
 0x338   : > { %5126 = vmatpush.bf16.msra.mxu1 %v8522_v41  ;;  %5039 = vmatpush.bf16.msra.mxu3 %v8520_v47  ;;  %v5296_v41 = vld [vmem:[#allocation3 + $0x24] sm:$0xff] }
 0x33a   : > { %4639 = vmatpush.bf16.msrb.mxu2 %v8475_v23  ;;  %v8539_v23 = vld [vmem:[%s10432_s5 + $0x5d0] sm:$0xff] }
 0x33b   : > { %4882 = vmatpush.bf16.msra.mxu0 %v8499_v21 }
 0x33c   : > { %5127 = vmatpush.bf16.msra.mxu1 %v8521_v38  ;;  %5040 = vmatpush.bf16.msra.mxu3 %v8519_v63  ;;  %v5297_v63 = vpack.c.bf16 %v5296_v41, %v5296_v41 }
 0x33e   : > { %4640 = vmatpush.bf16.msrb.mxu2 %v8474_v12 }
 0x33f   : > { %4883 = vmatpush.bf16.msra.mxu0 %v8498_v40  ;;  %5128 = vmatmul.bf16.vlgmr.msra.gmra.mxu1 %v5054_v62 }
 0x340   : > { %5041 = vmatpush.bf16.msra.mxu3 %v8518_v19 }
 0x342   : > { %4641 = vmatpush.bf16.msrb.mxu2 %v8473_v4  ;;  %v5215_v4 = vld [vmem:[#allocation3 + $0x23] sm:$0xff] }
 0x343   : > { %4884 = vmatpush.bf16.msra.mxu0 %v8497_v43  ;;  %v5216_v43 = vpack.c.bf16 %v5215_v4, %v5215_v4  ;;  %v8566_v4 = vld [vmem:[%s10436_s9 + $0x28] sm:$0xff] }
 0x344   : > { %5042 = vmatpush.bf16.msra.mxu3 %v8517_v2 }
 0x345   : > { %4642 = vmatmul.bf16.vlgmr.msrb.gmra.mxu2 %v4568_v55 }
 0x346   : > { %4958 = vmatpush.bf16.msra.mxu2 %v8512_v9  ;;  %4885 = vmatmul.bf16.vlgmr.msra.gmra.mxu0 %v4811_v17 }
 0x347   : > { %5201 = vmatpush.bf16.msrb.mxu0 %v8536_v45 }
 0x348   : > { %5043 = vmatpush.bf16.msra.mxu3 %v8516_v26 }
 0x34a   : > { %4959 = vmatpush.bf16.msra.mxu2 %v8511_v6 }
 0x34b   : > { %5202 = vmatpush.bf16.msrb.mxu0 %v8535_v49 }
 0x34c   : > { %5044 = vmatpush.bf16.msra.mxu3 %v8515_v1 }
 0x34e   : > { %4960 = vmatpush.bf16.msra.mxu2 %v8510_v52 }
 0x34f   : > { %5203 = vmatpush.bf16.msrb.mxu0 %v8534_v3 }
 0x350   : > { %5045 = vmatpush.bf16.msra.mxu3 %v8514_v7 }
 0x352   : > { %4961 = vmatpush.bf16.msra.mxu2 %v8509_v0 }
 0x353   : > { %5204 = vmatpush.bf16.msrb.mxu0 %v8533_v37 }
 0x354   : > { %5046 = vmatpush.bf16.msra.mxu3 %v8513_v14 }
 0x356   : > { %4962 = vmatpush.bf16.msra.mxu2 %v8508_v30 }
 0x357   : > { %5205 = vmatpush.bf16.msrb.mxu0 %v8532_v36  ;;  %5047 = vmatmul.bf16.vlgmr.msra.gmra.mxu3 %v4973_v8 }
 0x358   : > { %5363 = vmatpush.bf16.msrb.mxu3 %v8552_v32  ;;  %v3510_v50 = vpop.f32.mrf.mxu3 }
 0x35a   : > { %4963 = vmatpush.bf16.msra.mxu2 %v8507_v16  ;;  %v3833_v53 = vpop.f32.mrf.mxu1 }
 0x35b   : > { %5206 = vmatpush.bf16.msrb.mxu0 %v8531_v46 }
 0x35c   : > { %5364 = vmatpush.bf16.msrb.mxu3 %v8551_v24 }
 0x35e   : > { %4964 = vmatpush.bf16.msra.mxu2 %v8506_v31 }
 0x35f   : > { %5207 = vmatpush.bf16.msrb.mxu0 %v8530_v39 }
 0x360   : > { %5365 = vmatpush.bf16.msrb.mxu3 %v8550_v59  ;;  %v3512_v33 = vpop.f32.mrf.mxu3 }
 0x362   : > { %4965 = vmatpush.bf16.msra.mxu2 %v8505_v28  ;;  %v3835_v35 = vpop.f32.mrf.mxu1 }
 0x363   : > { %5208 = vmatpush.bf16.msrb.mxu0 %v8529_v22  ;;  %v3590_v27 = vpop.f32.mrf.mxu0 }
 0x364   : > { %5366 = vmatpush.bf16.msrb.mxu3 %v8549_v11 }
 0x365   : > { %4966 = vmatmul.bf16.vlgmr.msra.gmra.mxu2 %v4892_v13 }
 0x366   : > { %5282 = vmatpush.bf16.msrb.mxu2 %v8544_v60  ;;  %5209 = vmatmul.bf16.vlgmr.msrb.gmra.mxu0 %v5135_v29 }
 0x368   : > { %5367 = vmatpush.bf16.msrb.mxu3 %v8548_v56  ;;  %v3449_v54 = vpop.f32.mrf.mxu2 }
 0x369   : > { %v3511_v18 = vadd.f32 %v3510_v50, %v3449_v54  ;;  %v8556_v54 = vld [vmem:[%s10434_s7 + $0x18] sm:$0xff] }
 0x36a   : > { %5283 = vmatpush.bf16.msrb.mxu2 %v8543_v44  ;;  %v3752_v21 = vpop.f32.mrf.mxu3  ;;  %v4157_v57 = vpop.f32.mrf.mxu1 }
 0x36b   : > { %v3592_v47 = vpop.f32.mrf.mxu0  ;;  %v3594_v38 = vadd.f32 %v3590_v27, %v3511_v18  ;;  %v8560_v27 = vld [vmem:[%s10434_s7 + $0x38] sm:$0xff] }
 0x36c   : > { %5368 = vmatpush.bf16.msrb.mxu3 %v8547_v10  ;;  %5452 = vmatpush.bf16.msrb.mxu1 %v8560_v27 }
 0x36e   : > { %5284 = vmatpush.bf16.msrb.mxu2 %v8542_v25 }
 0x370   : > { %5369 = vmatpush.bf16.msrb.mxu3 %v8546_v51  ;;  %v3451_v12 = vpop.f32.mrf.mxu2  ;;  %v8558_v51 = vld [vmem:[%s10434_s7 + $0x28] sm:$0xff] }
 0x371   : > { %v8554_v12 = vld [vmem:[%s10434_s7 + $0x8] sm:$0xff] }
 0x372   : > { %5285 = vmatpush.bf16.msrb.mxu2 %v8541_v15  ;;  %v3754_v19 = vpop.f32.mrf.mxu3  ;;  %v4159_v62 = vpop.f32.mrf.mxu1  ;;  %v8559_v15 = vld [vmem:[%s10434_s7 + $0x30] sm:$0xff] }
 0x373   : > { %v3914_v40 = vpop.f32.mrf.mxu0  ;;  %5453 = vmatpush.bf16.msrb.mxu1 %v8559_v15  ;;  %v8568_v19 = vld [vmem:[%s10436_s9 + $0x38] sm:$0xff]  ;;  %v8567_v62 = vld [vmem:[%s10436_s9 + $0x30] sm:$0xff] }
 0x374   : > { %5370 = vmatpush.bf16.msrb.mxu3 %v8545_v58  ;;  %5535 = vmatpush.bf16.msra.mxu0 %v8568_v19 }
 0x376   : > { %5286 = vmatpush.bf16.msrb.mxu2 %v8540_v34  ;;  %v8557_v34 = vld [vmem:[%s10434_s7 + $0x20] sm:$0xff] }
 0x377   : > { %5371 = vmatmul.bf16.vlgmr.msrb.gmra.mxu3 %v5297_v63  ;;  %5454 = vmatpush.bf16.msrb.mxu1 %v8558_v51 }
 0x378   : > { %v3671_v9 = vpop.f32.mrf.mxu2  ;;  %5536 = vmatpush.bf16.msra.mxu0 %v8567_v62 }
 0x379   : > { %v3675_v45 = vadd.f32 %v3671_v9, %v3594_v38  ;;  %v8565_v9 = vld [vmem:[%s10436_s9 + $0x20] sm:$0xff] }
 0x37a   : > { %5287 = vmatpush.bf16.msrb.mxu2 %v8539_v23  ;;  %v4076_v55 = vpop.f32.mrf.mxu3 }
 0x37b   : > { %v3916_v20 = vpop.f32.mrf.mxu0  ;;  %v3756_v2 = vadd.f32 %v3752_v21, %v3675_v45  ;;  %5455 = vmatpush.bf16.msrb.mxu1 %v8557_v34  ;;  %v8564_v45 = vld [vmem:[%s10436_s9 + $0x18] sm:$0xff] }
 0x37c   : > { %v4481_v17 = vpop.f32.mrf.mxu1  ;;  %5537 = vmatpush.bf16.msra.mxu0 %v8566_v4 }
 0x37d   : > { %v3837_v6 = vadd.f32 %v3833_v53, %v3756_v2  ;;  %v8563_v2 = vld [vmem:[%s10436_s9 + $0x10] sm:$0xff] }
 0x37e   : > { %5288 = vmatpush.bf16.msrb.mxu2 %v8538_v5 }
 0x37f   : > { %v3918_v49 = vadd.f32 %v3914_v40, %v3837_v6  ;;  %5456 = vmatpush.bf16.msrb.mxu1 %v8556_v54  ;;  %v8553_v40 = vld [vmem:[%s10434_s7] sm:$0xff] }
 0x380   : > { %v3673_v26 = vpop.f32.mrf.mxu2  ;;  %5538 = vmatpush.bf16.msra.mxu0 %v8565_v9 }
 0x382   : > { %5289 = vmatpush.bf16.msrb.mxu2 %v8537_v61  ;;  %v4078_v3 = vpop.f32.mrf.mxu3 }
 0x383   : > { %v4238_v52 = vpop.f32.mrf.mxu0 }
 0x384   : > { %v4483_v1 = vpop.f32.mrf.mxu1  ;;  %5539 = vmatpush.bf16.msra.mxu0 %v8564_v45 }
 0x385   : > { %5290 = vmatmul.bf16.vlgmr.msrb.gmra.mxu2 %v5216_v43 }
 0x388   : > { %v3995_v0 = vpop.f32.mrf.mxu2  ;;  %5540 = vmatpush.bf16.msra.mxu0 %v8563_v2 }
 0x389   : > { %v3999_v37 = vadd.f32 %v3995_v0, %v3918_v49  ;;  %v8581_v49 = vld [vmem:[%s10433_s6] ss:$0 sm:$0xff] }
 0x38b   : > { %v4240_v7 = vpop.f32.mrf.mxu0  ;;  %v4080_v30 = vadd.f32 %v4076_v55, %v3999_v37  ;;  %v8562_v37 = vld [vmem:[%s10436_s9 + $0x8] sm:$0xff] }
 0x38c   : > { %5541 = vmatpush.bf16.msra.mxu0 %v8562_v37  ;;  %v8561_v7 = vld [vmem:[%s10436_s9] sm:$0xff] }
 0x38d   : > { %v4161_v36 = vadd.f32 %v4157_v57, %v4080_v30  ;;  %v8555_v57 = vld [vmem:[%s10434_s7 + $0x10] sm:$0xff]  ;;  %v8582_v30 = vld [vmem:[%s10435_s8] ss:$0 sm:$0xff] }
 0x38e   : > { %5457 = vmatpush.bf16.msrb.mxu1 %v8555_v57 }
 0x38f   : > { %v4242_v14 = vadd.f32 %v4238_v52, %v4161_v36 }
 0x390   : > { %v3997_v32 = vpop.f32.mrf.mxu2  ;;  %5542 = vmatpush.bf16.msra.mxu0 %v8561_v7 }
 0x392   : > { %5458 = vmatpush.bf16.msrb.mxu1 %v8554_v12 }
 0x396   : > { %5459 = vmatpush.bf16.msrb.mxu1 %v8553_v40 }
 0x39a   : > { %v4400_v46 = vpop.f32.mrf.mxu3 }
 0x39c   : > { %v4805_v16 = vpop.f32.mrf.mxu1 }
 0x3a2   : > { %v4402_v31 = vpop.f32.mrf.mxu3 }
 0x3a3   : > { %v4562_v24 = vpop.f32.mrf.mxu0 }
 0x3a4   : > { %v4807_v8 = vpop.f32.mrf.mxu1 }
 0x3a8   : > { %v4319_v39 = vpop.f32.mrf.mxu2 }
 0x3a9   : > { %v4323_v59 = vadd.f32 %v4319_v39, %v4242_v14 }
 0x3ab   : > { %v4564_v28 = vpop.f32.mrf.mxu0  ;;  %v4404_v22 = vadd.f32 %v4400_v46, %v4323_v59 }
 0x3ad   : > { %v4485_v60 = vadd.f32 %v4481_v17, %v4404_v22 }
 0x3af   : > { %v4566_v48 = vadd.f32 %v4562_v24, %v4485_v60  ;;  %v8583_v24 = vld [vmem:[%s10437_s10] ss:$0 sm:$0xff] }
 0x3b0   : > { %v4321_v42 = vpop.f32.mrf.mxu2 }
 0x3ba   : > { %v4724_v50 = vpop.f32.mrf.mxu3 }
 0x3bc   : > { %v5129_v11 = vpop.f32.mrf.mxu1 }
 0x3c2   : > { %v4726_v44 = vpop.f32.mrf.mxu3 }
 0x3c3   : > { %v4886_v13 = vpop.f32.mrf.mxu0 }
 0x3c4   : > { %v5131_v29 = vpop.f32.mrf.mxu1 }
 0x3c8   : > { %v4643_v53 = vpop.f32.mrf.mxu2 }
 0x3c9   : > { %v4647_v56 = vadd.f32 %v4643_v53, %v4566_v48 }
 0x3cb   : > { %v4888_v25 = vpop.f32.mrf.mxu0  ;;  %v4728_v10 = vadd.f32 %v4724_v50, %v4647_v56 }
 0x3cd   : > { %v4809_v33 = vadd.f32 %v4805_v16, %v4728_v10 }
 0x3cf   : > { %v4890_v47 = vadd.f32 %v4886_v13, %v4809_v33 }
 0x3d0   : > { %v4645_v35 = vpop.f32.mrf.mxu2 }
 0x3da   : > { %v5048_v58 = vpop.f32.mrf.mxu3 }
 0x3e2   : > { %v5050_v41 = vpop.f32.mrf.mxu3 }
 0x3e3   : > { %v5210_v18 = vpop.f32.mrf.mxu0 }
 0x3e8   : > { %v4967_v23 = vpop.f32.mrf.mxu2 }
 0x3e9   : > { %v4971_v21 = vadd.f32 %v4967_v23, %v4890_v47 }
 0x3eb   : > { %v5212_v38 = vpop.f32.mrf.mxu0  ;;  %v5052_v63 = vadd.f32 %v5048_v58, %v4971_v21 }
 0x3ed   : > { %v5133_v5 = vadd.f32 %v5129_v11, %v5052_v63 }
 0x3ef   : > { %v5214_v55 = vadd.f32 %v5210_v18, %v5133_v5 }
 0x3f0   : > { %v4969_v61 = vpop.f32.mrf.mxu2 }
 0x3fa   : > { %v5372_v43 = vpop.f32.mrf.mxu3 }
 0x402   : > { %v5374_v20 = vpop.f32.mrf.mxu3 }
 0x408   : > { %v5291_v17 = vpop.f32.mrf.mxu2 }
 0x409   : > { %v5295_v6 = vadd.f32 %v5291_v17, %v5214_v55 }
 0x40b   : > { %v5376_v26 = vadd.f32 %v5372_v43, %v5295_v6 }
 0x40d   : > { %v5381_v52 = vadd.f32 %v8581_v49, %v5376_v26 }
 0x40f   : > { %v5382_v3 = vmax.f32 %v5381_v52, 0.0 }
 0x410   : > { %v5293_v1 = vpop.f32.mrf.mxu2 }
 0x411   : > { %v5383_v0 = vpack.c.bf16 %v5382_v3, %v5382_v3 }
 0x413   : > { %5460 = vmatmul.bf16.vlgmr.msrb.gmra.mxu1 %v5383_v0 }
 0x490   : > { %v5461_v36 = vpop.f32.mrf.mxu1 }
 0x491   : > { %v5462_v14 = vadd.f32 %v8582_v30, %v5461_v36 }
 0x493   : > { %v5465_v32 = vmax.f32 %v5462_v14, 0.0 }
 0x495   : > { %v5466_v16 = vpack.c.bf16 %v5465_v32, %v5465_v32 }
 0x497   : > { %5543 = vmatmul.bf16.vlgmr.msra.gmra.mxu0 %v5466_v16 }
 0x498   : > { %v5463_v46 = vpop.f32.mrf.mxu1 }
 0x514   : > { %v5544_v8 = vpop.f32.mrf.mxu0 }
 0x515   : > { %v5545_v31 = vadd.f32 %v8583_v24, %v5544_v8 }
 0x517   : > { %5548 = vst [vmem:[%s384_s23] sm:$0xff] %v5545_v31 }
 0x51c   : > { %v5546_v39 = vpop.f32.mrf.mxu0 }
 0x51d PF: > { %s21_s17 = sadd.s32 1, %s8599_s17  }
 0x51e   : > { %p18_p4 = scmp.ge.s32.totalorder %s21_s17, 4  }
 0x520   :  { %20 = sbr.rel (!%p18_p4) target bundleno = 1 (0x1), region = 152 }

</bundles_post_ra>
